<compile_context>
chip_gen: v7x
topology: tpu7x:2x2x1
jax: 0.10.0
libtpu: 0.0.40
codegen_flags: <defaults>
</compile_context>

<pallas_src>
import jax
import jax.numpy as jnp
from jax.experimental import pallas as pl
from jax.experimental.pallas import tpu as pltpu


# ---------------------------------------------------------------------------
# Kernel
# ---------------------------------------------------------------------------
def _make_gru_kernel(n_layers, h_dim, t_steps):
    """Builds the kernel body for a fixed (static) layer count / time block."""

    def kernel(*refs):
        # --- unpack refs (order must match wrapper) -----------------------
        idx = 0
        x_ref = refs[idx]; idx += 1            # (Ts, B, I)   current time block
        h0_ref = refs[idx]; idx += 1           # (L, B, H)    initial hidden (VMEM)
        layer_refs = []
        for _ in range(n_layers):
            layer_refs.append(refs[idx:idx + 3])   # wx (d_in,3H), bx (1,3H), wh (H,3H)
            idx += 3
        why_ref = refs[idx]; idx += 1          # (H, O_pad)
        by_ref = refs[idx]; idx += 1           # (1, O_pad)
        y_ref = refs[idx]; idx += 1            # (Ts, B, O_pad) output time block
        hout_ref = refs[idx]; idx += 1         # (L, B, H)    final hidden state
        hstate = refs[idx]                     # VMEM scratch (L, B, H) f32 carry

        tb = pl.program_id(0)
        H = h_dim

        # Initialize the hidden-state carry on the first time block.
        @pl.when(tb == 0)
        def _():
            hstate[...] = h0_ref[...].astype(jnp.float32)

        def step(t, carry):
            x = x_ref[t].astype(jnp.float32)          # (B, I)
            for k in range(n_layers):                 # statically unrolled over layers
                wx_ref, bx_ref, wh_ref = layer_refs[k]
                h = hstate[k]                          # (B, H) f32
                # Fused gate GEMMs: (B, d_in) @ (d_in, 3H) and (B, H) @ (H, 3H).
                gx = jnp.dot(x.astype(wx_ref.dtype), wx_ref[...],
                             preferred_element_type=jnp.float32) + bx_ref[...]
                gh = jnp.dot(h.astype(wh_ref.dtype), wh_ref[...],
                             preferred_element_type=jnp.float32)
                z = jax.nn.sigmoid(gx[:, 0 * H:1 * H] + gh[:, 0 * H:1 * H])
                r = jax.nn.sigmoid(gx[:, 1 * H:2 * H] + gh[:, 1 * H:2 * H])
                g = jnp.tanh(gx[:, 2 * H:3 * H] + r * gh[:, 2 * H:3 * H])
                h_new = g + z * (h - g)                # ht = new + update * (h - new)
                hstate[k] = h_new
                x = h_new
                # TODO(synk): inter-layer dropout not applied (module default dropout=0).
            # Lane-dense output projection (O padded to a multiple of 128).
            y = jnp.dot(x.astype(why_ref.dtype), why_ref[...],
                        preferred_element_type=jnp.float32) + by_ref[...]
            y_ref[t] = y.astype(y_ref.dtype)
            return carry

        jax.lax.fori_loop(0, t_steps, step, 0, unroll=True)

        # Write the final hidden state exactly once, on the last time block.
        @pl.when(tb == pl.num_programs(0) - 1)
        def _():
            hout_ref[...] = hstate[...].astype(hout_ref.dtype)

    return kernel


# ---------------------------------------------------------------------------
# Wrapper
# ---------------------------------------------------------------------------
def multilayer_gru_forward(x, params, h0=None, *, weight_dtype=None, time_block=16):
    """Forward pass matching MultilayerGRU.forward.

    x            : (B, S, I) float32
    params       : dict with "layers" (list of per-layer weight dicts), "why", "by"
    h0           : optional (B, L, H) initial hidden state
    weight_dtype : optional dtype for the GEMM weights (e.g. jnp.bfloat16 on
                   v6e/v7x); None keeps the parameter dtype (f32 here).
    returns      : (layer_output (B, S, O), hidden_state (B, L, H))
    """
    B, S, I = x.shape
    layers = params["layers"]
    L = len(layers)
    H = layers[0]["whz"].shape[0]
    O = params["why"].shape[1]
    dtype = x.dtype
    wdt = params["why"].dtype if weight_dtype is None else weight_dtype

    # Pick a time-block size that divides S (keeps the in-kernel loop unrolled
    # and bounded; one grid step covers Ts timesteps).
    Ts = max(1, min(S, time_block))
    while S % Ts:
        Ts -= 1
    n_tb = S // Ts

    # Lane-dense output: pad O up to a multiple of 128.
    O_pad = ((O + 127) // 128) * 128

    if h0 is None:
        h0_lbh = jnp.zeros((L, B, H), dtype)
    else:
        h0_lbh = jnp.transpose(h0, (1, 0, 2)).astype(dtype)   # (B,L,H) -> (L,B,H)
    x_tm = jnp.transpose(x, (1, 0, 2))                         # (S, B, I)

    # --- assemble operands + specs ------------------------------------------
    # Constant-index operands (weights, biases, h0) are placed wholesale in
    # VMEM: one resident copy, no double-buffering.
    vmem_full = pl.BlockSpec(memory_space=pltpu.MemorySpace.VMEM)

    operands = [x_tm, h0_lbh]
    in_specs = [
        pl.BlockSpec((Ts, B, I), lambda tb: (tb, 0, 0)),       # x time block
        vmem_full,                                             # h0 (read once)
    ]
    for lp in layers:
        wx = jnp.concatenate([lp["wxz"], lp["wxr"], lp["wxg"]], axis=1).astype(wdt)   # (d_in, 3H)
        bx = jnp.concatenate([lp["bz"], lp["br"], lp["bg"]], axis=1).astype(jnp.float32)  # (1, 3H)
        wh = jnp.concatenate([lp["whz"], lp["whr"], lp["whg"]], axis=1).astype(wdt)   # (H, 3H)
        operands += [wx, bx, wh]
        in_specs += [vmem_full, vmem_full, vmem_full]

    why_p = jnp.zeros((H, O_pad), wdt).at[:, :O].set(params["why"].astype(wdt))
    by_p = jnp.zeros((1, O_pad), jnp.float32).at[:, :O].set(params["by"].astype(jnp.float32))
    operands += [why_p, by_p]
    in_specs += [vmem_full, vmem_full]

    out_shape = (jax.ShapeDtypeStruct((S, B, O_pad), dtype),
                 jax.ShapeDtypeStruct((L, B, H), dtype))
    out_specs = (pl.BlockSpec((Ts, B, O_pad), lambda tb: (tb, 0, 0)),
                 pl.BlockSpec((L, B, H), lambda tb: (0, 0, 0)))   # resident, written once

    kernel = _make_gru_kernel(L, H, Ts)

    y_tm, h_lbh = pl.pallas_call(
        kernel,
        out_shape=out_shape,
        grid_spec=pltpu.PrefetchScalarGridSpec(
            num_scalar_prefetch=0,
            grid=(n_tb,),
            in_specs=in_specs,
            out_specs=out_specs,
            scratch_shapes=[pltpu.VMEM((L, B, H), jnp.float32)],
        ),
        compiler_params=pltpu.CompilerParams(
            # Time recurrence is sequential. (For large H, also raise
            # vmem_limit_bytes and/or use bf16 weights to fit v7x's 64 MiB VMEM.)
            dimension_semantics=("arbitrary",)),
    )(*operands)

    layer_output = jnp.transpose(y_tm[:, :, :O], (1, 0, 2))   # (B, S, O)
    hidden_state = jnp.transpose(h_lbh, (1, 0, 2))            # (B, L, H)
    return layer_output, hidden_state


# ---------------------------------------------------------------------------
# Deterministic parameter init (mirrors GRUCell.__init__ uniform(-std, std))
# ---------------------------------------------------------------------------
def init_params(key, in_dim, h_dim, out_dim, n_layers):
    std = 1.0 / jnp.sqrt(jnp.float32(h_dim))
    layers = []
    for k in range(n_layers):
        d_in = in_dim if k == 0 else h_dim
        lp = {}
        for name, shape in (
            ("wxz", (d_in, h_dim)), ("wxr", (d_in, h_dim)), ("wxg", (d_in, h_dim)),
            ("bz", (1, h_dim)), ("br", (1, h_dim)), ("bg", (1, h_dim)),
            ("whz", (h_dim, h_dim)), ("whr", (h_dim, h_dim)), ("whg", (h_dim, h_dim)),
        ):
            key, sub = jax.random.split(key)
            lp[name] = jax.random.uniform(sub, shape, jnp.float32, -std, std)
        layers.append(lp)
    key, k1, k2 = jax.random.split(key, 3)
    std_y = 1.0 / jnp.sqrt(jnp.float32(h_dim))
    why = jax.random.uniform(k1, (h_dim, out_dim), jnp.float32, -std_y, std_y)
    by = jax.random.uniform(k2, (1, out_dim), jnp.float32, -std_y, std_y)
    return {"layers": layers, "why": why, "by": by}


# ---------------------------------------------------------------------------
# Pure-JAX reference (mirrors the PyTorch forward exactly)
# ---------------------------------------------------------------------------
def reference_forward(x, params, h0=None):
    B, S, _ = x.shape
    layers = params["layers"]
    L = len(layers)
    H = layers[0]["whz"].shape[0]
    states = [jnp.zeros((B, H), x.dtype) if h0 is None else h0[:, k, :]
              for k in range(L)]
    outs = []
    for t in range(S):
        xk = x[:, t, :]
        for k in range(L):
            lp = layers[k]
            h = states[k]
            z = jax.nn.sigmoid(xk @ lp["wxz"] + lp["bz"] + h @ lp["whz"])
            r = jax.nn.sigmoid(xk @ lp["wxr"] + lp["br"] + h @ lp["whr"])
            g = jnp.tanh(xk @ lp["wxg"] + lp["bg"] + r * (h @ lp["whg"]))
            states[k] = g + z * (h - g)
            xk = states[k]
        outs.append(xk @ params["why"] + params["by"])
    return jnp.stack(outs, axis=1), jnp.stack(states, axis=1)


# ---------------------------------------------------------------------------
if __name__ == "__main__":
    B, S, IN_DIM, H_DIM, OUT_DIM, N_LAYERS = 2, 8, 16, 32, 12, 2

    key = jax.random.PRNGKey(0)
    key, kx, kh, kp = jax.random.split(key, 4)
    x = jax.random.normal(kx, (B, S, IN_DIM), jnp.float32)
    h0 = jax.random.normal(kh, (B, N_LAYERS, H_DIM), jnp.float32)
    params = init_params(kp, IN_DIM, H_DIM, OUT_DIM, N_LAYERS)

    y, h_final = multilayer_gru_forward(x, params, h0)
    y = jax.block_until_ready(y)
    h_final = jax.block_until_ready(h_final)

    y_ref, h_ref = reference_forward(x, params, h0)
    assert y.shape == (B, S, OUT_DIM) and h_final.shape == (B, N_LAYERS, H_DIM)
    assert jnp.allclose(y, y_ref, atol=1e-4, rtol=1e-4)
    assert jnp.allclose(h_final, h_ref, atol=1e-4, rtol=1e-4)

    print("KERNEL_OK")
</pallas_src>

<mosaic_0001>
module attributes {stable_mosaic.version = 11 : i64} {
  func.func @kernel(%arg0: i32, %arg1: memref<8x2x16xf32, #tpu.memory_space<vmem>>, %arg2: memref<2x2x32xf32, #tpu.memory_space<vmem>>, %arg3: memref<16x96xf32, #tpu.memory_space<vmem>>, %arg4: memref<1x96xf32, #tpu.memory_space<vmem>>, %arg5: memref<32x96xf32, #tpu.memory_space<vmem>>, %arg6: memref<32x96xf32, #tpu.memory_space<vmem>>, %arg7: memref<1x96xf32, #tpu.memory_space<vmem>>, %arg8: memref<32x96xf32, #tpu.memory_space<vmem>>, %arg9: memref<32x128xf32, #tpu.memory_space<vmem>>, %arg10: memref<1x128xf32, #tpu.memory_space<vmem>>, %arg11: memref<8x2x128xf32, #tpu.memory_space<vmem>>, %arg12: memref<2x2x32xf32, #tpu.memory_space<vmem>>, %arg13: memref<2x2x32xf32, #tpu.memory_space<vmem>>) attributes {dimension_semantics = [#tpu.dimension_semantics<arbitrary>], iteration_bounds = array<i64: 1>, scalar_prefetch = 0 : i64, scratch_operands = 1 : i64, tpu.core_type = #tpu.core_type<tc>, window_params = [{transform_indices = @transform_0, window_bounds = array<i64: 8, 2, 16>}, {pipeline_mode = #tpu.pipeline_mode<synchronous>, transform_indices = @transform_1, window_bounds = array<i64: 2, 2, 32>}, {pipeline_mode = #tpu.pipeline_mode<synchronous>, transform_indices = @transform_2, window_bounds = array<i64: 16, 96>}, {pipeline_mode = #tpu.pipeline_mode<synchronous>, transform_indices = @transform_3, window_bounds = array<i64: 1, 96>}, {pipeline_mode = #tpu.pipeline_mode<synchronous>, transform_indices = @transform_4, window_bounds = array<i64: 32, 96>}, {pipeline_mode = #tpu.pipeline_mode<synchronous>, transform_indices = @transform_5, window_bounds = array<i64: 32, 96>}, {pipeline_mode = #tpu.pipeline_mode<synchronous>, transform_indices = @transform_6, window_bounds = array<i64: 1, 96>}, {pipeline_mode = #tpu.pipeline_mode<synchronous>, transform_indices = @transform_7, window_bounds = array<i64: 32, 96>}, {pipeline_mode = #tpu.pipeline_mode<synchronous>, transform_indices = @transform_8, window_bounds = array<i64: 32, 128>}, {pipeline_mode = #tpu.pipeline_mode<synchronous>, transform_indices = @transform_9, window_bounds = array<i64: 1, 128>}, {transform_indices = @transform_10, window_bounds = array<i64: 8, 2, 128>}, {pipeline_mode = #tpu.pipeline_mode<synchronous>, transform_indices = @transform_11, window_bounds = array<i64: 2, 2, 32>}]} {
    %c0_i32 = arith.constant 0 : i32
    %0 = arith.cmpi eq, %arg0, %c0_i32 : i32
    %1 = arith.extui %0 : i1 to i32
    %c0_i32_0 = arith.constant 0 : i32
    %2 = arith.cmpi ne, %1, %c0_i32_0 : i32
    scf.if %2 {
      %c0_329 = arith.constant 0 : index
      %c0_330 = arith.constant 0 : index
      %c0_331 = arith.constant 0 : index
      %678 = vector.load %arg2[%c0_329, %c0_330, %c0_331] : memref<2x2x32xf32, #tpu.memory_space<vmem>>, vector<2x2x32xf32>
      %c0_332 = arith.constant 0 : index
      %c0_333 = arith.constant 0 : index
      %c0_334 = arith.constant 0 : index
      %679 = vector.load %arg13[%c0_332, %c0_333, %c0_334] : memref<2x2x32xf32, #tpu.memory_space<vmem>>, vector<2x2x32xf32>
      tpu.vector_store %arg13[%c0_332, %c0_333, %c0_334], %678 {strides = array<i32>} : memref<2x2x32xf32, #tpu.memory_space<vmem>>, vector<2x2x32xf32>,
    } else {
    }
    %c0_i32_1 = arith.constant 0 : i32
    %3 = arith.index_cast %c0_i32_1 : i32 to index
    %c0 = arith.constant 0 : index
    %c0_2 = arith.constant 0 : index
    %4 = vector.load %arg1[%3, %c0, %c0_2] : memref<8x2x16xf32, #tpu.memory_space<vmem>>, vector<1x2x16xf32>
    %5 = vector.shape_cast %4 : vector<1x2x16xf32> to vector<2x16xf32>
    %c0_3 = arith.constant 0 : index
    %c0_4 = arith.constant 0 : index
    %c0_5 = arith.constant 0 : index
    %6 = vector.load %arg13[%c0_3, %c0_4, %c0_5] : memref<2x2x32xf32, #tpu.memory_space<vmem>>, vector<1x2x32xf32>
    %7 = vector.shape_cast %6 : vector<1x2x32xf32> to vector<2x32xf32>
    %c0_6 = arith.constant 0 : index
    %c0_7 = arith.constant 0 : index
    %8 = vector.load %arg3[%c0_6, %c0_7] : memref<16x96xf32, #tpu.memory_space<vmem>>, vector<16x96xf32>
    %cst = arith.constant dense<0.000000e+00> : vector<2x96xf32>
    %9 = tpu.matmul %5, %8, %cst {dimension_numbers = #tpu.dot_dimension_numbers<[1], [0], [0], [1], [0, 0, 1, 1], [], []>} : vector<2x16xf32>, vector<16x96xf32>, vector<2x96xf32> -> vector<2x96xf32>
    %c0_8 = arith.constant 0 : index
    %c0_9 = arith.constant 0 : index
    %10 = vector.load %arg4[%c0_8, %c0_9] : memref<1x96xf32, #tpu.memory_space<vmem>>, vector<1x96xf32>
    %11 = vector.broadcast %10 : vector<1x96xf32> to vector<2x96xf32>
    %12 = arith.addf %9, %11 : vector<2x96xf32>
    %c0_10 = arith.constant 0 : index
    %c0_11 = arith.constant 0 : index
    %13 = vector.load %arg5[%c0_10, %c0_11] : memref<32x96xf32, #tpu.memory_space<vmem>>, vector<32x96xf32>
    %cst_12 = arith.constant dense<0.000000e+00> : vector<2x96xf32>
    %14 = tpu.matmul %7, %13, %cst_12 {dimension_numbers = #tpu.dot_dimension_numbers<[1], [0], [0], [1], [0, 0, 1, 1], [], []>} : vector<2x32xf32>, vector<32x96xf32>, vector<2x96xf32> -> vector<2x96xf32>
    %15 = vector.extract_strided_slice %12 {offsets = [0, 0], sizes = [2, 32], strides = [1, 1]} : vector<2x96xf32> to vector<2x32xf32>
    %16 = vector.extract_strided_slice %14 {offsets = [0, 0], sizes = [2, 32], strides = [1, 1]} : vector<2x96xf32> to vector<2x32xf32>
    %17 = arith.addf %15, %16 : vector<2x32xf32>
    %18 = arith.negf %17 : vector<2x32xf32>
    %19 = math.exp %18 : vector<2x32xf32>
    %cst_13 = arith.constant 1.000000e+00 : f32
    %20 = vector.broadcast %cst_13 : f32 to vector<2x32xf32>
    %21 = arith.addf %20, %19 : vector<2x32xf32>
    %22 = arith.divf %20, %21 : vector<2x32xf32>
    %23 = vector.extract_strided_slice %12 {offsets = [0, 32], sizes = [2, 32], strides = [1, 1]} : vector<2x96xf32> to vector<2x32xf32>
    %24 = vector.extract_strided_slice %14 {offsets = [0, 32], sizes = [2, 32], strides = [1, 1]} : vector<2x96xf32> to vector<2x32xf32>
    %25 = arith.addf %23, %24 : vector<2x32xf32>
    %26 = arith.negf %25 : vector<2x32xf32>
    %27 = math.exp %26 : vector<2x32xf32>
    %cst_14 = arith.constant 1.000000e+00 : f32
    %28 = vector.broadcast %cst_14 : f32 to vector<2x32xf32>
    %29 = arith.addf %28, %27 : vector<2x32xf32>
    %30 = arith.divf %28, %29 : vector<2x32xf32>
    %31 = vector.extract_strided_slice %12 {offsets = [0, 64], sizes = [2, 32], strides = [1, 1]} : vector<2x96xf32> to vector<2x32xf32>
    %32 = vector.extract_strided_slice %14 {offsets = [0, 64], sizes = [2, 32], strides = [1, 1]} : vector<2x96xf32> to vector<2x32xf32>
    %33 = arith.mulf %30, %32 : vector<2x32xf32>
    %34 = arith.addf %31, %33 : vector<2x32xf32>
    %35 = math.tanh %34 : vector<2x32xf32>
    %36 = arith.subf %7, %35 : vector<2x32xf32>
    %37 = arith.mulf %22, %36 : vector<2x32xf32>
    %38 = arith.addf %35, %37 : vector<2x32xf32>
    %c0_15 = arith.constant 0 : index
    %c0_16 = arith.constant 0 : index
    %c0_17 = arith.constant 0 : index
    %39 = vector.load %arg13[%c0_15, %c0_16, %c0_17] : memref<2x2x32xf32, #tpu.memory_space<vmem>>, vector<1x2x32xf32>
    %40 = vector.shape_cast %39 : vector<1x2x32xf32> to vector<2x32xf32>
    %41 = vector.shape_cast %38 : vector<2x32xf32> to vector<1x2x32xf32>
    tpu.vector_store %arg13[%c0_15, %c0_16, %c0_17], %41 {strides = array<i32>} : memref<2x2x32xf32, #tpu.memory_space<vmem>>, vector<1x2x32xf32>,
    %c1 = arith.constant 1 : index
    %c0_18 = arith.constant 0 : index
    %c0_19 = arith.constant 0 : index
    %42 = vector.load %arg13[%c1, %c0_18, %c0_19] : memref<2x2x32xf32, #tpu.memory_space<vmem>>, vector<1x2x32xf32>
    %43 = vector.shape_cast %42 : vector<1x2x32xf32> to vector<2x32xf32>
    %c0_20 = arith.constant 0 : index
    %c0_21 = arith.constant 0 : index
    %44 = vector.load %arg6[%c0_20, %c0_21] : memref<32x96xf32, #tpu.memory_space<vmem>>, vector<32x96xf32>
    %cst_22 = arith.constant dense<0.000000e+00> : vector<2x96xf32>
    %45 = tpu.matmul %38, %44, %cst_22 {dimension_numbers = #tpu.dot_dimension_numbers<[1], [0], [0], [1], [0, 0, 1, 1], [], []>} : vector<2x32xf32>, vector<32x96xf32>, vector<2x96xf32> -> vector<2x96xf32>
    %c0_23 = arith.constant 0 : index
    %c0_24 = arith.constant 0 : index
    %46 = vector.load %arg7[%c0_23, %c0_24] : memref<1x96xf32, #tpu.memory_space<vmem>>, vector<1x96xf32>
    %47 = vector.broadcast %46 : vector<1x96xf32> to vector<2x96xf32>
    %48 = arith.addf %45, %47 : vector<2x96xf32>
    %c0_25 = arith.constant 0 : index
    %c0_26 = arith.constant 0 : index
    %49 = vector.load %arg8[%c0_25, %c0_26] : memref<32x96xf32, #tpu.memory_space<vmem>>, vector<32x96xf32>
    %cst_27 = arith.constant dense<0.000000e+00> : vector<2x96xf32>
    %50 = tpu.matmul %43, %49, %cst_27 {dimension_numbers = #tpu.dot_dimension_numbers<[1], [0], [0], [1], [0, 0, 1, 1], [], []>} : vector<2x32xf32>, vector<32x96xf32>, vector<2x96xf32> -> vector<2x96xf32>
    %51 = vector.extract_strided_slice %48 {offsets = [0, 0], sizes = [2, 32], strides = [1, 1]} : vector<2x96xf32> to vector<2x32xf32>
    %52 = vector.extract_strided_slice %50 {offsets = [0, 0], sizes = [2, 32], strides = [1, 1]} : vector<2x96xf32> to vector<2x32xf32>
    %53 = arith.addf %51, %52 : vector<2x32xf32>
    %54 = arith.negf %53 : vector<2x32xf32>
    %55 = math.exp %54 : vector<2x32xf32>
    %cst_28 = arith.constant 1.000000e+00 : f32
    %56 = vector.broadcast %cst_28 : f32 to vector<2x32xf32>
    %57 = arith.addf %56, %55 : vector<2x32xf32>
    %58 = arith.divf %56, %57 : vector<2x32xf32>
    %59 = vector.extract_strided_slice %48 {offsets = [0, 32], sizes = [2, 32], strides = [1, 1]} : vector<2x96xf32> to vector<2x32xf32>
    %60 = vector.extract_strided_slice %50 {offsets = [0, 32], sizes = [2, 32], strides = [1, 1]} : vector<2x96xf32> to vector<2x32xf32>
    %61 = arith.addf %59, %60 : vector<2x32xf32>
    %62 = arith.negf %61 : vector<2x32xf32>
    %63 = math.exp %62 : vector<2x32xf32>
    %cst_29 = arith.constant 1.000000e+00 : f32
    %64 = vector.broadcast %cst_29 : f32 to vector<2x32xf32>
    %65 = arith.addf %64, %63 : vector<2x32xf32>
    %66 = arith.divf %64, %65 : vector<2x32xf32>
    %67 = vector.extract_strided_slice %48 {offsets = [0, 64], sizes = [2, 32], strides = [1, 1]} : vector<2x96xf32> to vector<2x32xf32>
    %68 = vector.extract_strided_slice %50 {offsets = [0, 64], sizes = [2, 32], strides = [1, 1]} : vector<2x96xf32> to vector<2x32xf32>
    %69 = arith.mulf %66, %68 : vector<2x32xf32>
    %70 = arith.addf %67, %69 : vector<2x32xf32>
    %71 = math.tanh %70 : vector<2x32xf32>
    %72 = arith.subf %43, %71 : vector<2x32xf32>
    %73 = arith.mulf %58, %72 : vector<2x32xf32>
    %74 = arith.addf %71, %73 : vector<2x32xf32>
    %c1_30 = arith.constant 1 : index
    %c0_31 = arith.constant 0 : index
    %c0_32 = arith.constant 0 : index
    %75 = vector.load %arg13[%c1_30, %c0_31, %c0_32] : memref<2x2x32xf32, #tpu.memory_space<vmem>>, vector<1x2x32xf32>
    %76 = vector.shape_cast %75 : vector<1x2x32xf32> to vector<2x32xf32>
    %77 = vector.shape_cast %74 : vector<2x32xf32> to vector<1x2x32xf32>
    tpu.vector_store %arg13[%c1_30, %c0_31, %c0_32], %77 {strides = array<i32>} : memref<2x2x32xf32, #tpu.memory_space<vmem>>, vector<1x2x32xf32>,
    %c0_33 = arith.constant 0 : index
    %c0_34 = arith.constant 0 : index
    %78 = vector.load %arg9[%c0_33, %c0_34] : memref<32x128xf32, #tpu.memory_space<vmem>>, vector<32x128xf32>
    %cst_35 = arith.constant dense<0.000000e+00> : vector<2x128xf32>
    %79 = tpu.matmul %74, %78, %cst_35 {dimension_numbers = #tpu.dot_dimension_numbers<[1], [0], [0], [1], [0, 0, 1, 1], [], []>} : vector<2x32xf32>, vector<32x128xf32>, vector<2x128xf32> -> vector<2x128xf32>
    %c0_36 = arith.constant 0 : index
    %c0_37 = arith.constant 0 : index
    %80 = vector.load %arg10[%c0_36, %c0_37] : memref<1x128xf32, #tpu.memory_space<vmem>>, vector<1x128xf32>
    %81 = vector.broadcast %80 : vector<1x128xf32> to vector<2x128xf32>
    %82 = arith.addf %79, %81 : vector<2x128xf32>
    %83 = arith.index_cast %c0_i32_1 : i32 to index
    %c0_38 = arith.constant 0 : index
    %c0_39 = arith.constant 0 : index
    %84 = vector.load %arg11[%83, %c0_38, %c0_39] : memref<8x2x128xf32, #tpu.memory_space<vmem>>, vector<1x2x128xf32>
    %85 = vector.shape_cast %84 : vector<1x2x128xf32> to vector<2x128xf32>
    %86 = vector.shape_cast %82 : vector<2x128xf32> to vector<1x2x128xf32>
    tpu.vector_store %arg11[%83, %c0_38, %c0_39], %86 {strides = array<i32>} : memref<8x2x128xf32, #tpu.memory_space<vmem>>, vector<1x2x128xf32>,
    %c1_i32 = arith.constant 1 : i32
    %87 = arith.index_cast %c1_i32 : i32 to index
    %c0_40 = arith.constant 0 : index
    %c0_41 = arith.constant 0 : index
    %88 = vector.load %arg1[%87, %c0_40, %c0_41] : memref<8x2x16xf32, #tpu.memory_space<vmem>>, vector<1x2x16xf32>
    %89 = vector.shape_cast %88 : vector<1x2x16xf32> to vector<2x16xf32>
    %c0_42 = arith.constant 0 : index
    %c0_43 = arith.constant 0 : index
    %c0_44 = arith.constant 0 : index
    %90 = vector.load %arg13[%c0_42, %c0_43, %c0_44] : memref<2x2x32xf32, #tpu.memory_space<vmem>>, vector<1x2x32xf32>
    %91 = vector.shape_cast %90 : vector<1x2x32xf32> to vector<2x32xf32>
    %c0_45 = arith.constant 0 : index
    %c0_46 = arith.constant 0 : index
    %92 = vector.load %arg3[%c0_45, %c0_46] : memref<16x96xf32, #tpu.memory_space<vmem>>, vector<16x96xf32>
    %cst_47 = arith.constant dense<0.000000e+00> : vector<2x96xf32>
    %93 = tpu.matmul %89, %92, %cst_47 {dimension_numbers = #tpu.dot_dimension_numbers<[1], [0], [0], [1], [0, 0, 1, 1], [], []>} : vector<2x16xf32>, vector<16x96xf32>, vector<2x96xf32> -> vector<2x96xf32>
    %c0_48 = arith.constant 0 : index
    %c0_49 = arith.constant 0 : index
    %94 = vector.load %arg4[%c0_48, %c0_49] : memref<1x96xf32, #tpu.memory_space<vmem>>, vector<1x96xf32>
    %95 = vector.broadcast %94 : vector<1x96xf32> to vector<2x96xf32>
    %96 = arith.addf %93, %95 : vector<2x96xf32>
    %c0_50 = arith.constant 0 : index
    %c0_51 = arith.constant 0 : index
    %97 = vector.load %arg5[%c0_50, %c0_51] : memref<32x96xf32, #tpu.memory_space<vmem>>, vector<32x96xf32>
    %cst_52 = arith.constant dense<0.000000e+00> : vector<2x96xf32>
    %98 = tpu.matmul %91, %97, %cst_52 {dimension_numbers = #tpu.dot_dimension_numbers<[1], [0], [0], [1], [0, 0, 1, 1], [], []>} : vector<2x32xf32>, vector<32x96xf32>, vector<2x96xf32> -> vector<2x96xf32>
    %99 = vector.extract_strided_slice %96 {offsets = [0, 0], sizes = [2, 32], strides = [1, 1]} : vector<2x96xf32> to vector<2x32xf32>
    %100 = vector.extract_strided_slice %98 {offsets = [0, 0], sizes = [2, 32], strides = [1, 1]} : vector<2x96xf32> to vector<2x32xf32>
    %101 = arith.addf %99, %100 : vector<2x32xf32>
    %102 = arith.negf %101 : vector<2x32xf32>
    %103 = math.exp %102 : vector<2x32xf32>
    %cst_53 = arith.constant 1.000000e+00 : f32
    %104 = vector.broadcast %cst_53 : f32 to vector<2x32xf32>
    %105 = arith.addf %104, %103 : vector<2x32xf32>
    %106 = arith.divf %104, %105 : vector<2x32xf32>
    %107 = vector.extract_strided_slice %96 {offsets = [0, 32], sizes = [2, 32], strides = [1, 1]} : vector<2x96xf32> to vector<2x32xf32>
    %108 = vector.extract_strided_slice %98 {offsets = [0, 32], sizes = [2, 32], strides = [1, 1]} : vector<2x96xf32> to vector<2x32xf32>
    %109 = arith.addf %107, %108 : vector<2x32xf32>
    %110 = arith.negf %109 : vector<2x32xf32>
    %111 = math.exp %110 : vector<2x32xf32>
    %cst_54 = arith.constant 1.000000e+00 : f32
    %112 = vector.broadcast %cst_54 : f32 to vector<2x32xf32>
    %113 = arith.addf %112, %111 : vector<2x32xf32>
    %114 = arith.divf %112, %113 : vector<2x32xf32>
    %115 = vector.extract_strided_slice %96 {offsets = [0, 64], sizes = [2, 32], strides = [1, 1]} : vector<2x96xf32> to vector<2x32xf32>
    %116 = vector.extract_strided_slice %98 {offsets = [0, 64], sizes = [2, 32], strides = [1, 1]} : vector<2x96xf32> to vector<2x32xf32>
    %117 = arith.mulf %114, %116 : vector<2x32xf32>
    %118 = arith.addf %115, %117 : vector<2x32xf32>
    %119 = math.tanh %118 : vector<2x32xf32>
    %120 = arith.subf %91, %119 : vector<2x32xf32>
    %121 = arith.mulf %106, %120 : vector<2x32xf32>
    %122 = arith.addf %119, %121 : vector<2x32xf32>
    %c0_55 = arith.constant 0 : index
    %c0_56 = arith.constant 0 : index
    %c0_57 = arith.constant 0 : index
    %123 = vector.load %arg13[%c0_55, %c0_56, %c0_57] : memref<2x2x32xf32, #tpu.memory_space<vmem>>, vector<1x2x32xf32>
    %124 = vector.shape_cast %123 : vector<1x2x32xf32> to vector<2x32xf32>
    %125 = vector.shape_cast %122 : vector<2x32xf32> to vector<1x2x32xf32>
    tpu.vector_store %arg13[%c0_55, %c0_56, %c0_57], %125 {strides = array<i32>} : memref<2x2x32xf32, #tpu.memory_space<vmem>>, vector<1x2x32xf32>,
    %c1_58 = arith.constant 1 : index
    %c0_59 = arith.constant 0 : index
    %c0_60 = arith.constant 0 : index
    %126 = vector.load %arg13[%c1_58, %c0_59, %c0_60] : memref<2x2x32xf32, #tpu.memory_space<vmem>>, vector<1x2x32xf32>
    %127 = vector.shape_cast %126 : vector<1x2x32xf32> to vector<2x32xf32>
    %c0_61 = arith.constant 0 : index
    %c0_62 = arith.constant 0 : index
    %128 = vector.load %arg6[%c0_61, %c0_62] : memref<32x96xf32, #tpu.memory_space<vmem>>, vector<32x96xf32>
    %cst_63 = arith.constant dense<0.000000e+00> : vector<2x96xf32>
    %129 = tpu.matmul %122, %128, %cst_63 {dimension_numbers = #tpu.dot_dimension_numbers<[1], [0], [0], [1], [0, 0, 1, 1], [], []>} : vector<2x32xf32>, vector<32x96xf32>, vector<2x96xf32> -> vector<2x96xf32>
    %c0_64 = arith.constant 0 : index
    %c0_65 = arith.constant 0 : index
    %130 = vector.load %arg7[%c0_64, %c0_65] : memref<1x96xf32, #tpu.memory_space<vmem>>, vector<1x96xf32>
    %131 = vector.broadcast %130 : vector<1x96xf32> to vector<2x96xf32>
    %132 = arith.addf %129, %131 : vector<2x96xf32>
    %c0_66 = arith.constant 0 : index
    %c0_67 = arith.constant 0 : index
    %133 = vector.load %arg8[%c0_66, %c0_67] : memref<32x96xf32, #tpu.memory_space<vmem>>, vector<32x96xf32>
    %cst_68 = arith.constant dense<0.000000e+00> : vector<2x96xf32>
    %134 = tpu.matmul %127, %133, %cst_68 {dimension_numbers = #tpu.dot_dimension_numbers<[1], [0], [0], [1], [0, 0, 1, 1], [], []>} : vector<2x32xf32>, vector<32x96xf32>, vector<2x96xf32> -> vector<2x96xf32>
    %135 = vector.extract_strided_slice %132 {offsets = [0, 0], sizes = [2, 32], strides = [1, 1]} : vector<2x96xf32> to vector<2x32xf32>
    %136 = vector.extract_strided_slice %134 {offsets = [0, 0], sizes = [2, 32], strides = [1, 1]} : vector<2x96xf32> to vector<2x32xf32>
    %137 = arith.addf %135, %136 : vector<2x32xf32>
    %138 = arith.negf %137 : vector<2x32xf32>
    %139 = math.exp %138 : vector<2x32xf32>
    %cst_69 = arith.constant 1.000000e+00 : f32
    %140 = vector.broadcast %cst_69 : f32 to vector<2x32xf32>
    %141 = arith.addf %140, %139 : vector<2x32xf32>
    %142 = arith.divf %140, %141 : vector<2x32xf32>
    %143 = vector.extract_strided_slice %132 {offsets = [0, 32], sizes = [2, 32], strides = [1, 1]} : vector<2x96xf32> to vector<2x32xf32>
    %144 = vector.extract_strided_slice %134 {offsets = [0, 32], sizes = [2, 32], strides = [1, 1]} : vector<2x96xf32> to vector<2x32xf32>
    %145 = arith.addf %143, %144 : vector<2x32xf32>
    %146 = arith.negf %145 : vector<2x32xf32>
    %147 = math.exp %146 : vector<2x32xf32>
    %cst_70 = arith.constant 1.000000e+00 : f32
    %148 = vector.broadcast %cst_70 : f32 to vector<2x32xf32>
    %149 = arith.addf %148, %147 : vector<2x32xf32>
    %150 = arith.divf %148, %149 : vector<2x32xf32>
    %151 = vector.extract_strided_slice %132 {offsets = [0, 64], sizes = [2, 32], strides = [1, 1]} : vector<2x96xf32> to vector<2x32xf32>
    %152 = vector.extract_strided_slice %134 {offsets = [0, 64], sizes = [2, 32], strides = [1, 1]} : vector<2x96xf32> to vector<2x32xf32>
    %153 = arith.mulf %150, %152 : vector<2x32xf32>
    %154 = arith.addf %151, %153 : vector<2x32xf32>
    %155 = math.tanh %154 : vector<2x32xf32>
    %156 = arith.subf %127, %155 : vector<2x32xf32>
    %157 = arith.mulf %142, %156 : vector<2x32xf32>
    %158 = arith.addf %155, %157 : vector<2x32xf32>
    %c1_71 = arith.constant 1 : index
    %c0_72 = arith.constant 0 : index
    %c0_73 = arith.constant 0 : index
    %159 = vector.load %arg13[%c1_71, %c0_72, %c0_73] : memref<2x2x32xf32, #tpu.memory_space<vmem>>, vector<1x2x32xf32>
    %160 = vector.shape_cast %159 : vector<1x2x32xf32> to vector<2x32xf32>
    %161 = vector.shape_cast %158 : vector<2x32xf32> to vector<1x2x32xf32>
    tpu.vector_store %arg13[%c1_71, %c0_72, %c0_73], %161 {strides = array<i32>} : memref<2x2x32xf32, #tpu.memory_space<vmem>>, vector<1x2x32xf32>,
    %c0_74 = arith.constant 0 : index
    %c0_75 = arith.constant 0 : index
    %162 = vector.load %arg9[%c0_74, %c0_75] : memref<32x128xf32, #tpu.memory_space<vmem>>, vector<32x128xf32>
    %cst_76 = arith.constant dense<0.000000e+00> : vector<2x128xf32>
    %163 = tpu.matmul %158, %162, %cst_76 {dimension_numbers = #tpu.dot_dimension_numbers<[1], [0], [0], [1], [0, 0, 1, 1], [], []>} : vector<2x32xf32>, vector<32x128xf32>, vector<2x128xf32> -> vector<2x128xf32>
    %c0_77 = arith.constant 0 : index
    %c0_78 = arith.constant 0 : index
    %164 = vector.load %arg10[%c0_77, %c0_78] : memref<1x128xf32, #tpu.memory_space<vmem>>, vector<1x128xf32>
    %165 = vector.broadcast %164 : vector<1x128xf32> to vector<2x128xf32>
    %166 = arith.addf %163, %165 : vector<2x128xf32>
    %167 = arith.index_cast %c1_i32 : i32 to index
    %c0_79 = arith.constant 0 : index
    %c0_80 = arith.constant 0 : index
    %168 = vector.load %arg11[%167, %c0_79, %c0_80] : memref<8x2x128xf32, #tpu.memory_space<vmem>>, vector<1x2x128xf32>
    %169 = vector.shape_cast %168 : vector<1x2x128xf32> to vector<2x128xf32>
    %170 = vector.shape_cast %166 : vector<2x128xf32> to vector<1x2x128xf32>
    tpu.vector_store %arg11[%167, %c0_79, %c0_80], %170 {strides = array<i32>} : memref<8x2x128xf32, #tpu.memory_space<vmem>>, vector<1x2x128xf32>,
    %c2_i32 = arith.constant 2 : i32
    %171 = arith.index_cast %c2_i32 : i32 to index
    %c0_81 = arith.constant 0 : index
    %c0_82 = arith.constant 0 : index
    %172 = vector.load %arg1[%171, %c0_81, %c0_82] : memref<8x2x16xf32, #tpu.memory_space<vmem>>, vector<1x2x16xf32>
    %173 = vector.shape_cast %172 : vector<1x2x16xf32> to vector<2x16xf32>
    %c0_83 = arith.constant 0 : index
    %c0_84 = arith.constant 0 : index
    %c0_85 = arith.constant 0 : index
    %174 = vector.load %arg13[%c0_83, %c0_84, %c0_85] : memref<2x2x32xf32, #tpu.memory_space<vmem>>, vector<1x2x32xf32>
    %175 = vector.shape_cast %174 : vector<1x2x32xf32> to vector<2x32xf32>
    %c0_86 = arith.constant 0 : index
    %c0_87 = arith.constant 0 : index
    %176 = vector.load %arg3[%c0_86, %c0_87] : memref<16x96xf32, #tpu.memory_space<vmem>>, vector<16x96xf32>
    %cst_88 = arith.constant dense<0.000000e+00> : vector<2x96xf32>
    %177 = tpu.matmul %173, %176, %cst_88 {dimension_numbers = #tpu.dot_dimension_numbers<[1], [0], [0], [1], [0, 0, 1, 1], [], []>} : vector<2x16xf32>, vector<16x96xf32>, vector<2x96xf32> -> vector<2x96xf32>
    %c0_89 = arith.constant 0 : index
    %c0_90 = arith.constant 0 : index
    %178 = vector.load %arg4[%c0_89, %c0_90] : memref<1x96xf32, #tpu.memory_space<vmem>>, vector<1x96xf32>
    %179 = vector.broadcast %178 : vector<1x96xf32> to vector<2x96xf32>
    %180 = arith.addf %177, %179 : vector<2x96xf32>
    %c0_91 = arith.constant 0 : index
    %c0_92 = arith.constant 0 : index
    %181 = vector.load %arg5[%c0_91, %c0_92] : memref<32x96xf32, #tpu.memory_space<vmem>>, vector<32x96xf32>
    %cst_93 = arith.constant dense<0.000000e+00> : vector<2x96xf32>
    %182 = tpu.matmul %175, %181, %cst_93 {dimension_numbers = #tpu.dot_dimension_numbers<[1], [0], [0], [1], [0, 0, 1, 1], [], []>} : vector<2x32xf32>, vector<32x96xf32>, vector<2x96xf32> -> vector<2x96xf32>
    %183 = vector.extract_strided_slice %180 {offsets = [0, 0], sizes = [2, 32], strides = [1, 1]} : vector<2x96xf32> to vector<2x32xf32>
    %184 = vector.extract_strided_slice %182 {offsets = [0, 0], sizes = [2, 32], strides = [1, 1]} : vector<2x96xf32> to vector<2x32xf32>
    %185 = arith.addf %183, %184 : vector<2x32xf32>
    %186 = arith.negf %185 : vector<2x32xf32>
    %187 = math.exp %186 : vector<2x32xf32>
    %cst_94 = arith.constant 1.000000e+00 : f32
    %188 = vector.broadcast %cst_94 : f32 to vector<2x32xf32>
    %189 = arith.addf %188, %187 : vector<2x32xf32>
    %190 = arith.divf %188, %189 : vector<2x32xf32>
    %191 = vector.extract_strided_slice %180 {offsets = [0, 32], sizes = [2, 32], strides = [1, 1]} : vector<2x96xf32> to vector<2x32xf32>
    %192 = vector.extract_strided_slice %182 {offsets = [0, 32], sizes = [2, 32], strides = [1, 1]} : vector<2x96xf32> to vector<2x32xf32>
    %193 = arith.addf %191, %192 : vector<2x32xf32>
    %194 = arith.negf %193 : vector<2x32xf32>
    %195 = math.exp %194 : vector<2x32xf32>
    %cst_95 = arith.constant 1.000000e+00 : f32
    %196 = vector.broadcast %cst_95 : f32 to vector<2x32xf32>
    %197 = arith.addf %196, %195 : vector<2x32xf32>
    %198 = arith.divf %196, %197 : vector<2x32xf32>
    %199 = vector.extract_strided_slice %180 {offsets = [0, 64], sizes = [2, 32], strides = [1, 1]} : vector<2x96xf32> to vector<2x32xf32>
    %200 = vector.extract_strided_slice %182 {offsets = [0, 64], sizes = [2, 32], strides = [1, 1]} : vector<2x96xf32> to vector<2x32xf32>
    %201 = arith.mulf %198, %200 : vector<2x32xf32>
    %202 = arith.addf %199, %201 : vector<2x32xf32>
    %203 = math.tanh %202 : vector<2x32xf32>
    %204 = arith.subf %175, %203 : vector<2x32xf32>
    %205 = arith.mulf %190, %204 : vector<2x32xf32>
    %206 = arith.addf %203, %205 : vector<2x32xf32>
    %c0_96 = arith.constant 0 : index
    %c0_97 = arith.constant 0 : index
    %c0_98 = arith.constant 0 : index
    %207 = vector.load %arg13[%c0_96, %c0_97, %c0_98] : memref<2x2x32xf32, #tpu.memory_space<vmem>>, vector<1x2x32xf32>
    %208 = vector.shape_cast %207 : vector<1x2x32xf32> to vector<2x32xf32>
    %209 = vector.shape_cast %206 : vector<2x32xf32> to vector<1x2x32xf32>
    tpu.vector_store %arg13[%c0_96, %c0_97, %c0_98], %209 {strides = array<i32>} : memref<2x2x32xf32, #tpu.memory_space<vmem>>, vector<1x2x32xf32>,
    %c1_99 = arith.constant 1 : index
    %c0_100 = arith.constant 0 : index
    %c0_101 = arith.constant 0 : index
    %210 = vector.load %arg13[%c1_99, %c0_100, %c0_101] : memref<2x2x32xf32, #tpu.memory_space<vmem>>, vector<1x2x32xf32>
    %211 = vector.shape_cast %210 : vector<1x2x32xf32> to vector<2x32xf32>
    %c0_102 = arith.constant 0 : index
    %c0_103 = arith.constant 0 : index
    %212 = vector.load %arg6[%c0_102, %c0_103] : memref<32x96xf32, #tpu.memory_space<vmem>>, vector<32x96xf32>
    %cst_104 = arith.constant dense<0.000000e+00> : vector<2x96xf32>
    %213 = tpu.matmul %206, %212, %cst_104 {dimension_numbers = #tpu.dot_dimension_numbers<[1], [0], [0], [1], [0, 0, 1, 1], [], []>} : vector<2x32xf32>, vector<32x96xf32>, vector<2x96xf32> -> vector<2x96xf32>
    %c0_105 = arith.constant 0 : index
    %c0_106 = arith.constant 0 : index
    %214 = vector.load %arg7[%c0_105, %c0_106] : memref<1x96xf32, #tpu.memory_space<vmem>>, vector<1x96xf32>
    %215 = vector.broadcast %214 : vector<1x96xf32> to vector<2x96xf32>
    %216 = arith.addf %213, %215 : vector<2x96xf32>
    %c0_107 = arith.constant 0 : index
    %c0_108 = arith.constant 0 : index
    %217 = vector.load %arg8[%c0_107, %c0_108] : memref<32x96xf32, #tpu.memory_space<vmem>>, vector<32x96xf32>
    %cst_109 = arith.constant dense<0.000000e+00> : vector<2x96xf32>
    %218 = tpu.matmul %211, %217, %cst_109 {dimension_numbers = #tpu.dot_dimension_numbers<[1], [0], [0], [1], [0, 0, 1, 1], [], []>} : vector<2x32xf32>, vector<32x96xf32>, vector<2x96xf32> -> vector<2x96xf32>
    %219 = vector.extract_strided_slice %216 {offsets = [0, 0], sizes = [2, 32], strides = [1, 1]} : vector<2x96xf32> to vector<2x32xf32>
    %220 = vector.extract_strided_slice %218 {offsets = [0, 0], sizes = [2, 32], strides = [1, 1]} : vector<2x96xf32> to vector<2x32xf32>
    %221 = arith.addf %219, %220 : vector<2x32xf32>
    %222 = arith.negf %221 : vector<2x32xf32>
    %223 = math.exp %222 : vector<2x32xf32>
    %cst_110 = arith.constant 1.000000e+00 : f32
    %224 = vector.broadcast %cst_110 : f32 to vector<2x32xf32>
    %225 = arith.addf %224, %223 : vector<2x32xf32>
    %226 = arith.divf %224, %225 : vector<2x32xf32>
    %227 = vector.extract_strided_slice %216 {offsets = [0, 32], sizes = [2, 32], strides = [1, 1]} : vector<2x96xf32> to vector<2x32xf32>
    %228 = vector.extract_strided_slice %218 {offsets = [0, 32], sizes = [2, 32], strides = [1, 1]} : vector<2x96xf32> to vector<2x32xf32>
    %229 = arith.addf %227, %228 : vector<2x32xf32>
    %230 = arith.negf %229 : vector<2x32xf32>
    %231 = math.exp %230 : vector<2x32xf32>
    %cst_111 = arith.constant 1.000000e+00 : f32
    %232 = vector.broadcast %cst_111 : f32 to vector<2x32xf32>
    %233 = arith.addf %232, %231 : vector<2x32xf32>
    %234 = arith.divf %232, %233 : vector<2x32xf32>
    %235 = vector.extract_strided_slice %216 {offsets = [0, 64], sizes = [2, 32], strides = [1, 1]} : vector<2x96xf32> to vector<2x32xf32>
    %236 = vector.extract_strided_slice %218 {offsets = [0, 64], sizes = [2, 32], strides = [1, 1]} : vector<2x96xf32> to vector<2x32xf32>
    %237 = arith.mulf %234, %236 : vector<2x32xf32>
    %238 = arith.addf %235, %237 : vector<2x32xf32>
    %239 = math.tanh %238 : vector<2x32xf32>
    %240 = arith.subf %211, %239 : vector<2x32xf32>
    %241 = arith.mulf %226, %240 : vector<2x32xf32>
    %242 = arith.addf %239, %241 : vector<2x32xf32>
    %c1_112 = arith.constant 1 : index
    %c0_113 = arith.constant 0 : index
    %c0_114 = arith.constant 0 : index
    %243 = vector.load %arg13[%c1_112, %c0_113, %c0_114] : memref<2x2x32xf32, #tpu.memory_space<vmem>>, vector<1x2x32xf32>
    %244 = vector.shape_cast %243 : vector<1x2x32xf32> to vector<2x32xf32>
    %245 = vector.shape_cast %242 : vector<2x32xf32> to vector<1x2x32xf32>
    tpu.vector_store %arg13[%c1_112, %c0_113, %c0_114], %245 {strides = array<i32>} : memref<2x2x32xf32, #tpu.memory_space<vmem>>, vector<1x2x32xf32>,
    %c0_115 = arith.constant 0 : index
    %c0_116 = arith.constant 0 : index
    %246 = vector.load %arg9[%c0_115, %c0_116] : memref<32x128xf32, #tpu.memory_space<vmem>>, vector<32x128xf32>
    %cst_117 = arith.constant dense<0.000000e+00> : vector<2x128xf32>
    %247 = tpu.matmul %242, %246, %cst_117 {dimension_numbers = #tpu.dot_dimension_numbers<[1], [0], [0], [1], [0, 0, 1, 1], [], []>} : vector<2x32xf32>, vector<32x128xf32>, vector<2x128xf32> -> vector<2x128xf32>
    %c0_118 = arith.constant 0 : index
    %c0_119 = arith.constant 0 : index
    %248 = vector.load %arg10[%c0_118, %c0_119] : memref<1x128xf32, #tpu.memory_space<vmem>>, vector<1x128xf32>
    %249 = vector.broadcast %248 : vector<1x128xf32> to vector<2x128xf32>
    %250 = arith.addf %247, %249 : vector<2x128xf32>
    %251 = arith.index_cast %c2_i32 : i32 to index
    %c0_120 = arith.constant 0 : index
    %c0_121 = arith.constant 0 : index
    %252 = vector.load %arg11[%251, %c0_120, %c0_121] : memref<8x2x128xf32, #tpu.memory_space<vmem>>, vector<1x2x128xf32>
    %253 = vector.shape_cast %252 : vector<1x2x128xf32> to vector<2x128xf32>
    %254 = vector.shape_cast %250 : vector<2x128xf32> to vector<1x2x128xf32>
    tpu.vector_store %arg11[%251, %c0_120, %c0_121], %254 {strides = array<i32>} : memref<8x2x128xf32, #tpu.memory_space<vmem>>, vector<1x2x128xf32>,
    %c3_i32 = arith.constant 3 : i32
    %255 = arith.index_cast %c3_i32 : i32 to index
    %c0_122 = arith.constant 0 : index
    %c0_123 = arith.constant 0 : index
    %256 = vector.load %arg1[%255, %c0_122, %c0_123] : memref<8x2x16xf32, #tpu.memory_space<vmem>>, vector<1x2x16xf32>
    %257 = vector.shape_cast %256 : vector<1x2x16xf32> to vector<2x16xf32>
    %c0_124 = arith.constant 0 : index
    %c0_125 = arith.constant 0 : index
    %c0_126 = arith.constant 0 : index
    %258 = vector.load %arg13[%c0_124, %c0_125, %c0_126] : memref<2x2x32xf32, #tpu.memory_space<vmem>>, vector<1x2x32xf32>
    %259 = vector.shape_cast %258 : vector<1x2x32xf32> to vector<2x32xf32>
    %c0_127 = arith.constant 0 : index
    %c0_128 = arith.constant 0 : index
    %260 = vector.load %arg3[%c0_127, %c0_128] : memref<16x96xf32, #tpu.memory_space<vmem>>, vector<16x96xf32>
    %cst_129 = arith.constant dense<0.000000e+00> : vector<2x96xf32>
    %261 = tpu.matmul %257, %260, %cst_129 {dimension_numbers = #tpu.dot_dimension_numbers<[1], [0], [0], [1], [0, 0, 1, 1], [], []>} : vector<2x16xf32>, vector<16x96xf32>, vector<2x96xf32> -> vector<2x96xf32>
    %c0_130 = arith.constant 0 : index
    %c0_131 = arith.constant 0 : index
    %262 = vector.load %arg4[%c0_130, %c0_131] : memref<1x96xf32, #tpu.memory_space<vmem>>, vector<1x96xf32>
    %263 = vector.broadcast %262 : vector<1x96xf32> to vector<2x96xf32>
    %264 = arith.addf %261, %263 : vector<2x96xf32>
    %c0_132 = arith.constant 0 : index
    %c0_133 = arith.constant 0 : index
    %265 = vector.load %arg5[%c0_132, %c0_133] : memref<32x96xf32, #tpu.memory_space<vmem>>, vector<32x96xf32>
    %cst_134 = arith.constant dense<0.000000e+00> : vector<2x96xf32>
    %266 = tpu.matmul %259, %265, %cst_134 {dimension_numbers = #tpu.dot_dimension_numbers<[1], [0], [0], [1], [0, 0, 1, 1], [], []>} : vector<2x32xf32>, vector<32x96xf32>, vector<2x96xf32> -> vector<2x96xf32>
    %267 = vector.extract_strided_slice %264 {offsets = [0, 0], sizes = [2, 32], strides = [1, 1]} : vector<2x96xf32> to vector<2x32xf32>
    %268 = vector.extract_strided_slice %266 {offsets = [0, 0], sizes = [2, 32], strides = [1, 1]} : vector<2x96xf32> to vector<2x32xf32>
    %269 = arith.addf %267, %268 : vector<2x32xf32>
    %270 = arith.negf %269 : vector<2x32xf32>
    %271 = math.exp %270 : vector<2x32xf32>
    %cst_135 = arith.constant 1.000000e+00 : f32
    %272 = vector.broadcast %cst_135 : f32 to vector<2x32xf32>
    %273 = arith.addf %272, %271 : vector<2x32xf32>
    %274 = arith.divf %272, %273 : vector<2x32xf32>
    %275 = vector.extract_strided_slice %264 {offsets = [0, 32], sizes = [2, 32], strides = [1, 1]} : vector<2x96xf32> to vector<2x32xf32>
    %276 = vector.extract_strided_slice %266 {offsets = [0, 32], sizes = [2, 32], strides = [1, 1]} : vector<2x96xf32> to vector<2x32xf32>
    %277 = arith.addf %275, %276 : vector<2x32xf32>
    %278 = arith.negf %277 : vector<2x32xf32>
    %279 = math.exp %278 : vector<2x32xf32>
    %cst_136 = arith.constant 1.000000e+00 : f32
    %280 = vector.broadcast %cst_136 : f32 to vector<2x32xf32>
    %281 = arith.addf %280, %279 : vector<2x32xf32>
    %282 = arith.divf %280, %281 : vector<2x32xf32>
    %283 = vector.extract_strided_slice %264 {offsets = [0, 64], sizes = [2, 32], strides = [1, 1]} : vector<2x96xf32> to vector<2x32xf32>
    %284 = vector.extract_strided_slice %266 {offsets = [0, 64], sizes = [2, 32], strides = [1, 1]} : vector<2x96xf32> to vector<2x32xf32>
    %285 = arith.mulf %282, %284 : vector<2x32xf32>
    %286 = arith.addf %283, %285 : vector<2x32xf32>
    %287 = math.tanh %286 : vector<2x32xf32>
    %288 = arith.subf %259, %287 : vector<2x32xf32>
    %289 = arith.mulf %274, %288 : vector<2x32xf32>
    %290 = arith.addf %287, %289 : vector<2x32xf32>
    %c0_137 = arith.constant 0 : index
    %c0_138 = arith.constant 0 : index
    %c0_139 = arith.constant 0 : index
    %291 = vector.load %arg13[%c0_137, %c0_138, %c0_139] : memref<2x2x32xf32, #tpu.memory_space<vmem>>, vector<1x2x32xf32>
    %292 = vector.shape_cast %291 : vector<1x2x32xf32> to vector<2x32xf32>
    %293 = vector.shape_cast %290 : vector<2x32xf32> to vector<1x2x32xf32>
    tpu.vector_store %arg13[%c0_137, %c0_138, %c0_139], %293 {strides = array<i32>} : memref<2x2x32xf32, #tpu.memory_space<vmem>>, vector<1x2x32xf32>,
    %c1_140 = arith.constant 1 : index
    %c0_141 = arith.constant 0 : index
    %c0_142 = arith.constant 0 : index
    %294 = vector.load %arg13[%c1_140, %c0_141, %c0_142] : memref<2x2x32xf32, #tpu.memory_space<vmem>>, vector<1x2x32xf32>
    %295 = vector.shape_cast %294 : vector<1x2x32xf32> to vector<2x32xf32>
    %c0_143 = arith.constant 0 : index
    %c0_144 = arith.constant 0 : index
    %296 = vector.load %arg6[%c0_143, %c0_144] : memref<32x96xf32, #tpu.memory_space<vmem>>, vector<32x96xf32>
    %cst_145 = arith.constant dense<0.000000e+00> : vector<2x96xf32>
    %297 = tpu.matmul %290, %296, %cst_145 {dimension_numbers = #tpu.dot_dimension_numbers<[1], [0], [0], [1], [0, 0, 1, 1], [], []>} : vector<2x32xf32>, vector<32x96xf32>, vector<2x96xf32> -> vector<2x96xf32>
    %c0_146 = arith.constant 0 : index
    %c0_147 = arith.constant 0 : index
    %298 = vector.load %arg7[%c0_146, %c0_147] : memref<1x96xf32, #tpu.memory_space<vmem>>, vector<1x96xf32>
    %299 = vector.broadcast %298 : vector<1x96xf32> to vector<2x96xf32>
    %300 = arith.addf %297, %299 : vector<2x96xf32>
    %c0_148 = arith.constant 0 : index
    %c0_149 = arith.constant 0 : index
    %301 = vector.load %arg8[%c0_148, %c0_149] : memref<32x96xf32, #tpu.memory_space<vmem>>, vector<32x96xf32>
    %cst_150 = arith.constant dense<0.000000e+00> : vector<2x96xf32>
    %302 = tpu.matmul %295, %301, %cst_150 {dimension_numbers = #tpu.dot_dimension_numbers<[1], [0], [0], [1], [0, 0, 1, 1], [], []>} : vector<2x32xf32>, vector<32x96xf32>, vector<2x96xf32> -> vector<2x96xf32>
    %303 = vector.extract_strided_slice %300 {offsets = [0, 0], sizes = [2, 32], strides = [1, 1]} : vector<2x96xf32> to vector<2x32xf32>
    %304 = vector.extract_strided_slice %302 {offsets = [0, 0], sizes = [2, 32], strides = [1, 1]} : vector<2x96xf32> to vector<2x32xf32>
    %305 = arith.addf %303, %304 : vector<2x32xf32>
    %306 = arith.negf %305 : vector<2x32xf32>
    %307 = math.exp %306 : vector<2x32xf32>
    %cst_151 = arith.constant 1.000000e+00 : f32
    %308 = vector.broadcast %cst_151 : f32 to vector<2x32xf32>
    %309 = arith.addf %308, %307 : vector<2x32xf32>
    %310 = arith.divf %308, %309 : vector<2x32xf32>
    %311 = vector.extract_strided_slice %300 {offsets = [0, 32], sizes = [2, 32], strides = [1, 1]} : vector<2x96xf32> to vector<2x32xf32>
    %312 = vector.extract_strided_slice %302 {offsets = [0, 32], sizes = [2, 32], strides = [1, 1]} : vector<2x96xf32> to vector<2x32xf32>
    %313 = arith.addf %311, %312 : vector<2x32xf32>
    %314 = arith.negf %313 : vector<2x32xf32>
    %315 = math.exp %314 : vector<2x32xf32>
    %cst_152 = arith.constant 1.000000e+00 : f32
    %316 = vector.broadcast %cst_152 : f32 to vector<2x32xf32>
    %317 = arith.addf %316, %315 : vector<2x32xf32>
    %318 = arith.divf %316, %317 : vector<2x32xf32>
    %319 = vector.extract_strided_slice %300 {offsets = [0, 64], sizes = [2, 32], strides = [1, 1]} : vector<2x96xf32> to vector<2x32xf32>
    %320 = vector.extract_strided_slice %302 {offsets = [0, 64], sizes = [2, 32], strides = [1, 1]} : vector<2x96xf32> to vector<2x32xf32>
    %321 = arith.mulf %318, %320 : vector<2x32xf32>
    %322 = arith.addf %319, %321 : vector<2x32xf32>
    %323 = math.tanh %322 : vector<2x32xf32>
    %324 = arith.subf %295, %323 : vector<2x32xf32>
    %325 = arith.mulf %310, %324 : vector<2x32xf32>
    %326 = arith.addf %323, %325 : vector<2x32xf32>
    %c1_153 = arith.constant 1 : index
    %c0_154 = arith.constant 0 : index
    %c0_155 = arith.constant 0 : index
    %327 = vector.load %arg13[%c1_153, %c0_154, %c0_155] : memref<2x2x32xf32, #tpu.memory_space<vmem>>, vector<1x2x32xf32>
    %328 = vector.shape_cast %327 : vector<1x2x32xf32> to vector<2x32xf32>
    %329 = vector.shape_cast %326 : vector<2x32xf32> to vector<1x2x32xf32>
    tpu.vector_store %arg13[%c1_153, %c0_154, %c0_155], %329 {strides = array<i32>} : memref<2x2x32xf32, #tpu.memory_space<vmem>>, vector<1x2x32xf32>,
    %c0_156 = arith.constant 0 : index
    %c0_157 = arith.constant 0 : index
    %330 = vector.load %arg9[%c0_156, %c0_157] : memref<32x128xf32, #tpu.memory_space<vmem>>, vector<32x128xf32>
    %cst_158 = arith.constant dense<0.000000e+00> : vector<2x128xf32>
    %331 = tpu.matmul %326, %330, %cst_158 {dimension_numbers = #tpu.dot_dimension_numbers<[1], [0], [0], [1], [0, 0, 1, 1], [], []>} : vector<2x32xf32>, vector<32x128xf32>, vector<2x128xf32> -> vector<2x128xf32>
    %c0_159 = arith.constant 0 : index
    %c0_160 = arith.constant 0 : index
    %332 = vector.load %arg10[%c0_159, %c0_160] : memref<1x128xf32, #tpu.memory_space<vmem>>, vector<1x128xf32>
    %333 = vector.broadcast %332 : vector<1x128xf32> to vector<2x128xf32>
    %334 = arith.addf %331, %333 : vector<2x128xf32>
    %335 = arith.index_cast %c3_i32 : i32 to index
    %c0_161 = arith.constant 0 : index
    %c0_162 = arith.constant 0 : index
    %336 = vector.load %arg11[%335, %c0_161, %c0_162] : memref<8x2x128xf32, #tpu.memory_space<vmem>>, vector<1x2x128xf32>
    %337 = vector.shape_cast %336 : vector<1x2x128xf32> to vector<2x128xf32>
    %338 = vector.shape_cast %334 : vector<2x128xf32> to vector<1x2x128xf32>
    tpu.vector_store %arg11[%335, %c0_161, %c0_162], %338 {strides = array<i32>} : memref<8x2x128xf32, #tpu.memory_space<vmem>>, vector<1x2x128xf32>,
    %c4_i32 = arith.constant 4 : i32
    %339 = arith.index_cast %c4_i32 : i32 to index
    %c0_163 = arith.constant 0 : index
    %c0_164 = arith.constant 0 : index
    %340 = vector.load %arg1[%339, %c0_163, %c0_164] : memref<8x2x16xf32, #tpu.memory_space<vmem>>, vector<1x2x16xf32>
    %341 = vector.shape_cast %340 : vector<1x2x16xf32> to vector<2x16xf32>
    %c0_165 = arith.constant 0 : index
    %c0_166 = arith.constant 0 : index
    %c0_167 = arith.constant 0 : index
    %342 = vector.load %arg13[%c0_165, %c0_166, %c0_167] : memref<2x2x32xf32, #tpu.memory_space<vmem>>, vector<1x2x32xf32>
    %343 = vector.shape_cast %342 : vector<1x2x32xf32> to vector<2x32xf32>
    %c0_168 = arith.constant 0 : index
    %c0_169 = arith.constant 0 : index
    %344 = vector.load %arg3[%c0_168, %c0_169] : memref<16x96xf32, #tpu.memory_space<vmem>>, vector<16x96xf32>
    %cst_170 = arith.constant dense<0.000000e+00> : vector<2x96xf32>
    %345 = tpu.matmul %341, %344, %cst_170 {dimension_numbers = #tpu.dot_dimension_numbers<[1], [0], [0], [1], [0, 0, 1, 1], [], []>} : vector<2x16xf32>, vector<16x96xf32>, vector<2x96xf32> -> vector<2x96xf32>
    %c0_171 = arith.constant 0 : index
    %c0_172 = arith.constant 0 : index
    %346 = vector.load %arg4[%c0_171, %c0_172] : memref<1x96xf32, #tpu.memory_space<vmem>>, vector<1x96xf32>
    %347 = vector.broadcast %346 : vector<1x96xf32> to vector<2x96xf32>
    %348 = arith.addf %345, %347 : vector<2x96xf32>
    %c0_173 = arith.constant 0 : index
    %c0_174 = arith.constant 0 : index
    %349 = vector.load %arg5[%c0_173, %c0_174] : memref<32x96xf32, #tpu.memory_space<vmem>>, vector<32x96xf32>
    %cst_175 = arith.constant dense<0.000000e+00> : vector<2x96xf32>
    %350 = tpu.matmul %343, %349, %cst_175 {dimension_numbers = #tpu.dot_dimension_numbers<[1], [0], [0], [1], [0, 0, 1, 1], [], []>} : vector<2x32xf32>, vector<32x96xf32>, vector<2x96xf32> -> vector<2x96xf32>
    %351 = vector.extract_strided_slice %348 {offsets = [0, 0], sizes = [2, 32], strides = [1, 1]} : vector<2x96xf32> to vector<2x32xf32>
    %352 = vector.extract_strided_slice %350 {offsets = [0, 0], sizes = [2, 32], strides = [1, 1]} : vector<2x96xf32> to vector<2x32xf32>
    %353 = arith.addf %351, %352 : vector<2x32xf32>
    %354 = arith.negf %353 : vector<2x32xf32>
    %355 = math.exp %354 : vector<2x32xf32>
    %cst_176 = arith.constant 1.000000e+00 : f32
    %356 = vector.broadcast %cst_176 : f32 to vector<2x32xf32>
    %357 = arith.addf %356, %355 : vector<2x32xf32>
    %358 = arith.divf %356, %357 : vector<2x32xf32>
    %359 = vector.extract_strided_slice %348 {offsets = [0, 32], sizes = [2, 32], strides = [1, 1]} : vector<2x96xf32> to vector<2x32xf32>
    %360 = vector.extract_strided_slice %350 {offsets = [0, 32], sizes = [2, 32], strides = [1, 1]} : vector<2x96xf32> to vector<2x32xf32>
    %361 = arith.addf %359, %360 : vector<2x32xf32>
    %362 = arith.negf %361 : vector<2x32xf32>
    %363 = math.exp %362 : vector<2x32xf32>
    %cst_177 = arith.constant 1.000000e+00 : f32
    %364 = vector.broadcast %cst_177 : f32 to vector<2x32xf32>
    %365 = arith.addf %364, %363 : vector<2x32xf32>
    %366 = arith.divf %364, %365 : vector<2x32xf32>
    %367 = vector.extract_strided_slice %348 {offsets = [0, 64], sizes = [2, 32], strides = [1, 1]} : vector<2x96xf32> to vector<2x32xf32>
    %368 = vector.extract_strided_slice %350 {offsets = [0, 64], sizes = [2, 32], strides = [1, 1]} : vector<2x96xf32> to vector<2x32xf32>
    %369 = arith.mulf %366, %368 : vector<2x32xf32>
    %370 = arith.addf %367, %369 : vector<2x32xf32>
    %371 = math.tanh %370 : vector<2x32xf32>
    %372 = arith.subf %343, %371 : vector<2x32xf32>
    %373 = arith.mulf %358, %372 : vector<2x32xf32>
    %374 = arith.addf %371, %373 : vector<2x32xf32>
    %c0_178 = arith.constant 0 : index
    %c0_179 = arith.constant 0 : index
    %c0_180 = arith.constant 0 : index
    %375 = vector.load %arg13[%c0_178, %c0_179, %c0_180] : memref<2x2x32xf32, #tpu.memory_space<vmem>>, vector<1x2x32xf32>
    %376 = vector.shape_cast %375 : vector<1x2x32xf32> to vector<2x32xf32>
    %377 = vector.shape_cast %374 : vector<2x32xf32> to vector<1x2x32xf32>
    tpu.vector_store %arg13[%c0_178, %c0_179, %c0_180], %377 {strides = array<i32>} : memref<2x2x32xf32, #tpu.memory_space<vmem>>, vector<1x2x32xf32>,
    %c1_181 = arith.constant 1 : index
    %c0_182 = arith.constant 0 : index
    %c0_183 = arith.constant 0 : index
    %378 = vector.load %arg13[%c1_181, %c0_182, %c0_183] : memref<2x2x32xf32, #tpu.memory_space<vmem>>, vector<1x2x32xf32>
    %379 = vector.shape_cast %378 : vector<1x2x32xf32> to vector<2x32xf32>
    %c0_184 = arith.constant 0 : index
    %c0_185 = arith.constant 0 : index
    %380 = vector.load %arg6[%c0_184, %c0_185] : memref<32x96xf32, #tpu.memory_space<vmem>>, vector<32x96xf32>
    %cst_186 = arith.constant dense<0.000000e+00> : vector<2x96xf32>
    %381 = tpu.matmul %374, %380, %cst_186 {dimension_numbers = #tpu.dot_dimension_numbers<[1], [0], [0], [1], [0, 0, 1, 1], [], []>} : vector<2x32xf32>, vector<32x96xf32>, vector<2x96xf32> -> vector<2x96xf32>
    %c0_187 = arith.constant 0 : index
    %c0_188 = arith.constant 0 : index
    %382 = vector.load %arg7[%c0_187, %c0_188] : memref<1x96xf32, #tpu.memory_space<vmem>>, vector<1x96xf32>
    %383 = vector.broadcast %382 : vector<1x96xf32> to vector<2x96xf32>
    %384 = arith.addf %381, %383 : vector<2x96xf32>
    %c0_189 = arith.constant 0 : index
    %c0_190 = arith.constant 0 : index
    %385 = vector.load %arg8[%c0_189, %c0_190] : memref<32x96xf32, #tpu.memory_space<vmem>>, vector<32x96xf32>
    %cst_191 = arith.constant dense<0.000000e+00> : vector<2x96xf32>
    %386 = tpu.matmul %379, %385, %cst_191 {dimension_numbers = #tpu.dot_dimension_numbers<[1], [0], [0], [1], [0, 0, 1, 1], [], []>} : vector<2x32xf32>, vector<32x96xf32>, vector<2x96xf32> -> vector<2x96xf32>
    %387 = vector.extract_strided_slice %384 {offsets = [0, 0], sizes = [2, 32], strides = [1, 1]} : vector<2x96xf32> to vector<2x32xf32>
    %388 = vector.extract_strided_slice %386 {offsets = [0, 0], sizes = [2, 32], strides = [1, 1]} : vector<2x96xf32> to vector<2x32xf32>
    %389 = arith.addf %387, %388 : vector<2x32xf32>
    %390 = arith.negf %389 : vector<2x32xf32>
    %391 = math.exp %390 : vector<2x32xf32>
    %cst_192 = arith.constant 1.000000e+00 : f32
    %392 = vector.broadcast %cst_192 : f32 to vector<2x32xf32>
    %393 = arith.addf %392, %391 : vector<2x32xf32>
    %394 = arith.divf %392, %393 : vector<2x32xf32>
    %395 = vector.extract_strided_slice %384 {offsets = [0, 32], sizes = [2, 32], strides = [1, 1]} : vector<2x96xf32> to vector<2x32xf32>
    %396 = vector.extract_strided_slice %386 {offsets = [0, 32], sizes = [2, 32], strides = [1, 1]} : vector<2x96xf32> to vector<2x32xf32>
    %397 = arith.addf %395, %396 : vector<2x32xf32>
    %398 = arith.negf %397 : vector<2x32xf32>
    %399 = math.exp %398 : vector<2x32xf32>
    %cst_193 = arith.constant 1.000000e+00 : f32
    %400 = vector.broadcast %cst_193 : f32 to vector<2x32xf32>
    %401 = arith.addf %400, %399 : vector<2x32xf32>
    %402 = arith.divf %400, %401 : vector<2x32xf32>
    %403 = vector.extract_strided_slice %384 {offsets = [0, 64], sizes = [2, 32], strides = [1, 1]} : vector<2x96xf32> to vector<2x32xf32>
    %404 = vector.extract_strided_slice %386 {offsets = [0, 64], sizes = [2, 32], strides = [1, 1]} : vector<2x96xf32> to vector<2x32xf32>
    %405 = arith.mulf %402, %404 : vector<2x32xf32>
    %406 = arith.addf %403, %405 : vector<2x32xf32>
    %407 = math.tanh %406 : vector<2x32xf32>
    %408 = arith.subf %379, %407 : vector<2x32xf32>
    %409 = arith.mulf %394, %408 : vector<2x32xf32>
    %410 = arith.addf %407, %409 : vector<2x32xf32>
    %c1_194 = arith.constant 1 : index
    %c0_195 = arith.constant 0 : index
    %c0_196 = arith.constant 0 : index
    %411 = vector.load %arg13[%c1_194, %c0_195, %c0_196] : memref<2x2x32xf32, #tpu.memory_space<vmem>>, vector<1x2x32xf32>
    %412 = vector.shape_cast %411 : vector<1x2x32xf32> to vector<2x32xf32>
    %413 = vector.shape_cast %410 : vector<2x32xf32> to vector<1x2x32xf32>
    tpu.vector_store %arg13[%c1_194, %c0_195, %c0_196], %413 {strides = array<i32>} : memref<2x2x32xf32, #tpu.memory_space<vmem>>, vector<1x2x32xf32>,
    %c0_197 = arith.constant 0 : index
    %c0_198 = arith.constant 0 : index
    %414 = vector.load %arg9[%c0_197, %c0_198] : memref<32x128xf32, #tpu.memory_space<vmem>>, vector<32x128xf32>
    %cst_199 = arith.constant dense<0.000000e+00> : vector<2x128xf32>
    %415 = tpu.matmul %410, %414, %cst_199 {dimension_numbers = #tpu.dot_dimension_numbers<[1], [0], [0], [1], [0, 0, 1, 1], [], []>} : vector<2x32xf32>, vector<32x128xf32>, vector<2x128xf32> -> vector<2x128xf32>
    %c0_200 = arith.constant 0 : index
    %c0_201 = arith.constant 0 : index
    %416 = vector.load %arg10[%c0_200, %c0_201] : memref<1x128xf32, #tpu.memory_space<vmem>>, vector<1x128xf32>
    %417 = vector.broadcast %416 : vector<1x128xf32> to vector<2x128xf32>
    %418 = arith.addf %415, %417 : vector<2x128xf32>
    %419 = arith.index_cast %c4_i32 : i32 to index
    %c0_202 = arith.constant 0 : index
    %c0_203 = arith.constant 0 : index
    %420 = vector.load %arg11[%419, %c0_202, %c0_203] : memref<8x2x128xf32, #tpu.memory_space<vmem>>, vector<1x2x128xf32>
    %421 = vector.shape_cast %420 : vector<1x2x128xf32> to vector<2x128xf32>
    %422 = vector.shape_cast %418 : vector<2x128xf32> to vector<1x2x128xf32>
    tpu.vector_store %arg11[%419, %c0_202, %c0_203], %422 {strides = array<i32>} : memref<8x2x128xf32, #tpu.memory_space<vmem>>, vector<1x2x128xf32>,
    %c5_i32 = arith.constant 5 : i32
    %423 = arith.index_cast %c5_i32 : i32 to index
    %c0_204 = arith.constant 0 : index
    %c0_205 = arith.constant 0 : index
    %424 = vector.load %arg1[%423, %c0_204, %c0_205] : memref<8x2x16xf32, #tpu.memory_space<vmem>>, vector<1x2x16xf32>
    %425 = vector.shape_cast %424 : vector<1x2x16xf32> to vector<2x16xf32>
    %c0_206 = arith.constant 0 : index
    %c0_207 = arith.constant 0 : index
    %c0_208 = arith.constant 0 : index
    %426 = vector.load %arg13[%c0_206, %c0_207, %c0_208] : memref<2x2x32xf32, #tpu.memory_space<vmem>>, vector<1x2x32xf32>
    %427 = vector.shape_cast %426 : vector<1x2x32xf32> to vector<2x32xf32>
    %c0_209 = arith.constant 0 : index
    %c0_210 = arith.constant 0 : index
    %428 = vector.load %arg3[%c0_209, %c0_210] : memref<16x96xf32, #tpu.memory_space<vmem>>, vector<16x96xf32>
    %cst_211 = arith.constant dense<0.000000e+00> : vector<2x96xf32>
    %429 = tpu.matmul %425, %428, %cst_211 {dimension_numbers = #tpu.dot_dimension_numbers<[1], [0], [0], [1], [0, 0, 1, 1], [], []>} : vector<2x16xf32>, vector<16x96xf32>, vector<2x96xf32> -> vector<2x96xf32>
    %c0_212 = arith.constant 0 : index
    %c0_213 = arith.constant 0 : index
    %430 = vector.load %arg4[%c0_212, %c0_213] : memref<1x96xf32, #tpu.memory_space<vmem>>, vector<1x96xf32>
    %431 = vector.broadcast %430 : vector<1x96xf32> to vector<2x96xf32>
    %432 = arith.addf %429, %431 : vector<2x96xf32>
    %c0_214 = arith.constant 0 : index
    %c0_215 = arith.constant 0 : index
    %433 = vector.load %arg5[%c0_214, %c0_215] : memref<32x96xf32, #tpu.memory_space<vmem>>, vector<32x96xf32>
    %cst_216 = arith.constant dense<0.000000e+00> : vector<2x96xf32>
    %434 = tpu.matmul %427, %433, %cst_216 {dimension_numbers = #tpu.dot_dimension_numbers<[1], [0], [0], [1], [0, 0, 1, 1], [], []>} : vector<2x32xf32>, vector<32x96xf32>, vector<2x96xf32> -> vector<2x96xf32>
    %435 = vector.extract_strided_slice %432 {offsets = [0, 0], sizes = [2, 32], strides = [1, 1]} : vector<2x96xf32> to vector<2x32xf32>
    %436 = vector.extract_strided_slice %434 {offsets = [0, 0], sizes = [2, 32], strides = [1, 1]} : vector<2x96xf32> to vector<2x32xf32>
    %437 = arith.addf %435, %436 : vector<2x32xf32>
    %438 = arith.negf %437 : vector<2x32xf32>
    %439 = math.exp %438 : vector<2x32xf32>
    %cst_217 = arith.constant 1.000000e+00 : f32
    %440 = vector.broadcast %cst_217 : f32 to vector<2x32xf32>
    %441 = arith.addf %440, %439 : vector<2x32xf32>
    %442 = arith.divf %440, %441 : vector<2x32xf32>
    %443 = vector.extract_strided_slice %432 {offsets = [0, 32], sizes = [2, 32], strides = [1, 1]} : vector<2x96xf32> to vector<2x32xf32>
    %444 = vector.extract_strided_slice %434 {offsets = [0, 32], sizes = [2, 32], strides = [1, 1]} : vector<2x96xf32> to vector<2x32xf32>
    %445 = arith.addf %443, %444 : vector<2x32xf32>
    %446 = arith.negf %445 : vector<2x32xf32>
    %447 = math.exp %446 : vector<2x32xf32>
    %cst_218 = arith.constant 1.000000e+00 : f32
    %448 = vector.broadcast %cst_218 : f32 to vector<2x32xf32>
    %449 = arith.addf %448, %447 : vector<2x32xf32>
    %450 = arith.divf %448, %449 : vector<2x32xf32>
    %451 = vector.extract_strided_slice %432 {offsets = [0, 64], sizes = [2, 32], strides = [1, 1]} : vector<2x96xf32> to vector<2x32xf32>
    %452 = vector.extract_strided_slice %434 {offsets = [0, 64], sizes = [2, 32], strides = [1, 1]} : vector<2x96xf32> to vector<2x32xf32>
    %453 = arith.mulf %450, %452 : vector<2x32xf32>
    %454 = arith.addf %451, %453 : vector<2x32xf32>
    %455 = math.tanh %454 : vector<2x32xf32>
    %456 = arith.subf %427, %455 : vector<2x32xf32>
    %457 = arith.mulf %442, %456 : vector<2x32xf32>
    %458 = arith.addf %455, %457 : vector<2x32xf32>
    %c0_219 = arith.constant 0 : index
    %c0_220 = arith.constant 0 : index
    %c0_221 = arith.constant 0 : index
    %459 = vector.load %arg13[%c0_219, %c0_220, %c0_221] : memref<2x2x32xf32, #tpu.memory_space<vmem>>, vector<1x2x32xf32>
    %460 = vector.shape_cast %459 : vector<1x2x32xf32> to vector<2x32xf32>
    %461 = vector.shape_cast %458 : vector<2x32xf32> to vector<1x2x32xf32>
    tpu.vector_store %arg13[%c0_219, %c0_220, %c0_221], %461 {strides = array<i32>} : memref<2x2x32xf32, #tpu.memory_space<vmem>>, vector<1x2x32xf32>,
    %c1_222 = arith.constant 1 : index
    %c0_223 = arith.constant 0 : index
    %c0_224 = arith.constant 0 : index
    %462 = vector.load %arg13[%c1_222, %c0_223, %c0_224] : memref<2x2x32xf32, #tpu.memory_space<vmem>>, vector<1x2x32xf32>
    %463 = vector.shape_cast %462 : vector<1x2x32xf32> to vector<2x32xf32>
    %c0_225 = arith.constant 0 : index
    %c0_226 = arith.constant 0 : index
    %464 = vector.load %arg6[%c0_225, %c0_226] : memref<32x96xf32, #tpu.memory_space<vmem>>, vector<32x96xf32>
    %cst_227 = arith.constant dense<0.000000e+00> : vector<2x96xf32>
    %465 = tpu.matmul %458, %464, %cst_227 {dimension_numbers = #tpu.dot_dimension_numbers<[1], [0], [0], [1], [0, 0, 1, 1], [], []>} : vector<2x32xf32>, vector<32x96xf32>, vector<2x96xf32> -> vector<2x96xf32>
    %c0_228 = arith.constant 0 : index
    %c0_229 = arith.constant 0 : index
    %466 = vector.load %arg7[%c0_228, %c0_229] : memref<1x96xf32, #tpu.memory_space<vmem>>, vector<1x96xf32>
    %467 = vector.broadcast %466 : vector<1x96xf32> to vector<2x96xf32>
    %468 = arith.addf %465, %467 : vector<2x96xf32>
    %c0_230 = arith.constant 0 : index
    %c0_231 = arith.constant 0 : index
    %469 = vector.load %arg8[%c0_230, %c0_231] : memref<32x96xf32, #tpu.memory_space<vmem>>, vector<32x96xf32>
    %cst_232 = arith.constant dense<0.000000e+00> : vector<2x96xf32>
    %470 = tpu.matmul %463, %469, %cst_232 {dimension_numbers = #tpu.dot_dimension_numbers<[1], [0], [0], [1], [0, 0, 1, 1], [], []>} : vector<2x32xf32>, vector<32x96xf32>, vector<2x96xf32> -> vector<2x96xf32>
    %471 = vector.extract_strided_slice %468 {offsets = [0, 0], sizes = [2, 32], strides = [1, 1]} : vector<2x96xf32> to vector<2x32xf32>
    %472 = vector.extract_strided_slice %470 {offsets = [0, 0], sizes = [2, 32], strides = [1, 1]} : vector<2x96xf32> to vector<2x32xf32>
    %473 = arith.addf %471, %472 : vector<2x32xf32>
    %474 = arith.negf %473 : vector<2x32xf32>
    %475 = math.exp %474 : vector<2x32xf32>
    %cst_233 = arith.constant 1.000000e+00 : f32
    %476 = vector.broadcast %cst_233 : f32 to vector<2x32xf32>
    %477 = arith.addf %476, %475 : vector<2x32xf32>
    %478 = arith.divf %476, %477 : vector<2x32xf32>
    %479 = vector.extract_strided_slice %468 {offsets = [0, 32], sizes = [2, 32], strides = [1, 1]} : vector<2x96xf32> to vector<2x32xf32>
    %480 = vector.extract_strided_slice %470 {offsets = [0, 32], sizes = [2, 32], strides = [1, 1]} : vector<2x96xf32> to vector<2x32xf32>
    %481 = arith.addf %479, %480 : vector<2x32xf32>
    %482 = arith.negf %481 : vector<2x32xf32>
    %483 = math.exp %482 : vector<2x32xf32>
    %cst_234 = arith.constant 1.000000e+00 : f32
    %484 = vector.broadcast %cst_234 : f32 to vector<2x32xf32>
    %485 = arith.addf %484, %483 : vector<2x32xf32>
    %486 = arith.divf %484, %485 : vector<2x32xf32>
    %487 = vector.extract_strided_slice %468 {offsets = [0, 64], sizes = [2, 32], strides = [1, 1]} : vector<2x96xf32> to vector<2x32xf32>
    %488 = vector.extract_strided_slice %470 {offsets = [0, 64], sizes = [2, 32], strides = [1, 1]} : vector<2x96xf32> to vector<2x32xf32>
    %489 = arith.mulf %486, %488 : vector<2x32xf32>
    %490 = arith.addf %487, %489 : vector<2x32xf32>
    %491 = math.tanh %490 : vector<2x32xf32>
    %492 = arith.subf %463, %491 : vector<2x32xf32>
    %493 = arith.mulf %478, %492 : vector<2x32xf32>
    %494 = arith.addf %491, %493 : vector<2x32xf32>
    %c1_235 = arith.constant 1 : index
    %c0_236 = arith.constant 0 : index
    %c0_237 = arith.constant 0 : index
    %495 = vector.load %arg13[%c1_235, %c0_236, %c0_237] : memref<2x2x32xf32, #tpu.memory_space<vmem>>, vector<1x2x32xf32>
    %496 = vector.shape_cast %495 : vector<1x2x32xf32> to vector<2x32xf32>
    %497 = vector.shape_cast %494 : vector<2x32xf32> to vector<1x2x32xf32>
    tpu.vector_store %arg13[%c1_235, %c0_236, %c0_237], %497 {strides = array<i32>} : memref<2x2x32xf32, #tpu.memory_space<vmem>>, vector<1x2x32xf32>,
    %c0_238 = arith.constant 0 : index
    %c0_239 = arith.constant 0 : index
    %498 = vector.load %arg9[%c0_238, %c0_239] : memref<32x128xf32, #tpu.memory_space<vmem>>, vector<32x128xf32>
    %cst_240 = arith.constant dense<0.000000e+00> : vector<2x128xf32>
    %499 = tpu.matmul %494, %498, %cst_240 {dimension_numbers = #tpu.dot_dimension_numbers<[1], [0], [0], [1], [0, 0, 1, 1], [], []>} : vector<2x32xf32>, vector<32x128xf32>, vector<2x128xf32> -> vector<2x128xf32>
    %c0_241 = arith.constant 0 : index
    %c0_242 = arith.constant 0 : index
    %500 = vector.load %arg10[%c0_241, %c0_242] : memref<1x128xf32, #tpu.memory_space<vmem>>, vector<1x128xf32>
    %501 = vector.broadcast %500 : vector<1x128xf32> to vector<2x128xf32>
    %502 = arith.addf %499, %501 : vector<2x128xf32>
    %503 = arith.index_cast %c5_i32 : i32 to index
    %c0_243 = arith.constant 0 : index
    %c0_244 = arith.constant 0 : index
    %504 = vector.load %arg11[%503, %c0_243, %c0_244] : memref<8x2x128xf32, #tpu.memory_space<vmem>>, vector<1x2x128xf32>
    %505 = vector.shape_cast %504 : vector<1x2x128xf32> to vector<2x128xf32>
    %506 = vector.shape_cast %502 : vector<2x128xf32> to vector<1x2x128xf32>
    tpu.vector_store %arg11[%503, %c0_243, %c0_244], %506 {strides = array<i32>} : memref<8x2x128xf32, #tpu.memory_space<vmem>>, vector<1x2x128xf32>,
    %c6_i32 = arith.constant 6 : i32
    %507 = arith.index_cast %c6_i32 : i32 to index
    %c0_245 = arith.constant 0 : index
    %c0_246 = arith.constant 0 : index
    %508 = vector.load %arg1[%507, %c0_245, %c0_246] : memref<8x2x16xf32, #tpu.memory_space<vmem>>, vector<1x2x16xf32>
    %509 = vector.shape_cast %508 : vector<1x2x16xf32> to vector<2x16xf32>
    %c0_247 = arith.constant 0 : index
    %c0_248 = arith.constant 0 : index
    %c0_249 = arith.constant 0 : index
    %510 = vector.load %arg13[%c0_247, %c0_248, %c0_249] : memref<2x2x32xf32, #tpu.memory_space<vmem>>, vector<1x2x32xf32>
    %511 = vector.shape_cast %510 : vector<1x2x32xf32> to vector<2x32xf32>
    %c0_250 = arith.constant 0 : index
    %c0_251 = arith.constant 0 : index
    %512 = vector.load %arg3[%c0_250, %c0_251] : memref<16x96xf32, #tpu.memory_space<vmem>>, vector<16x96xf32>
    %cst_252 = arith.constant dense<0.000000e+00> : vector<2x96xf32>
    %513 = tpu.matmul %509, %512, %cst_252 {dimension_numbers = #tpu.dot_dimension_numbers<[1], [0], [0], [1], [0, 0, 1, 1], [], []>} : vector<2x16xf32>, vector<16x96xf32>, vector<2x96xf32> -> vector<2x96xf32>
    %c0_253 = arith.constant 0 : index
    %c0_254 = arith.constant 0 : index
    %514 = vector.load %arg4[%c0_253, %c0_254] : memref<1x96xf32, #tpu.memory_space<vmem>>, vector<1x96xf32>
    %515 = vector.broadcast %514 : vector<1x96xf32> to vector<2x96xf32>
    %516 = arith.addf %513, %515 : vector<2x96xf32>
    %c0_255 = arith.constant 0 : index
    %c0_256 = arith.constant 0 : index
    %517 = vector.load %arg5[%c0_255, %c0_256] : memref<32x96xf32, #tpu.memory_space<vmem>>, vector<32x96xf32>
    %cst_257 = arith.constant dense<0.000000e+00> : vector<2x96xf32>
    %518 = tpu.matmul %511, %517, %cst_257 {dimension_numbers = #tpu.dot_dimension_numbers<[1], [0], [0], [1], [0, 0, 1, 1], [], []>} : vector<2x32xf32>, vector<32x96xf32>, vector<2x96xf32> -> vector<2x96xf32>
    %519 = vector.extract_strided_slice %516 {offsets = [0, 0], sizes = [2, 32], strides = [1, 1]} : vector<2x96xf32> to vector<2x32xf32>
    %520 = vector.extract_strided_slice %518 {offsets = [0, 0], sizes = [2, 32], strides = [1, 1]} : vector<2x96xf32> to vector<2x32xf32>
    %521 = arith.addf %519, %520 : vector<2x32xf32>
    %522 = arith.negf %521 : vector<2x32xf32>
    %523 = math.exp %522 : vector<2x32xf32>
    %cst_258 = arith.constant 1.000000e+00 : f32
    %524 = vector.broadcast %cst_258 : f32 to vector<2x32xf32>
    %525 = arith.addf %524, %523 : vector<2x32xf32>
    %526 = arith.divf %524, %525 : vector<2x32xf32>
    %527 = vector.extract_strided_slice %516 {offsets = [0, 32], sizes = [2, 32], strides = [1, 1]} : vector<2x96xf32> to vector<2x32xf32>
    %528 = vector.extract_strided_slice %518 {offsets = [0, 32], sizes = [2, 32], strides = [1, 1]} : vector<2x96xf32> to vector<2x32xf32>
    %529 = arith.addf %527, %528 : vector<2x32xf32>
    %530 = arith.negf %529 : vector<2x32xf32>
    %531 = math.exp %530 : vector<2x32xf32>
    %cst_259 = arith.constant 1.000000e+00 : f32
    %532 = vector.broadcast %cst_259 : f32 to vector<2x32xf32>
    %533 = arith.addf %532, %531 : vector<2x32xf32>
    %534 = arith.divf %532, %533 : vector<2x32xf32>
    %535 = vector.extract_strided_slice %516 {offsets = [0, 64], sizes = [2, 32], strides = [1, 1]} : vector<2x96xf32> to vector<2x32xf32>
    %536 = vector.extract_strided_slice %518 {offsets = [0, 64], sizes = [2, 32], strides = [1, 1]} : vector<2x96xf32> to vector<2x32xf32>
    %537 = arith.mulf %534, %536 : vector<2x32xf32>
    %538 = arith.addf %535, %537 : vector<2x32xf32>
    %539 = math.tanh %538 : vector<2x32xf32>
    %540 = arith.subf %511, %539 : vector<2x32xf32>
    %541 = arith.mulf %526, %540 : vector<2x32xf32>
    %542 = arith.addf %539, %541 : vector<2x32xf32>
    %c0_260 = arith.constant 0 : index
    %c0_261 = arith.constant 0 : index
    %c0_262 = arith.constant 0 : index
    %543 = vector.load %arg13[%c0_260, %c0_261, %c0_262] : memref<2x2x32xf32, #tpu.memory_space<vmem>>, vector<1x2x32xf32>
    %544 = vector.shape_cast %543 : vector<1x2x32xf32> to vector<2x32xf32>
    %545 = vector.shape_cast %542 : vector<2x32xf32> to vector<1x2x32xf32>
    tpu.vector_store %arg13[%c0_260, %c0_261, %c0_262], %545 {strides = array<i32>} : memref<2x2x32xf32, #tpu.memory_space<vmem>>, vector<1x2x32xf32>,
    %c1_263 = arith.constant 1 : index
    %c0_264 = arith.constant 0 : index
    %c0_265 = arith.constant 0 : index
    %546 = vector.load %arg13[%c1_263, %c0_264, %c0_265] : memref<2x2x32xf32, #tpu.memory_space<vmem>>, vector<1x2x32xf32>
    %547 = vector.shape_cast %546 : vector<1x2x32xf32> to vector<2x32xf32>
    %c0_266 = arith.constant 0 : index
    %c0_267 = arith.constant 0 : index
    %548 = vector.load %arg6[%c0_266, %c0_267] : memref<32x96xf32, #tpu.memory_space<vmem>>, vector<32x96xf32>
    %cst_268 = arith.constant dense<0.000000e+00> : vector<2x96xf32>
    %549 = tpu.matmul %542, %548, %cst_268 {dimension_numbers = #tpu.dot_dimension_numbers<[1], [0], [0], [1], [0, 0, 1, 1], [], []>} : vector<2x32xf32>, vector<32x96xf32>, vector<2x96xf32> -> vector<2x96xf32>
    %c0_269 = arith.constant 0 : index
    %c0_270 = arith.constant 0 : index
    %550 = vector.load %arg7[%c0_269, %c0_270] : memref<1x96xf32, #tpu.memory_space<vmem>>, vector<1x96xf32>
    %551 = vector.broadcast %550 : vector<1x96xf32> to vector<2x96xf32>
    %552 = arith.addf %549, %551 : vector<2x96xf32>
    %c0_271 = arith.constant 0 : index
    %c0_272 = arith.constant 0 : index
    %553 = vector.load %arg8[%c0_271, %c0_272] : memref<32x96xf32, #tpu.memory_space<vmem>>, vector<32x96xf32>
    %cst_273 = arith.constant dense<0.000000e+00> : vector<2x96xf32>
    %554 = tpu.matmul %547, %553, %cst_273 {dimension_numbers = #tpu.dot_dimension_numbers<[1], [0], [0], [1], [0, 0, 1, 1], [], []>} : vector<2x32xf32>, vector<32x96xf32>, vector<2x96xf32> -> vector<2x96xf32>
    %555 = vector.extract_strided_slice %552 {offsets = [0, 0], sizes = [2, 32], strides = [1, 1]} : vector<2x96xf32> to vector<2x32xf32>
    %556 = vector.extract_strided_slice %554 {offsets = [0, 0], sizes = [2, 32], strides = [1, 1]} : vector<2x96xf32> to vector<2x32xf32>
    %557 = arith.addf %555, %556 : vector<2x32xf32>
    %558 = arith.negf %557 : vector<2x32xf32>
    %559 = math.exp %558 : vector<2x32xf32>
    %cst_274 = arith.constant 1.000000e+00 : f32
    %560 = vector.broadcast %cst_274 : f32 to vector<2x32xf32>
    %561 = arith.addf %560, %559 : vector<2x32xf32>
    %562 = arith.divf %560, %561 : vector<2x32xf32>
    %563 = vector.extract_strided_slice %552 {offsets = [0, 32], sizes = [2, 32], strides = [1, 1]} : vector<2x96xf32> to vector<2x32xf32>
    %564 = vector.extract_strided_slice %554 {offsets = [0, 32], sizes = [2, 32], strides = [1, 1]} : vector<2x96xf32> to vector<2x32xf32>
    %565 = arith.addf %563, %564 : vector<2x32xf32>
    %566 = arith.negf %565 : vector<2x32xf32>
    %567 = math.exp %566 : vector<2x32xf32>
    %cst_275 = arith.constant 1.000000e+00 : f32
    %568 = vector.broadcast %cst_275 : f32 to vector<2x32xf32>
    %569 = arith.addf %568, %567 : vector<2x32xf32>
    %570 = arith.divf %568, %569 : vector<2x32xf32>
    %571 = vector.extract_strided_slice %552 {offsets = [0, 64], sizes = [2, 32], strides = [1, 1]} : vector<2x96xf32> to vector<2x32xf32>
    %572 = vector.extract_strided_slice %554 {offsets = [0, 64], sizes = [2, 32], strides = [1, 1]} : vector<2x96xf32> to vector<2x32xf32>
    %573 = arith.mulf %570, %572 : vector<2x32xf32>
    %574 = arith.addf %571, %573 : vector<2x32xf32>
    %575 = math.tanh %574 : vector<2x32xf32>
    %576 = arith.subf %547, %575 : vector<2x32xf32>
    %577 = arith.mulf %562, %576 : vector<2x32xf32>
    %578 = arith.addf %575, %577 : vector<2x32xf32>
    %c1_276 = arith.constant 1 : index
    %c0_277 = arith.constant 0 : index
    %c0_278 = arith.constant 0 : index
    %579 = vector.load %arg13[%c1_276, %c0_277, %c0_278] : memref<2x2x32xf32, #tpu.memory_space<vmem>>, vector<1x2x32xf32>
    %580 = vector.shape_cast %579 : vector<1x2x32xf32> to vector<2x32xf32>
    %581 = vector.shape_cast %578 : vector<2x32xf32> to vector<1x2x32xf32>
    tpu.vector_store %arg13[%c1_276, %c0_277, %c0_278], %581 {strides = array<i32>} : memref<2x2x32xf32, #tpu.memory_space<vmem>>, vector<1x2x32xf32>,
    %c0_279 = arith.constant 0 : index
    %c0_280 = arith.constant 0 : index
    %582 = vector.load %arg9[%c0_279, %c0_280] : memref<32x128xf32, #tpu.memory_space<vmem>>, vector<32x128xf32>
    %cst_281 = arith.constant dense<0.000000e+00> : vector<2x128xf32>
    %583 = tpu.matmul %578, %582, %cst_281 {dimension_numbers = #tpu.dot_dimension_numbers<[1], [0], [0], [1], [0, 0, 1, 1], [], []>} : vector<2x32xf32>, vector<32x128xf32>, vector<2x128xf32> -> vector<2x128xf32>
    %c0_282 = arith.constant 0 : index
    %c0_283 = arith.constant 0 : index
    %584 = vector.load %arg10[%c0_282, %c0_283] : memref<1x128xf32, #tpu.memory_space<vmem>>, vector<1x128xf32>
    %585 = vector.broadcast %584 : vector<1x128xf32> to vector<2x128xf32>
    %586 = arith.addf %583, %585 : vector<2x128xf32>
    %587 = arith.index_cast %c6_i32 : i32 to index
    %c0_284 = arith.constant 0 : index
    %c0_285 = arith.constant 0 : index
    %588 = vector.load %arg11[%587, %c0_284, %c0_285] : memref<8x2x128xf32, #tpu.memory_space<vmem>>, vector<1x2x128xf32>
    %589 = vector.shape_cast %588 : vector<1x2x128xf32> to vector<2x128xf32>
    %590 = vector.shape_cast %586 : vector<2x128xf32> to vector<1x2x128xf32>
    tpu.vector_store %arg11[%587, %c0_284, %c0_285], %590 {strides = array<i32>} : memref<8x2x128xf32, #tpu.memory_space<vmem>>, vector<1x2x128xf32>,
    %c7_i32 = arith.constant 7 : i32
    %591 = arith.index_cast %c7_i32 : i32 to index
    %c0_286 = arith.constant 0 : index
    %c0_287 = arith.constant 0 : index
    %592 = vector.load %arg1[%591, %c0_286, %c0_287] : memref<8x2x16xf32, #tpu.memory_space<vmem>>, vector<1x2x16xf32>
    %593 = vector.shape_cast %592 : vector<1x2x16xf32> to vector<2x16xf32>
    %c0_288 = arith.constant 0 : index
    %c0_289 = arith.constant 0 : index
    %c0_290 = arith.constant 0 : index
    %594 = vector.load %arg13[%c0_288, %c0_289, %c0_290] : memref<2x2x32xf32, #tpu.memory_space<vmem>>, vector<1x2x32xf32>
    %595 = vector.shape_cast %594 : vector<1x2x32xf32> to vector<2x32xf32>
    %c0_291 = arith.constant 0 : index
    %c0_292 = arith.constant 0 : index
    %596 = vector.load %arg3[%c0_291, %c0_292] : memref<16x96xf32, #tpu.memory_space<vmem>>, vector<16x96xf32>
    %cst_293 = arith.constant dense<0.000000e+00> : vector<2x96xf32>
    %597 = tpu.matmul %593, %596, %cst_293 {dimension_numbers = #tpu.dot_dimension_numbers<[1], [0], [0], [1], [0, 0, 1, 1], [], []>} : vector<2x16xf32>, vector<16x96xf32>, vector<2x96xf32> -> vector<2x96xf32>
    %c0_294 = arith.constant 0 : index
    %c0_295 = arith.constant 0 : index
    %598 = vector.load %arg4[%c0_294, %c0_295] : memref<1x96xf32, #tpu.memory_space<vmem>>, vector<1x96xf32>
    %599 = vector.broadcast %598 : vector<1x96xf32> to vector<2x96xf32>
    %600 = arith.addf %597, %599 : vector<2x96xf32>
    %c0_296 = arith.constant 0 : index
    %c0_297 = arith.constant 0 : index
    %601 = vector.load %arg5[%c0_296, %c0_297] : memref<32x96xf32, #tpu.memory_space<vmem>>, vector<32x96xf32>
    %cst_298 = arith.constant dense<0.000000e+00> : vector<2x96xf32>
    %602 = tpu.matmul %595, %601, %cst_298 {dimension_numbers = #tpu.dot_dimension_numbers<[1], [0], [0], [1], [0, 0, 1, 1], [], []>} : vector<2x32xf32>, vector<32x96xf32>, vector<2x96xf32> -> vector<2x96xf32>
    %603 = vector.extract_strided_slice %600 {offsets = [0, 0], sizes = [2, 32], strides = [1, 1]} : vector<2x96xf32> to vector<2x32xf32>
    %604 = vector.extract_strided_slice %602 {offsets = [0, 0], sizes = [2, 32], strides = [1, 1]} : vector<2x96xf32> to vector<2x32xf32>
    %605 = arith.addf %603, %604 : vector<2x32xf32>
    %606 = arith.negf %605 : vector<2x32xf32>
    %607 = math.exp %606 : vector<2x32xf32>
    %cst_299 = arith.constant 1.000000e+00 : f32
    %608 = vector.broadcast %cst_299 : f32 to vector<2x32xf32>
    %609 = arith.addf %608, %607 : vector<2x32xf32>
    %610 = arith.divf %608, %609 : vector<2x32xf32>
    %611 = vector.extract_strided_slice %600 {offsets = [0, 32], sizes = [2, 32], strides = [1, 1]} : vector<2x96xf32> to vector<2x32xf32>
    %612 = vector.extract_strided_slice %602 {offsets = [0, 32], sizes = [2, 32], strides = [1, 1]} : vector<2x96xf32> to vector<2x32xf32>
    %613 = arith.addf %611, %612 : vector<2x32xf32>
    %614 = arith.negf %613 : vector<2x32xf32>
    %615 = math.exp %614 : vector<2x32xf32>
    %cst_300 = arith.constant 1.000000e+00 : f32
    %616 = vector.broadcast %cst_300 : f32 to vector<2x32xf32>
    %617 = arith.addf %616, %615 : vector<2x32xf32>
    %618 = arith.divf %616, %617 : vector<2x32xf32>
    %619 = vector.extract_strided_slice %600 {offsets = [0, 64], sizes = [2, 32], strides = [1, 1]} : vector<2x96xf32> to vector<2x32xf32>
    %620 = vector.extract_strided_slice %602 {offsets = [0, 64], sizes = [2, 32], strides = [1, 1]} : vector<2x96xf32> to vector<2x32xf32>
    %621 = arith.mulf %618, %620 : vector<2x32xf32>
    %622 = arith.addf %619, %621 : vector<2x32xf32>
    %623 = math.tanh %622 : vector<2x32xf32>
    %624 = arith.subf %595, %623 : vector<2x32xf32>
    %625 = arith.mulf %610, %624 : vector<2x32xf32>
    %626 = arith.addf %623, %625 : vector<2x32xf32>
    %c0_301 = arith.constant 0 : index
    %c0_302 = arith.constant 0 : index
    %c0_303 = arith.constant 0 : index
    %627 = vector.load %arg13[%c0_301, %c0_302, %c0_303] : memref<2x2x32xf32, #tpu.memory_space<vmem>>, vector<1x2x32xf32>
    %628 = vector.shape_cast %627 : vector<1x2x32xf32> to vector<2x32xf32>
    %629 = vector.shape_cast %626 : vector<2x32xf32> to vector<1x2x32xf32>
    tpu.vector_store %arg13[%c0_301, %c0_302, %c0_303], %629 {strides = array<i32>} : memref<2x2x32xf32, #tpu.memory_space<vmem>>, vector<1x2x32xf32>,
    %c1_304 = arith.constant 1 : index
    %c0_305 = arith.constant 0 : index
    %c0_306 = arith.constant 0 : index
    %630 = vector.load %arg13[%c1_304, %c0_305, %c0_306] : memref<2x2x32xf32, #tpu.memory_space<vmem>>, vector<1x2x32xf32>
    %631 = vector.shape_cast %630 : vector<1x2x32xf32> to vector<2x32xf32>
    %c0_307 = arith.constant 0 : index
    %c0_308 = arith.constant 0 : index
    %632 = vector.load %arg6[%c0_307, %c0_308] : memref<32x96xf32, #tpu.memory_space<vmem>>, vector<32x96xf32>
    %cst_309 = arith.constant dense<0.000000e+00> : vector<2x96xf32>
    %633 = tpu.matmul %626, %632, %cst_309 {dimension_numbers = #tpu.dot_dimension_numbers<[1], [0], [0], [1], [0, 0, 1, 1], [], []>} : vector<2x32xf32>, vector<32x96xf32>, vector<2x96xf32> -> vector<2x96xf32>
    %c0_310 = arith.constant 0 : index
    %c0_311 = arith.constant 0 : index
    %634 = vector.load %arg7[%c0_310, %c0_311] : memref<1x96xf32, #tpu.memory_space<vmem>>, vector<1x96xf32>
    %635 = vector.broadcast %634 : vector<1x96xf32> to vector<2x96xf32>
    %636 = arith.addf %633, %635 : vector<2x96xf32>
    %c0_312 = arith.constant 0 : index
    %c0_313 = arith.constant 0 : index
    %637 = vector.load %arg8[%c0_312, %c0_313] : memref<32x96xf32, #tpu.memory_space<vmem>>, vector<32x96xf32>
    %cst_314 = arith.constant dense<0.000000e+00> : vector<2x96xf32>
    %638 = tpu.matmul %631, %637, %cst_314 {dimension_numbers = #tpu.dot_dimension_numbers<[1], [0], [0], [1], [0, 0, 1, 1], [], []>} : vector<2x32xf32>, vector<32x96xf32>, vector<2x96xf32> -> vector<2x96xf32>
    %639 = vector.extract_strided_slice %636 {offsets = [0, 0], sizes = [2, 32], strides = [1, 1]} : vector<2x96xf32> to vector<2x32xf32>
    %640 = vector.extract_strided_slice %638 {offsets = [0, 0], sizes = [2, 32], strides = [1, 1]} : vector<2x96xf32> to vector<2x32xf32>
    %641 = arith.addf %639, %640 : vector<2x32xf32>
    %642 = arith.negf %641 : vector<2x32xf32>
    %643 = math.exp %642 : vector<2x32xf32>
    %cst_315 = arith.constant 1.000000e+00 : f32
    %644 = vector.broadcast %cst_315 : f32 to vector<2x32xf32>
    %645 = arith.addf %644, %643 : vector<2x32xf32>
    %646 = arith.divf %644, %645 : vector<2x32xf32>
    %647 = vector.extract_strided_slice %636 {offsets = [0, 32], sizes = [2, 32], strides = [1, 1]} : vector<2x96xf32> to vector<2x32xf32>
    %648 = vector.extract_strided_slice %638 {offsets = [0, 32], sizes = [2, 32], strides = [1, 1]} : vector<2x96xf32> to vector<2x32xf32>
    %649 = arith.addf %647, %648 : vector<2x32xf32>
    %650 = arith.negf %649 : vector<2x32xf32>
    %651 = math.exp %650 : vector<2x32xf32>
    %cst_316 = arith.constant 1.000000e+00 : f32
    %652 = vector.broadcast %cst_316 : f32 to vector<2x32xf32>
    %653 = arith.addf %652, %651 : vector<2x32xf32>
    %654 = arith.divf %652, %653 : vector<2x32xf32>
    %655 = vector.extract_strided_slice %636 {offsets = [0, 64], sizes = [2, 32], strides = [1, 1]} : vector<2x96xf32> to vector<2x32xf32>
    %656 = vector.extract_strided_slice %638 {offsets = [0, 64], sizes = [2, 32], strides = [1, 1]} : vector<2x96xf32> to vector<2x32xf32>
    %657 = arith.mulf %654, %656 : vector<2x32xf32>
    %658 = arith.addf %655, %657 : vector<2x32xf32>
    %659 = math.tanh %658 : vector<2x32xf32>
    %660 = arith.subf %631, %659 : vector<2x32xf32>
    %661 = arith.mulf %646, %660 : vector<2x32xf32>
    %662 = arith.addf %659, %661 : vector<2x32xf32>
    %c1_317 = arith.constant 1 : index
    %c0_318 = arith.constant 0 : index
    %c0_319 = arith.constant 0 : index
    %663 = vector.load %arg13[%c1_317, %c0_318, %c0_319] : memref<2x2x32xf32, #tpu.memory_space<vmem>>, vector<1x2x32xf32>
    %664 = vector.shape_cast %663 : vector<1x2x32xf32> to vector<2x32xf32>
    %665 = vector.shape_cast %662 : vector<2x32xf32> to vector<1x2x32xf32>
    tpu.vector_store %arg13[%c1_317, %c0_318, %c0_319], %665 {strides = array<i32>} : memref<2x2x32xf32, #tpu.memory_space<vmem>>, vector<1x2x32xf32>,
    %c0_320 = arith.constant 0 : index
    %c0_321 = arith.constant 0 : index
    %666 = vector.load %arg9[%c0_320, %c0_321] : memref<32x128xf32, #tpu.memory_space<vmem>>, vector<32x128xf32>
    %cst_322 = arith.constant dense<0.000000e+00> : vector<2x128xf32>
    %667 = tpu.matmul %662, %666, %cst_322 {dimension_numbers = #tpu.dot_dimension_numbers<[1], [0], [0], [1], [0, 0, 1, 1], [], []>} : vector<2x32xf32>, vector<32x128xf32>, vector<2x128xf32> -> vector<2x128xf32>
    %c0_323 = arith.constant 0 : index
    %c0_324 = arith.constant 0 : index
    %668 = vector.load %arg10[%c0_323, %c0_324] : memref<1x128xf32, #tpu.memory_space<vmem>>, vector<1x128xf32>
    %669 = vector.broadcast %668 : vector<1x128xf32> to vector<2x128xf32>
    %670 = arith.addf %667, %669 : vector<2x128xf32>
    %671 = arith.index_cast %c7_i32 : i32 to index
    %c0_325 = arith.constant 0 : index
    %c0_326 = arith.constant 0 : index
    %672 = vector.load %arg11[%671, %c0_325, %c0_326] : memref<8x2x128xf32, #tpu.memory_space<vmem>>, vector<1x2x128xf32>
    %673 = vector.shape_cast %672 : vector<1x2x128xf32> to vector<2x128xf32>
    %674 = vector.shape_cast %670 : vector<2x128xf32> to vector<1x2x128xf32>
    tpu.vector_store %arg11[%671, %c0_325, %c0_326], %674 {strides = array<i32>} : memref<8x2x128xf32, #tpu.memory_space<vmem>>, vector<1x2x128xf32>,
    %c8_i32 = arith.constant 8 : i32
    %c0_i32_327 = arith.constant 0 : i32
    %675 = arith.cmpi eq, %arg0, %c0_i32_327 : i32
    %676 = arith.extui %675 : i1 to i32
    %c0_i32_328 = arith.constant 0 : i32
    %677 = arith.cmpi ne, %676, %c0_i32_328 : i32
    scf.if %677 {
      %c0_329 = arith.constant 0 : index
      %c0_330 = arith.constant 0 : index
      %c0_331 = arith.constant 0 : index
      %678 = vector.load %arg13[%c0_329, %c0_330, %c0_331] : memref<2x2x32xf32, #tpu.memory_space<vmem>>, vector<2x2x32xf32>
      %c0_332 = arith.constant 0 : index
      %c0_333 = arith.constant 0 : index
      %c0_334 = arith.constant 0 : index
      %679 = vector.load %arg12[%c0_332, %c0_333, %c0_334] : memref<2x2x32xf32, #tpu.memory_space<vmem>>, vector<2x2x32xf32>
      tpu.vector_store %arg12[%c0_332, %c0_333, %c0_334], %678 {strides = array<i32>} : memref<2x2x32xf32, #tpu.memory_space<vmem>>, vector<2x2x32xf32>,
    } else {
    }
    return
  }
  func.func @transform_0(%arg0: i32) -> (i32, i32, i32) {
    %c0_i32 = arith.constant 0 : i32
    %c0_i32_0 = arith.constant 0 : i32
    %c0_i32_1 = arith.constant 0 : i32
    return %arg0, %c0_i32, %c0_i32_0 : i32, i32, i32
  }
  func.func @transform_1(%arg0: i32) -> (i32, i32, i32) {
    %c0_i32 = arith.constant 0 : i32
    %c0_i32_0 = arith.constant 0 : i32
    %c0_i32_1 = arith.constant 0 : i32
    %c0_i32_2 = arith.constant 0 : i32
    return %c0_i32, %c0_i32_0, %c0_i32_1 : i32, i32, i32
  }
  func.func @transform_2(%arg0: i32) -> (i32, i32) {
    %c0_i32 = arith.constant 0 : i32
    %c0_i32_0 = arith.constant 0 : i32
    %c0_i32_1 = arith.constant 0 : i32
    return %c0_i32, %c0_i32_0 : i32, i32
  }
  func.func @transform_3(%arg0: i32) -> (i32, i32) {
    %c0_i32 = arith.constant 0 : i32
    %c0_i32_0 = arith.constant 0 : i32
    %c0_i32_1 = arith.constant 0 : i32
    return %c0_i32, %c0_i32_0 : i32, i32
  }
  func.func @transform_4(%arg0: i32) -> (i32, i32) {
    %c0_i32 = arith.constant 0 : i32
    %c0_i32_0 = arith.constant 0 : i32
    %c0_i32_1 = arith.constant 0 : i32
    return %c0_i32, %c0_i32_0 : i32, i32
  }
  func.func @transform_5(%arg0: i32) -> (i32, i32) {
    %c0_i32 = arith.constant 0 : i32
    %c0_i32_0 = arith.constant 0 : i32
    %c0_i32_1 = arith.constant 0 : i32
    return %c0_i32, %c0_i32_0 : i32, i32
  }
  func.func @transform_6(%arg0: i32) -> (i32, i32) {
    %c0_i32 = arith.constant 0 : i32
    %c0_i32_0 = arith.constant 0 : i32
    %c0_i32_1 = arith.constant 0 : i32
    return %c0_i32, %c0_i32_0 : i32, i32
  }
  func.func @transform_7(%arg0: i32) -> (i32, i32) {
    %c0_i32 = arith.constant 0 : i32
    %c0_i32_0 = arith.constant 0 : i32
    %c0_i32_1 = arith.constant 0 : i32
    return %c0_i32, %c0_i32_0 : i32, i32
  }
  func.func @transform_8(%arg0: i32) -> (i32, i32) {
    %c0_i32 = arith.constant 0 : i32
    %c0_i32_0 = arith.constant 0 : i32
    %c0_i32_1 = arith.constant 0 : i32
    return %c0_i32, %c0_i32_0 : i32, i32
  }
  func.func @transform_9(%arg0: i32) -> (i32, i32) {
    %c0_i32 = arith.constant 0 : i32
    %c0_i32_0 = arith.constant 0 : i32
    %c0_i32_1 = arith.constant 0 : i32
    return %c0_i32, %c0_i32_0 : i32, i32
  }
  func.func @transform_10(%arg0: i32) -> (i32, i32, i32) {
    %c0_i32 = arith.constant 0 : i32
    %c0_i32_0 = arith.constant 0 : i32
    %c0_i32_1 = arith.constant 0 : i32
    return %arg0, %c0_i32, %c0_i32_0 : i32, i32, i32
  }
  func.func @transform_11(%arg0: i32) -> (i32, i32, i32) {
    %c0_i32 = arith.constant 0 : i32
    %c0_i32_0 = arith.constant 0 : i32
    %c0_i32_1 = arith.constant 0 : i32
    %c0_i32_2 = arith.constant 0 : i32
    return %c0_i32, %c0_i32_0, %c0_i32_1 : i32, i32, i32
  }
}

</mosaic_0001>

<bundles_post_ra>
// kernel: tpu_custom_call.1
= control target key start
LH: loop header
LB: loop body
LE: loop exit
PB: predicated region body
PF: predicated region fallthrough
CT: control target
= control target key end

     0   :  { %17 = vsyncpa [#allocation4], 0  ;;  %s5903_s0 = inlined_call_operand.hbm [shape: f32[8,2,16], index: 0, kind: input, shape index: {}]   ;;  %s5904_s1 = inlined_call_operand.hbm [shape: f32[2,2,32], index: 1, kind: input, shape index: {}]   ;;  %s5905_s2 = inlined_call_operand.hbm [shape: f32[16,96], index: 2, kind: input, shape index: {}]   ;;  %s5906_s3 = inlined_call_operand.vmem [shape: f32[1,96], index: 3, kind: input, shape index: {}]   ;;  %s5907_s4 = inlined_call_operand.hbm [shape: f32[32,96], index: 4, kind: input, shape index: {}]   ;;  %s5908_s5 = inlined_call_operand.hbm [shape: f32[32,96], index: 5, kind: input, shape index: {}]   ;;  %s5909_s6 = inlined_call_operand.vmem [shape: f32[1,96], index: 6, kind: input, shape index: {}]   ;;  %s5910_s7 = inlined_call_operand.hbm [shape: f32[32,96], index: 7, kind: input, shape index: {}]   ;;  %s5911_s8 = inlined_call_operand.hbm [shape: f32[32,128], index: 8, kind: input, shape index: {}]   ;;  %s5912_s9 = inlined_call_operand.vmem [shape: f32[1,128], index: 9, kind: input, shape index: {}]   ;;  %s5913_s10 = inlined_call_operand.hbm [shape: f32[8,2,128], index: 10, kind: output, shape index: {0}]   ;;  %s5914_s11 = inlined_call_operand.hbm [shape: f32[2,2,32], index: 11, kind: output, shape index: {1}]  }
   0x1   :  { %18 = vsyncpa [#allocation7], 0 }
   0x2   :  { %19 = vsyncpa [#allocation10], 0 }
   0x3   :  { %20 = vsyncpa [#allocation13], 0 }
   0x4   :  { %21 = vsyncpa [#allocation5], 0 }
   0x5   :  { %22 = vsyncpa [#allocation17], 0  ;;  %s5208_s17 = smov [#allocation6]   ;;  %s4998_s21 = scalar_lea.hbm %s5904_s1, 64 }
   0x6   :  { %s40_s18 = sshll.u32 %s5208_s17, 4  ;;  %p4999_p0 = scmp.ne.s32.totalorder %s5904_s1, %s4998_s21  ;;  %s41_s18 = int_to_ptr.vmem [resolvable:$true] %s40_s18 }
   0x7   :  { %p5002_p1 = scmp.lt.u32.totalorder %s4998_s21, %s5904_s1 }
   0x9   :  { %p5004_p2 = pnand %p5002_p1, %p4999_p0 }
   0xb   :  { %5007 = shalt.err (!%p5004_p2)
}
   0xc   :  { %s5008_s26 = scalar_lea.vmem %s41_s18, 64  ;;  %p5013_p4 = scmp.lt.s32.totalorder %s41_s18, %s41_s18 }
   0xd   :  { %p5009_p3 = scmp.ne.s32.totalorder %s41_s18, %s5008_s26  ;;  %p5014_p5 = scmp.lt.s32.totalorder %s5008_s26, %s5008_s26 }
   0xf   :  { %p5015_p6 = por %p5014_p5, %p5013_p4 }
  0x11   :  { %p5016_p7 = pnand %p5015_p6, %p5009_p3 }
  0x13   :  { %5019 = shalt.err (!%p5016_p7)
}
  0x14   :  { %s5209_s27 = smov 32   ;;  %s5210_s28 = smov 2  }
  0x15   :  { %46 = dma.hbm_to_vmem [thread:$0]  %s5904_s1, 64, %s41_s18, [#allocation7], %s5209_s27, %s5209_s27, %s5210_s28  }
  0x16   :  { %s5211_s12 = smov [#allocation9]   ;;  %s5212_s14 = smov [#allocation12]  }
  0x17   :  { %s66_s13 = sshll.u32 %s5211_s12, 4  ;;  %s92_s15 = sshll.u32 %s5212_s14, 4  ;;  %s67_s13 = int_to_ptr.vmem [resolvable:$true] %s66_s13  ;;  %s93_s15 = int_to_ptr.vmem [resolvable:$true] %s92_s15 }
  0x18   :  { %s5020_s19 = scalar_lea.hbm %s5907_s4, 512 }
  0x19   :  { %p5021_p8 = scmp.ne.s32.totalorder %s5907_s4, %s5020_s19  ;;  %p5024_p9 = scmp.lt.u32.totalorder %s5020_s19, %s5907_s4 }
  0x1b   :  { %p5026_p10 = pnand %p5024_p9, %p5021_p8 }
  0x1d   :  { %5029 = shalt.err (!%p5026_p10)
}
  0x1e   :  { %s5030_s1 = scalar_lea.vmem %s67_s13, 512  ;;  %p5035_p12 = scmp.lt.s32.totalorder %s67_s13, %s67_s13 }
  0x1f   :  { %p5031_p11 = scmp.ne.s32.totalorder %s67_s13, %s5030_s1  ;;  %p5036_p13 = scmp.lt.s32.totalorder %s5030_s1, %s5030_s1 }
  0x21   :  { %p5037_p0 = por %p5036_p13, %p5035_p12 }
  0x23   :  { %p5038_p1 = pnand %p5037_p0, %p5031_p11 }
  0x25   :  { %5041 = shalt.err (!%p5038_p1)
}
  0x26   :  { %s5213_s18 = smov 128   ;;  %s5214_s24 = smov 8  }
  0x27   :  { %72 = dma.hbm_to_vmem [thread:$0]  %s5907_s4, 512, %s67_s13, [#allocation10], %s5213_s18, %s5213_s18, %s5214_s24  }
  0x28   :  { %s5042_s12 = scalar_lea.hbm %s5910_s7, 512 }
  0x29   :  { %p5043_p2 = scmp.ne.s32.totalorder %s5910_s7, %s5042_s12  ;;  %p5046_p3 = scmp.lt.u32.totalorder %s5042_s12, %s5910_s7 }
  0x2b   :  { %p5048_p4 = pnand %p5046_p3, %p5043_p2 }
  0x2d   :  { %5051 = shalt.err (!%p5048_p4)
}
  0x2e   :  { %s5052_s20 = scalar_lea.vmem %s93_s15, 512  ;;  %p5057_p6 = scmp.lt.s32.totalorder %s93_s15, %s93_s15 }
  0x2f   :  { %p5053_p5 = scmp.ne.s32.totalorder %s93_s15, %s5052_s20  ;;  %p5058_p7 = scmp.lt.s32.totalorder %s5052_s20, %s5052_s20 }
  0x31   :  { %p5059_p8 = por %p5058_p7, %p5057_p6 }
  0x33   :  { %p5060_p9 = pnand %p5059_p8, %p5053_p5 }
  0x35   :  { %5063 = shalt.err (!%p5060_p9)
}
  0x36   :  { %98 = dma.hbm_to_vmem [thread:$0]  %s5910_s7, 512, %s93_s15, [#allocation13], %s5213_s18, %s5213_s18, %s5214_s24  }
  0x37   :  { %s5215_s21 = smov [#allocation3]   ;;  %s5216_s23 = smov [#allocation8]  }
  0x38   :  { %s28_s22 = sshll.u32 %s5215_s21, 4  ;;  %s52_s1 = sshll.u32 %s5216_s23, 4  ;;  %s29_s22 = int_to_ptr.vmem [resolvable:$true] %s28_s22  ;;  %s53_s1 = int_to_ptr.vmem [resolvable:$true] %s52_s1 }
  0x39   :  { %s5064_s29 = scalar_lea.hbm %s5903_s0, 256 }
  0x3a   :  { %p5065_p10 = scmp.ne.s32.totalorder %s5903_s0, %s5064_s29  ;;  %p5068_p11 = scmp.lt.u32.totalorder %s5064_s29, %s5903_s0 }
  0x3c   :  { %p5070_p12 = pnand %p5068_p11, %p5065_p10 }
  0x3e   :  { %5073 = shalt.err (!%p5070_p12)
}
  0x3f   :  { %s5074_s7 = scalar_lea.vmem %s29_s22, 256  ;;  %p5079_p0 = scmp.lt.s32.totalorder %s29_s22, %s29_s22 }
  0x40   :  { %p5075_p13 = scmp.ne.s32.totalorder %s29_s22, %s5074_s7  ;;  %p5080_p1 = scmp.lt.s32.totalorder %s5074_s7, %s5074_s7 }
  0x42   :  { %p5081_p2 = por %p5080_p1, %p5079_p0 }
  0x44   :  { %p5082_p3 = pnand %p5081_p2, %p5075_p13 }
  0x46   :  { %5085 = shalt.err (!%p5082_p3)
}
  0x47   :  { %34 = dma.hbm_to_vmem [thread:$0]  %s5903_s0, 256, %s29_s22, [#allocation4], %s5209_s27, %s5209_s27, %s5210_s28  }
  0x48   :  { %s5086_s4 = scalar_lea.hbm %s5905_s2, 256 }
  0x49   :  { %p5087_p4 = scmp.ne.s32.totalorder %s5905_s2, %s5086_s4  ;;  %p5090_p5 = scmp.lt.u32.totalorder %s5086_s4, %s5905_s2 }
  0x4b   :  { %p5092_p6 = pnand %p5090_p5, %p5087_p4 }
  0x4d   :  { %5095 = shalt.err (!%p5092_p6)
}
  0x4e   :  { %s5096_s26 = scalar_lea.vmem %s53_s1, 256  ;;  %p5101_p8 = scmp.lt.s32.totalorder %s53_s1, %s53_s1 }
  0x4f   :  { %p5097_p7 = scmp.ne.s32.totalorder %s53_s1, %s5096_s26  ;;  %p5102_p9 = scmp.lt.s32.totalorder %s5096_s26, %s5096_s26 }
  0x51   :  { %p5103_p10 = por %p5102_p9, %p5101_p8 }
  0x53   :  { %p5104_p11 = pnand %p5103_p10, %p5097_p7 }
  0x55   :  { %5107 = shalt.err (!%p5104_p11)
}
  0x56   :  { %58 = dma.hbm_to_vmem [thread:$0]  %s5905_s2, 256, %s53_s1, [#allocation7], %s5213_s18, %s5213_s18, %s5214_s24  }
  0x57   :  { %s5217_s29 = smov [#allocation11]   ;;  %s5218_s12 = smov [#allocation14]  }
  0x58   :  { %s78_s30 = sshll.u32 %s5217_s29, 4  ;;  %s104_s14 = sshll.u32 %s5218_s12, 4  ;;  %s79_s30 = int_to_ptr.vmem [resolvable:$true] %s78_s30  ;;  %s105_s14 = int_to_ptr.vmem [resolvable:$true] %s104_s14 }
  0x59   :  { %s5108_s15 = scalar_lea.hbm %s5908_s5, 512 }
  0x5a   :  { %p5109_p12 = scmp.ne.s32.totalorder %s5908_s5, %s5108_s15  ;;  %p5112_p13 = scmp.lt.u32.totalorder %s5108_s15, %s5908_s5 }
  0x5c   :  { %p5114_p0 = pnand %p5112_p13, %p5109_p12 }
  0x5e   :  { %5117 = shalt.err (!%p5114_p0)
}
  0x5f   :  { %s5118_s2 = scalar_lea.vmem %s79_s30, 512  ;;  %p5123_p2 = scmp.lt.s32.totalorder %s79_s30, %s79_s30 }
  0x60   :  { %p5119_p1 = scmp.ne.s32.totalorder %s79_s30, %s5118_s2  ;;  %p5124_p3 = scmp.lt.s32.totalorder %s5118_s2, %s5118_s2 }
  0x62   :  { %p5125_p4 = por %p5124_p3, %p5123_p2 }
  0x64   :  { %p5126_p5 = pnand %p5125_p4, %p5119_p1 }
  0x66   :  { %5129 = shalt.err (!%p5126_p5)
}
  0x67   :  { %84 = dma.hbm_to_vmem [thread:$0]  %s5908_s5, 512, %s79_s30, [#allocation10], %s5213_s18, %s5213_s18, %s5214_s24  }
  0x68   :  { %s5130_s25 = scalar_lea.hbm %s5911_s8, 512 }
  0x69   :  { %p5131_p6 = scmp.ne.s32.totalorder %s5911_s8, %s5130_s25  ;;  %p5134_p7 = scmp.lt.u32.totalorder %s5130_s25, %s5911_s8 }
  0x6b   :  { %p5136_p8 = pnand %p5134_p7, %p5131_p6 }
  0x6d   :  { %5139 = shalt.err (!%p5136_p8)
}
  0x6e   :  { %s5140_s12 = scalar_lea.vmem %s105_s14, 512  ;;  %p5145_p10 = scmp.lt.s32.totalorder %s105_s14, %s105_s14 }
  0x6f   :  { %p5141_p9 = scmp.ne.s32.totalorder %s105_s14, %s5140_s12  ;;  %p5146_p11 = scmp.lt.s32.totalorder %s5140_s12, %s5140_s12 }
  0x71   :  { %p5147_p12 = por %p5146_p11, %p5145_p10 }
  0x73   :  { %p5148_p13 = pnand %p5147_p12, %p5141_p9 }
  0x75   :  { %5151 = shalt.err (!%p5148_p13)
}
  0x76   :  { %110 = dma.hbm_to_vmem [thread:$0]  %s5911_s8, 512, %s105_s14, [#allocation13], %s5213_s18, %s5213_s18, %s5214_s24  }
  0x77   :  { %5196 = dma.done.wait [#allocation4], 256  }
  0x78   :  { %5197 = vsyncadd [#allocation4], 4294967040 }
  0x79   :  { %5198 = dma.done.wait [#allocation7], 320  }
  0x7a   :  { %5199 = vsyncadd [#allocation7], 4294966976 }
  0x7b   :  { %5200 = dma.done.wait [#allocation10], 1024  }
  0x7c   :  { %5201 = vsyncadd [#allocation10], 4294966272 }
  0x7d   :  { %5202 = dma.done.wait [#allocation13], 1024  }
  0x7e   :  { %5203 = vsyncadd [#allocation13], 4294966272  ;;  %v5219_v0 = vmov 0.0|0.0   ;;  %vm5220_vm0 = vmmov 0   ;;  %v5221_v1 = vmov 0.0   ;;  %v228_v2 = vld [vmem:[#allocation9] sm:$0xff] }
  0x7f   :  { %4671 = vmatprep.subr.bf16.mxu1 %v5219_v0  ;;  %4668 = vmatprep.subr.bf16.mxu0 %v5219_v0  ;;  %v229_v3 = vld [vmem:[#allocation9 + $0x8] sm:$0xff]  ;;  %v145_v4 = vld [vmem:[#allocation8] sm:$0xff]  ;;  %vm140_vm1 = vcmask 254976   ;;  %v146_v6 = vld [vmem:[#allocation8 + $0x8] sm:$0xff]  ;;  %vm154_vm2 = vcmask 130048   ;;  %vm232_vm3 = vcmask 261120  }
  0x80   :  { %4264 = vmatprep.mubr.msk.f32.mxu0 %vm5220_vm0, %v5221_v1  ;;  %4275 = vmatprep.mubr.msk.f32.mxu1 %vm5220_vm0, %v5221_v1  ;;  %v5397_v5 = vpack.c.bf16 %v229_v3, %v228_v2  ;;  %v230_v7 = vld [vmem:[#allocation9 + $0x10] sm:$0xff]  ;;  %v231_v8 = vld [vmem:[#allocation9 + $0x18] sm:$0xff]  ;;  %v5399_v9 = vpack.c.bf16 %v146_v6, %v145_v4  ;;  %v138_v10 = vld [vmem:[#allocation6] sm:$0x3]  ;;  %s5222_s8 = smov 96   ;;  %s5223_s14 = smov 64  }
  0x81   :  { %v5402_v11 = vpack.c.bf16 %v231_v8, %v230_v7  ;;  %141 = vst.msk [vmem:[#allocation2] sm:$0x3] %vm140_vm1, %v138_v10  ;;  %v143_v12 = vld [vmem:[#allocation3] sm:$0x3]  ;;  %v5420_v18 = vld [vmem:[%s5906_s3] ss:$0 sm:$0xff] }
  0x82   :  { %4673 = vmatpush3.bf16.msra.mxu1 %v5397_v5  ;;  %4670 = vmatpush3.bf16.msra.mxu0 %v5399_v9  ;;  %v426_v30 = vld [vmem:[#allocation12] sm:$0xff]  ;;  %v427_v31 = vld [vmem:[#allocation12 + $0x8] sm:$0xff]  ;;  %v428_v32 = vld [vmem:[#allocation12 + $0x10] sm:$0xff] }
  0x83   :  { %4674 = vmatprep.subr.bf16.mxu1 %v5219_v0  ;;  %4677 = vmatprep.subr.bf16.mxu0 %v5219_v0  ;;  %v5425_v33 = vpack.c.bf16 %v427_v31, %v426_v30  ;;  %v429_v34 = vld [vmem:[#allocation12 + $0x18] sm:$0xff]  ;;  %v139_v35 = vld [vmem:[#allocation6 + $0x2] sm:$0x3]  ;;  %v343_v36 = vld [vmem:[#allocation11] sm:$0xff] }
  0x84   :  { %142 = vst.msk [vmem:[#allocation2 + $0x2] sm:$0x3] %vm140_vm1, %v139_v35  ;;  %v344_v37 = vld [vmem:[#allocation11 + $0x8] sm:$0xff]  ;;  %v345_v38 = vld [vmem:[#allocation11 + $0x10] sm:$0xff]  ;;  %v346_v39 = vld [vmem:[#allocation11 + $0x18] sm:$0xff]  ;;  %v5429_v40 = vpack.c.bf16 %v429_v34, %v428_v32 }
  0x85   :  { %4265 = vmatmul.mubr.msk.f32.vlgmr.msra.gmra.mrb[0].mxu0 %vm154_vm2, %v143_v12  ;;  %v5431_v41 = vpack.c.bf16 %v344_v37, %v343_v36  ;;  %v5435_v42 = vpack.c.bf16 %v346_v39, %v345_v38  ;;  %v5457_v52 = vld [vmem:[%s5909_s6] ss:$0 sm:$0xff]  ;;  %v537_v4 = vld [vmem:[#allocation14] sm:$0xff]  ;;  %v538_v6 = vld [vmem:[#allocation14 + $0x8] sm:$0xff] }
  0x86   :  { %4676 = vmatpush3.bf16.msra.mxu1 %v5402_v11  ;;  %4286 = vmatprep.mubr.msk.f32.mxu0 %vm5220_vm0, %v5221_v1  ;;  %v539_v7 = vld [vmem:[#allocation14 + $0x10] sm:$0xff]  ;;  %v5462_v8 = vpack.c.bf16 %v538_v6, %v537_v4  ;;  %v540_v10 = vld [vmem:[#allocation14 + $0x18] sm:$0xff] }
  0x87   :  { %4683 = vmatprep.subr.bf16.mxu1 %v5219_v0  ;;  %4679 = vmatpush3.bf16.msra.mxu0 %v5431_v41  ;;  %v5465_v12 = vpack.c.bf16 %v540_v10, %v539_v7 }
  0x88   :  { %v144_v13 = vld [vmem:[#allocation2] sm:$0x3]  ;;  %4680 = vmatprep.subr.bf16.mxu0 %v5219_v0 }
  0x89   :  { %4276 = vmatmul.mubr.msk.f32.vlgmr.msra.gmra.mrb[0].mxu1 %vm232_vm3, %v144_v13 }
  0x8a   :  { %4297 = vmatprep.mubr.msk.f32.mxu1 %vm5220_vm0, %v5221_v1  ;;  %4685 = vmatpush3.bf16.msra.mxu1 %v5425_v33 }
  0x8b   :  { %4686 = vmatprep.subr.bf16.mxu1 %v5219_v0  ;;  %v342_v46 = vld [vmem:[#allocation2 + $0x2] sm:$0x3]  ;;  %4682 = vmatpush3.bf16.msra.mxu0 %v5435_v42 }
  0x8c   :  { %4689 = vmatprep.subr.bf16.mxu0 %v5219_v0 }
  0x8e   :  { %4688 = vmatpush3.bf16.msra.mxu1 %v5429_v40 }
  0x8f   :  { %4695 = vmatprep.subr.bf16.mxu1 %v5219_v0 }
  0x91   :  { %4298 = vmatmul.mubr.msk.f32.vlgmr.msra.gmra.mrb[2].mxu1 %vm232_vm3, %v342_v46 }
  0x92   :  { %4697 = vmatpush3.bf16.msra.mxu1 %v5399_v9  ;;  %4315 = vmatprep.mubr.msk.f32.mxu1 %vm5220_vm0, %v5221_v1 }
  0x93   :  { %4704 = vmatprep.subr.bf16.mxu1 %v5219_v0 }
 0x158   :  { %v224_v14 = vpop.f32.mrb[0].mxu0 }
 0x159   :  { %v4266_v15 = vpop.f32.mrb[1].mxu0  ;;  %v225_v19 = vadd.f32 %v5420_v18, %v224_v14 }
 0x15c   :  { %v302_v16 = vpop.f32.mrb[0].mxu1 }
 0x15d   :  { %314 = vrot.lane.b32.xlu0 %v302_v16, %s5222_s8  ;;  %v4277_v17 = vpop.f32.mrb[1].mxu1  ;;  %v306_v20 = vadd.f32 %v302_v16, %v225_v19  ;;  %v622_v16 = vld [vmem:[#allocation3 + $0x2] sm:$0x3] }
 0x15e   :  { %4316 = vmatmul.mubr.msk.f32.vlgmr.msra.gmra.mrb[4].mxu1 %vm154_vm2, %v622_v16 }
 0x15f   :  { %v3999_v21 = vmul.f32 -1.442695, %v306_v20  ;;  %4706 = vmatpush3.bf16.msra.mxu1 %v5431_v41  ;;  %4337 = vmatprep.mubr.msk.f32.mxu1 %vm5220_vm0, %v5221_v1 }
 0x160   :  { %4707 = vmatprep.subr.bf16.mxu1 %v5219_v0 }
 0x161   :  { %4902 = vpow2.f32 %v3999_v21 }
 0x163   :  { %4709 = vmatpush3.bf16.msra.mxu1 %v5435_v42 }
 0x164   :  { %v499_v49 = vpop.f32.mrb[2].mxu1  ;;  %4716 = vmatprep.subr.bf16.mxu1 %v5219_v0 }
 0x165   :  { %v4299_v50 = vpop.f32.mrb[3].mxu1 }
 0x16b   :  { %v4903_v22 = vpop.eup %4902 }
 0x16c   :  { %v310_v23 = vadd.f32 1.0, %v4903_v22 }
 0x16e   :  { %4904 = vrcp.f32 %v310_v23 }
 0x178   :  { %v4905_v24 = vpop.eup %4904 }
 0x1cf   :  { %v315_v25 = vpop.permute.xlu0 %314 }
 0x1d0   :  { %v317_v26 = vmul.f32 %v4905_v24, %v315_v25  ;;  %v5505_v25 = vld [vmem:[%s5912_s9] ss:$0 sm:$0xff] }
 0x1d2   :  { %319 = vrot.lane.b32.xlu0 %v317_v26, %s5209_s27 }
 0x231   :  { %v702_v23 = vpop.f32.mrb[4].mxu1 }
 0x232   :  { %v703_v34 = vadd.f32 %v5420_v18, %v702_v23 }
 0x244   :  { %v320_v27 = vpop.permute.xlu0 %319 }
 0x245   :  { %v322_v28 = vadd.f32 %v320_v27, %v225_v19 }
 0x247   :  { %4906 = vtanh.f32 %v322_v28 }
 0x251   :  { %v4907_v29 = vpop.eup %4906 }
 0x252   :  { %325 = vrot.lane.b32.xlu1 %v4907_v29, %s5223_s14 }
 0x2c4   :  { %v326_v43 = vpop.permute.xlu1 %325 }
 0x2c5   :  { %v328_v44 = vsub.f32 %v144_v13, %v326_v43 }
 0x2c7   :  { %v329_v45 = vmul.f32 %v4905_v24, %v328_v44  ;;  %v4317_v24 = vpop.f32.mrb[5].mxu1 }
 0x2c9   :  { %331 = vrot.lane.b32.xlu1 %v329_v45, %s5223_s14 }
 0x2cd   :  { %511 = vrot.lane.b32.xlu1 %v499_v49, %s5222_s8 }
 0x33b   :  { %v332_v47 = vpop.permute.xlu1 %331 }
 0x33c   :  { %v334_v48 = vadd.f32 %v4907_v29, %v332_v47 }
 0x33e   :  { %336 = vrot.lane.b32.xlu0 %v334_v48, %s5223_s14 }
 0x33f   :  { %v512_v60 = vpop.permute.xlu1 %511 }
 0x3b0   :  { %v337_v51 = vpop.permute.xlu0 %336 }
 0x3b1   :  { %340 = vst.msk [vmem:[#allocation2] sm:$0x3] %vm140_vm1, %v337_v51  ;;  %4287 = vmatmul.mubr.msk.f32.vlgmr.msra.gmra.mrb[2].mxu0 %vm232_vm3, %v337_v51 }
 0x3b2   :  { %4308 = vmatprep.mubr.msk.f32.mxu0 %vm5220_vm0, %v5221_v1  ;;  %4691 = vmatpush3.bf16.msra.mxu0 %v5462_v8 }
 0x3b3   :  { %4692 = vmatprep.subr.bf16.mxu0 %v5219_v0 }
 0x3b6   :  { %4694 = vmatpush3.bf16.msra.mxu0 %v5465_v12 }
 0x3b7   :  { %4698 = vmatprep.subr.bf16.mxu0 %v5219_v0 }
 0x3b8   :  { %v623_v21 = vld [vmem:[#allocation2] sm:$0x3] }
 0x484   :  { %v422_v53 = vpop.f32.mrb[2].mxu0 }
 0x485   :  { %v423_v54 = vadd.f32 %v5457_v52, %v422_v53  ;;  %v4288_v55 = vpop.f32.mrb[3].mxu0 }
 0x487   :  { %v503_v56 = vadd.f32 %v499_v49, %v423_v54 }
 0x489   :  { %v4003_v57 = vmul.f32 -1.442695, %v503_v56 }
 0x48b   :  { %4908 = vpow2.f32 %v4003_v57 }
 0x495   :  { %v4909_v58 = vpop.eup %4908 }
 0x496   :  { %v507_v59 = vadd.f32 1.0, %v4909_v58 }
 0x498   :  { %4910 = vrcp.f32 %v507_v59 }
 0x4a2   :  { %v4911_v61 = vpop.eup %4910 }
 0x4a3   :  { %v514_v62 = vmul.f32 %v4911_v61, %v512_v60 }
 0x4a5   :  { %516 = vrot.lane.b32.xlu0 %v514_v62, %s5209_s27 }
 0x517   :  { %v517_v63 = vpop.permute.xlu0 %516 }
 0x518   :  { %v519_v2 = vadd.f32 %v517_v63, %v423_v54 }
 0x51a   :  { %4912 = vtanh.f32 %v519_v2 }
 0x524   :  { %v4913_v3 = vpop.eup %4912 }
 0x525   :  { %522 = vrot.lane.b32.xlu1 %v4913_v3, %s5223_s14 }
 0x597   :  { %v523_v13 = vpop.permute.xlu1 %522 }
 0x598   :  { %v525_v14 = vsub.f32 %v342_v46, %v523_v13 }
 0x59a   :  { %v526_v15 = vmul.f32 %v4911_v61, %v525_v14  ;;  %v1098_v14 = vld [vmem:[#allocation3 + $0x4] sm:$0x3] }
 0x59c   :  { %528 = vrot.lane.b32.xlu0 %v526_v15, %s5223_s14 }
 0x60e   :  { %v529_v17 = vpop.permute.xlu0 %528 }
 0x60f   :  { %v531_v19 = vadd.f32 %v4913_v3, %v529_v17 }
 0x611   :  { %533 = vrot.lane.b32.xlu1 %v531_v19, %s5223_s14 }
 0x683   :  { %v534_v20 = vpop.permute.xlu1 %533 }
 0x684   :  { %536 = vst.msk [vmem:[#allocation2 + $0x2] sm:$0x3] %vm140_vm1, %v534_v20  ;;  %4309 = vmatmul.mubr.msk.f32.vlgmr.msra.gmra.mrb[4].mxu0 %vm232_vm3, %v534_v20 }
 0x685   :  { %4700 = vmatpush3.bf16.msra.mxu0 %v5397_v5  ;;  %4326 = vmatprep.mubr.msk.f32.mxu0 %vm5220_vm0, %v5221_v1 }
 0x686   :  { %4701 = vmatprep.subr.bf16.mxu0 %v5219_v0 }
 0x689   :  { %4703 = vmatpush3.bf16.msra.mxu0 %v5402_v11 }
 0x68a   :  { %4710 = vmatprep.subr.bf16.mxu0 %v5219_v0 }
 0x68b   :  { %v5494_v22 = vld [vmem:[#allocation2 + $0x2] sm:$0x3] }
 0x68c   :  { %4327 = vmatmul.mubr.msk.f32.vlgmr.msra.gmra.mrb[6].mxu0 %vm232_vm3, %v623_v21 }
 0x68d   :  { %4712 = vmatpush3.bf16.msra.mxu0 %v5425_v33  ;;  %4348 = vmatprep.mubr.msk.f32.mxu0 %vm5220_vm0, %v5221_v1 }
 0x68e   :  { %4713 = vmatprep.subr.bf16.mxu0 %v5219_v0 }
 0x691   :  { %4715 = vmatpush3.bf16.msra.mxu0 %v5429_v40 }
 0x692   :  { %4722 = vmatprep.subr.bf16.mxu0 %v5219_v0 }
 0x694   :  { %4349 = vmatmul.mubr.msk.f32.vlgmr.msra.gmra.mrb[8].mxu0 %vm232_vm3, %v5494_v22 }
 0x695   :  { %4724 = vmatpush3.bf16.msra.mxu0 %v5399_v9  ;;  %4366 = vmatprep.mubr.msk.f32.mxu0 %vm5220_vm0, %v5221_v1 }
 0x696   :  { %4731 = vmatprep.subr.bf16.mxu0 %v5219_v0 }
 0x698   :  { %4367 = vmatmul.mubr.msk.f32.vlgmr.msra.gmra.mrb[10].mxu0 %vm154_vm2, %v1098_v14 }
 0x699   :  { %4733 = vmatpush3.bf16.msra.mxu0 %v5431_v41  ;;  %4388 = vmatprep.mubr.msk.f32.mxu0 %vm5220_vm0, %v5221_v1 }
 0x69a   :  { %4734 = vmatprep.subr.bf16.mxu0 %v5219_v0 }
 0x69d   :  { %4736 = vmatpush3.bf16.msra.mxu0 %v5435_v42 }
 0x69e   :  { %4743 = vmatprep.subr.bf16.mxu0 %v5219_v0 }
 0x757   :  { %v616_v26 = vpop.f32.mrb[4].mxu0 }
 0x758   :  { %v617_v27 = vadd.f32 %v5505_v25, %v616_v26  ;;  %v4310_v28 = vpop.f32.mrb[5].mxu0 }
 0x75a   :  { %620 = vst [vmem:[#allocation15] sm:$0x3] %v617_v27 }
 0x75f   :  { %v779_v29 = vpop.f32.mrb[6].mxu0 }
 0x760   :  { %791 = vrot.lane.b32.xlu0 %v779_v29, %s5222_s8  ;;  %v4328_v30 = vpop.f32.mrb[7].mxu0  ;;  %v783_v35 = vadd.f32 %v779_v29, %v703_v34 }
 0x762   :  { %v4009_v36 = vmul.f32 -1.442695, %v783_v35 }
 0x764   :  { %4914 = vpow2.f32 %v4009_v36 }
 0x767   :  { %v974_v31 = vpop.f32.mrb[8].mxu0 }
 0x768   :  { %v4350_v32 = vpop.f32.mrb[9].mxu0 }
 0x76e   :  { %v4915_v37 = vpop.eup %4914 }
 0x76f   :  { %v787_v38 = vadd.f32 1.0, %v4915_v37 }
 0x771   :  { %4916 = vrcp.f32 %v787_v38 }
 0x77b   :  { %v4917_v39 = vpop.eup %4916 }
 0x7d2   :  { %v792_v43 = vpop.permute.xlu0 %791 }
 0x7d3   :  { %v794_v44 = vmul.f32 %v4917_v39, %v792_v43 }
 0x7d5   :  { %796 = vrot.lane.b32.xlu1 %v794_v44, %s5209_s27 }
 0x847   :  { %v797_v45 = vpop.permute.xlu1 %796 }
 0x848   :  { %v799_v46 = vadd.f32 %v797_v45, %v703_v34 }
 0x84a   :  { %4918 = vtanh.f32 %v799_v46 }
 0x854   :  { %v4919_v47 = vpop.eup %4918 }
 0x855   :  { %802 = vrot.lane.b32.xlu0 %v4919_v47, %s5223_s14 }
 0x8c7   :  { %v803_v48 = vpop.permute.xlu0 %802 }
 0x8c8   :  { %v805_v49 = vsub.f32 %v623_v21, %v803_v48  ;;  %v1178_v21 = vpop.f32.mrb[10].mxu0 }
 0x8ca   :  { %v806_v50 = vmul.f32 %v4917_v39, %v805_v49 }
 0x8cc   :  { %808 = vrot.lane.b32.xlu1 %v806_v50, %s5223_s14 }
 0x8d0   :  { %986 = vrot.lane.b32.xlu1 %v974_v31, %s5222_s8 }
 0x93e   :  { %v809_v51 = vpop.permute.xlu1 %808 }
 0x93f   :  { %v811_v53 = vadd.f32 %v4919_v47, %v809_v51 }
 0x941   :  { %813 = vrot.lane.b32.xlu0 %v811_v53, %s5223_s14 }
 0x942   :  { %v987_v63 = vpop.permute.xlu1 %986 }
 0x9b3   :  { %v814_v54 = vpop.permute.xlu0 %813 }
 0x9b4   :  { %816 = vst.msk [vmem:[#allocation2] sm:$0x3] %vm140_vm1, %v814_v54  ;;  %4338 = vmatmul.mubr.msk.f32.vlgmr.msra.gmra.mrb[6].mxu1 %vm232_vm3, %v814_v54 }
 0x9b5   :  { %4718 = vmatpush3.bf16.msra.mxu1 %v5462_v8  ;;  %4359 = vmatprep.mubr.msk.f32.mxu1 %vm5220_vm0, %v5221_v1 }
 0x9b6   :  { %4719 = vmatprep.subr.bf16.mxu1 %v5219_v0 }
 0x9b9   :  { %4721 = vmatpush3.bf16.msra.mxu1 %v5465_v12 }
 0x9ba   :  { %4725 = vmatprep.subr.bf16.mxu1 %v5219_v0 }
 0x9bb   :  { %v1099_v19 = vld [vmem:[#allocation2] sm:$0x3] }
 0xa87   :  { %v897_v55 = vpop.f32.mrb[6].mxu1 }
 0xa88   :  { %v898_v56 = vadd.f32 %v5457_v52, %v897_v55  ;;  %v4339_v57 = vpop.f32.mrb[7].mxu1 }
 0xa8a   :  { %v978_v58 = vadd.f32 %v974_v31, %v898_v56  ;;  %v1179_v31 = vadd.f32 %v5420_v18, %v1178_v21 }
 0xa8c   :  { %v4013_v59 = vmul.f32 -1.442695, %v978_v58 }
 0xa8e   :  { %4920 = vpow2.f32 %v4013_v59 }
 0xa98   :  { %v4921_v60 = vpop.eup %4920 }
 0xa99   :  { %v982_v61 = vadd.f32 1.0, %v4921_v60 }
 0xa9b   :  { %4922 = vrcp.f32 %v982_v61 }
 0xaa5   :  { %v4923_v62 = vpop.eup %4922 }
 0xaa6   :  { %v989_v2 = vmul.f32 %v4923_v62, %v987_v63 }
 0xaa8   :  { %991 = vrot.lane.b32.xlu0 %v989_v2, %s5209_s27 }
 0xb1a   :  { %v992_v3 = vpop.permute.xlu0 %991 }
 0xb1b   :  { %v994_v4 = vadd.f32 %v992_v3, %v898_v56 }
 0xb1d   :  { %4924 = vtanh.f32 %v994_v4 }
 0xb27   :  { %v4925_v6 = vpop.eup %4924 }
 0xb28   :  { %997 = vrot.lane.b32.xlu1 %v4925_v6, %s5223_s14 }
 0xb9a   :  { %v998_v7 = vpop.permute.xlu1 %997 }
 0xb9b   :  { %v1000_v10 = vsub.f32 %v5494_v22, %v998_v7  ;;  %v4368_v22 = vpop.f32.mrb[11].mxu0 }
 0xb9d   :  { %v1001_v13 = vmul.f32 %v4923_v62, %v1000_v10  ;;  %v1574_v10 = vld [vmem:[#allocation3 + $0x6] sm:$0x3] }
 0xb9f   :  { %1003 = vrot.lane.b32.xlu0 %v1001_v13, %s5223_s14 }
 0xc11   :  { %v1004_v15 = vpop.permute.xlu0 %1003 }
 0xc12   :  { %v1006_v16 = vadd.f32 %v4925_v6, %v1004_v15 }
 0xc14   :  { %1008 = vrot.lane.b32.xlu1 %v1006_v16, %s5223_s14 }
 0xc86   :  { %v1009_v17 = vpop.permute.xlu1 %1008 }
 0xc87   :  { %1011 = vst.msk [vmem:[#allocation2 + $0x2] sm:$0x3] %vm140_vm1, %v1009_v17  ;;  %4360 = vmatmul.mubr.msk.f32.vlgmr.msra.gmra.mrb[8].mxu1 %vm232_vm3, %v1009_v17 }
 0xc88   :  { %4727 = vmatpush3.bf16.msra.mxu1 %v5397_v5  ;;  %4377 = vmatprep.mubr.msk.f32.mxu1 %vm5220_vm0, %v5221_v1 }
 0xc89   :  { %4728 = vmatprep.subr.bf16.mxu1 %v5219_v0 }
 0xc8c   :  { %4730 = vmatpush3.bf16.msra.mxu1 %v5402_v11 }
 0xc8d   :  { %4737 = vmatprep.subr.bf16.mxu1 %v5219_v0 }
 0xc8e   :  { %v5551_v20 = vld [vmem:[#allocation2 + $0x2] sm:$0x3] }
 0xc8f   :  { %4378 = vmatmul.mubr.msk.f32.vlgmr.msra.gmra.mrb[10].mxu1 %vm232_vm3, %v1099_v19 }
 0xc90   :  { %4739 = vmatpush3.bf16.msra.mxu1 %v5425_v33  ;;  %4399 = vmatprep.mubr.msk.f32.mxu1 %vm5220_vm0, %v5221_v1 }
 0xc91   :  { %4740 = vmatprep.subr.bf16.mxu1 %v5219_v0 }
 0xc94   :  { %4742 = vmatpush3.bf16.msra.mxu1 %v5429_v40 }
 0xc95   :  { %4749 = vmatprep.subr.bf16.mxu1 %v5219_v0 }
 0xc97   :  { %4400 = vmatmul.mubr.msk.f32.vlgmr.msra.gmra.mrb[12].mxu1 %vm232_vm3, %v5551_v20 }
 0xc98   :  { %4751 = vmatpush3.bf16.msra.mxu1 %v5399_v9  ;;  %4417 = vmatprep.mubr.msk.f32.mxu1 %vm5220_vm0, %v5221_v1 }
 0xc99   :  { %4758 = vmatprep.subr.bf16.mxu1 %v5219_v0 }
 0xc9b   :  { %4418 = vmatmul.mubr.msk.f32.vlgmr.msra.gmra.mrb[14].mxu1 %vm154_vm2, %v1574_v10 }
 0xc9c   :  { %4760 = vmatpush3.bf16.msra.mxu1 %v5431_v41  ;;  %4439 = vmatprep.mubr.msk.f32.mxu1 %vm5220_vm0, %v5221_v1 }
 0xc9d   :  { %4761 = vmatprep.subr.bf16.mxu1 %v5219_v0 }
 0xca0   :  { %4763 = vmatpush3.bf16.msra.mxu1 %v5435_v42 }
 0xca1   :  { %4770 = vmatprep.subr.bf16.mxu1 %v5219_v0 }
 0xd5a   :  { %v1091_v23 = vpop.f32.mrb[8].mxu1 }
 0xd5b   :  { %v1092_v24 = vadd.f32 %v5505_v25, %v1091_v23  ;;  %v4361_v26 = vpop.f32.mrb[9].mxu1 }
 0xd5d   :  { %1096 = vst [vmem:[#allocation15 + $0x2] sm:$0x3] %v1092_v24 }
 0xd62   :  { %v1255_v27 = vpop.f32.mrb[10].mxu1 }
 0xd63   :  { %1267 = vrot.lane.b32.xlu0 %v1255_v27, %s5222_s8  ;;  %v4379_v28 = vpop.f32.mrb[11].mxu1  ;;  %v1259_v32 = vadd.f32 %v1255_v27, %v1179_v31 }
 0xd65   :  { %v4019_v34 = vmul.f32 -1.442695, %v1259_v32 }
 0xd67   :  { %4926 = vpow2.f32 %v4019_v34 }
 0xd6a   :  { %v1450_v29 = vpop.f32.mrb[12].mxu1 }
 0xd6b   :  { %v4401_v30 = vpop.f32.mrb[13].mxu1 }
 0xd71   :  { %v4927_v35 = vpop.eup %4926 }
 0xd72   :  { %v1263_v36 = vadd.f32 1.0, %v4927_v35 }
 0xd74   :  { %4928 = vrcp.f32 %v1263_v36 }
 0xd7e   :  { %v4929_v37 = vpop.eup %4928 }
 0xdd5   :  { %v1268_v38 = vpop.permute.xlu0 %1267 }
 0xdd6   :  { %v1270_v39 = vmul.f32 %v4929_v37, %v1268_v38 }
 0xdd8   :  { %1272 = vrot.lane.b32.xlu1 %v1270_v39, %s5209_s27 }
 0xe4a   :  { %v1273_v43 = vpop.permute.xlu1 %1272 }
 0xe4b   :  { %v1275_v44 = vadd.f32 %v1273_v43, %v1179_v31 }
 0xe4d   :  { %4930 = vtanh.f32 %v1275_v44 }
 0xe57   :  { %v4931_v45 = vpop.eup %4930 }
 0xe58   :  { %1278 = vrot.lane.b32.xlu0 %v4931_v45, %s5223_s14 }
 0xeca   :  { %v1279_v46 = vpop.permute.xlu0 %1278 }
 0xecb   :  { %v1281_v47 = vsub.f32 %v1099_v19, %v1279_v46  ;;  %v1654_v19 = vpop.f32.mrb[14].mxu1 }
 0xecd   :  { %v1282_v48 = vmul.f32 %v4929_v37, %v1281_v47 }
 0xecf   :  { %1284 = vrot.lane.b32.xlu1 %v1282_v48, %s5223_s14 }
 0xed3   :  { %1462 = vrot.lane.b32.xlu1 %v1450_v29, %s5222_s8 }
 0xf41   :  { %v1285_v49 = vpop.permute.xlu1 %1284 }
 0xf42   :  { %v1287_v50 = vadd.f32 %v4931_v45, %v1285_v49 }
 0xf44   :  { %1289 = vrot.lane.b32.xlu0 %v1287_v50, %s5223_s14 }
 0xf45   :  { %v1463_v61 = vpop.permute.xlu1 %1462 }
 0xfb6   :  { %v1290_v51 = vpop.permute.xlu0 %1289 }
 0xfb7   :  { %1292 = vst.msk [vmem:[#allocation2] sm:$0x3] %vm140_vm1, %v1290_v51  ;;  %4389 = vmatmul.mubr.msk.f32.vlgmr.msra.gmra.mrb[12].mxu0 %vm232_vm3, %v1290_v51 }
 0xfb8   :  { %4745 = vmatpush3.bf16.msra.mxu0 %v5462_v8  ;;  %4410 = vmatprep.mubr.msk.f32.mxu0 %vm5220_vm0, %v5221_v1 }
 0xfb9   :  { %4746 = vmatprep.subr.bf16.mxu0 %v5219_v0 }
 0xfbc   :  { %4748 = vmatpush3.bf16.msra.mxu0 %v5465_v12 }
 0xfbd   :  { %4752 = vmatprep.subr.bf16.mxu0 %v5219_v0 }
 0xfbe   :  { %v1575_v16 = vld [vmem:[#allocation2] sm:$0x3] }
0x108a   :  { %v1373_v53 = vpop.f32.mrb[12].mxu0 }
0x108b   :  { %v1374_v54 = vadd.f32 %v5457_v52, %v1373_v53  ;;  %v4390_v55 = vpop.f32.mrb[13].mxu0 }
0x108d   :  { %v1454_v56 = vadd.f32 %v1450_v29, %v1374_v54 }
0x108f   :  { %v4023_v57 = vmul.f32 -1.442695, %v1454_v56 }
0x1091   :  { %4932 = vpow2.f32 %v4023_v57 }
0x109b   :  { %v4933_v58 = vpop.eup %4932 }
0x109c   :  { %v1458_v59 = vadd.f32 1.0, %v4933_v58 }
0x109e   :  { %4934 = vrcp.f32 %v1458_v59 }
0x10a8   :  { %v4935_v60 = vpop.eup %4934 }
0x10a9   :  { %v1465_v62 = vmul.f32 %v4935_v60, %v1463_v61 }
0x10ab   :  { %1467 = vrot.lane.b32.xlu0 %v1465_v62, %s5209_s27 }
0x111d   :  { %v1468_v63 = vpop.permute.xlu0 %1467 }
0x111e   :  { %v1470_v2 = vadd.f32 %v1468_v63, %v1374_v54 }
0x1120   :  { %4936 = vtanh.f32 %v1470_v2 }
0x112a   :  { %v4937_v3 = vpop.eup %4936 }
0x112b   :  { %1473 = vrot.lane.b32.xlu1 %v4937_v3, %s5223_s14 }
0x119d   :  { %v1474_v4 = vpop.permute.xlu1 %1473 }
0x119e   :  { %v1476_v6 = vsub.f32 %v5551_v20, %v1474_v4  ;;  %v4419_v20 = vpop.f32.mrb[15].mxu1  ;;  %v2050_v4 = vld [vmem:[#allocation3 + $0x8] sm:$0x3] }
0x11a0   :  { %v1477_v7 = vmul.f32 %v4935_v60, %v1476_v6 }
0x11a2   :  { %1479 = vrot.lane.b32.xlu0 %v1477_v7, %s5223_s14 }
0x1214   :  { %v1480_v13 = vpop.permute.xlu0 %1479 }
0x1215   :  { %v1482_v14 = vadd.f32 %v4937_v3, %v1480_v13 }
0x1217   :  { %1484 = vrot.lane.b32.xlu1 %v1482_v14, %s5223_s14 }
0x1289   :  { %v1485_v15 = vpop.permute.xlu1 %1484 }
0x128a   :  { %1487 = vst.msk [vmem:[#allocation2 + $0x2] sm:$0x3] %vm140_vm1, %v1485_v15  ;;  %4411 = vmatmul.mubr.msk.f32.vlgmr.msra.gmra.mrb[14].mxu0 %vm232_vm3, %v1485_v15 }
0x128b   :  { %4754 = vmatpush3.bf16.msra.mxu0 %v5397_v5  ;;  %4428 = vmatprep.mubr.msk.f32.mxu0 %vm5220_vm0, %v5221_v1 }
0x128c   :  { %4755 = vmatprep.subr.bf16.mxu0 %v5219_v0 }
0x128f   :  { %4757 = vmatpush3.bf16.msra.mxu0 %v5402_v11 }
0x1290   :  { %4764 = vmatprep.subr.bf16.mxu0 %v5219_v0 }
0x1291   :  { %v5603_v17 = vld [vmem:[#allocation2 + $0x2] sm:$0x3] }
0x1292   :  { %4429 = vmatmul.mubr.msk.f32.vlgmr.msra.gmra.mrb[16].mxu0 %vm232_vm3, %v1575_v16 }
0x1293   :  { %4766 = vmatpush3.bf16.msra.mxu0 %v5425_v33  ;;  %4450 = vmatprep.mubr.msk.f32.mxu0 %vm5220_vm0, %v5221_v1 }
0x1294   :  { %4767 = vmatprep.subr.bf16.mxu0 %v5219_v0 }
0x1297   :  { %4769 = vmatpush3.bf16.msra.mxu0 %v5429_v40 }
0x1298   :  { %4776 = vmatprep.subr.bf16.mxu0 %v5219_v0 }
0x129a   :  { %4451 = vmatmul.mubr.msk.f32.vlgmr.msra.gmra.mrb[18].mxu0 %vm232_vm3, %v5603_v17 }
0x129b   :  { %4778 = vmatpush3.bf16.msra.mxu0 %v5399_v9  ;;  %4468 = vmatprep.mubr.msk.f32.mxu0 %vm5220_vm0, %v5221_v1  ;;  %v1655_v9 = vadd.f32 %v5420_v18, %v1654_v19 }
0x129c   :  { %4785 = vmatprep.subr.bf16.mxu0 %v5219_v0 }
0x129e   :  { %4469 = vmatmul.mubr.msk.f32.vlgmr.msra.gmra.mrb[20].mxu0 %vm154_vm2, %v2050_v4  ;;  %v2805_v4 = vld [vmem:[#allocation12] sm:$0xff] }
0x129f   :  { %4787 = vmatpush3.bf16.msra.mxu0 %v5431_v41  ;;  %4490 = vmatprep.mubr.msk.f32.mxu0 %vm5220_vm0, %v5221_v1 }
0x12a0   :  { %4788 = vmatprep.subr.bf16.mxu0 %v5219_v0 }
0x12a3   :  { %4790 = vmatpush3.bf16.msra.mxu0 %v5435_v42 }
0x12a4   :  { %4797 = vmatprep.subr.bf16.mxu0 %v5219_v0 }
0x135d   :  { %v1567_v21 = vpop.f32.mrb[14].mxu0 }
0x135e   :  { %v1568_v22 = vadd.f32 %v5505_v25, %v1567_v21  ;;  %v4412_v23 = vpop.f32.mrb[15].mxu0 }
0x1360   :  { %1572 = vst [vmem:[#allocation15 + $0x4] sm:$0x3] %v1568_v22 }
0x1365   :  { %v1731_v24 = vpop.f32.mrb[16].mxu0 }
0x1366   :  { %1743 = vrot.lane.b32.xlu0 %v1731_v24, %s5222_s8  ;;  %v4430_v26 = vpop.f32.mrb[17].mxu0  ;;  %v1735_v29 = vadd.f32 %v1731_v24, %v1655_v9 }
0x1368   :  { %v4029_v30 = vmul.f32 -1.442695, %v1735_v29 }
0x136a   :  { %4938 = vpow2.f32 %v4029_v30 }
0x136d   :  { %v1926_v27 = vpop.f32.mrb[18].mxu0 }
0x136e   :  { %v4452_v28 = vpop.f32.mrb[19].mxu0 }
0x1374   :  { %v4939_v31 = vpop.eup %4938 }
0x1375   :  { %v1739_v32 = vadd.f32 1.0, %v4939_v31 }
0x1377   :  { %4940 = vrcp.f32 %v1739_v32 }
0x1381   :  { %v4941_v34 = vpop.eup %4940 }
0x13d8   :  { %v1744_v35 = vpop.permute.xlu0 %1743 }
0x13d9   :  { %v1746_v36 = vmul.f32 %v4941_v34, %v1744_v35 }
0x13db   :  { %1748 = vrot.lane.b32.xlu1 %v1746_v36, %s5209_s27 }
0x144d   :  { %v1749_v37 = vpop.permute.xlu1 %1748 }
0x144e   :  { %v1751_v38 = vadd.f32 %v1749_v37, %v1655_v9 }
0x1450   :  { %4942 = vtanh.f32 %v1751_v38 }
0x145a   :  { %v4943_v39 = vpop.eup %4942 }
0x145b   :  { %1754 = vrot.lane.b32.xlu0 %v4943_v39, %s5223_s14 }
0x14cd   :  { %v1755_v43 = vpop.permute.xlu0 %1754 }
0x14ce   :  { %v1757_v44 = vsub.f32 %v1575_v16, %v1755_v43 }
0x14d0   :  { %v1758_v45 = vmul.f32 %v4941_v34, %v1757_v44 }
0x14d2   :  { %1760 = vrot.lane.b32.xlu1 %v1758_v45, %s5223_s14 }
0x14d6   :  { %1938 = vrot.lane.b32.xlu1 %v1926_v27, %s5222_s8 }
0x1544   :  { %v1761_v46 = vpop.permute.xlu1 %1760 }
0x1545   :  { %v1763_v47 = vadd.f32 %v4943_v39, %v1761_v46 }
0x1547   :  { %1765 = vrot.lane.b32.xlu0 %v1763_v47, %s5223_s14 }
0x1548   :  { %v1939_v58 = vpop.permute.xlu1 %1938 }
0x15b9   :  { %v1766_v48 = vpop.permute.xlu0 %1765 }
0x15ba   :  { %1768 = vst.msk [vmem:[#allocation2] sm:$0x3] %vm140_vm1, %v1766_v48  ;;  %4440 = vmatmul.mubr.msk.f32.vlgmr.msra.gmra.mrb[16].mxu1 %vm232_vm3, %v1766_v48 }
0x15bb   :  { %4772 = vmatpush3.bf16.msra.mxu1 %v5462_v8  ;;  %4461 = vmatprep.mubr.msk.f32.mxu1 %vm5220_vm0, %v5221_v1 }
0x15bc   :  { %4773 = vmatprep.subr.bf16.mxu1 %v5219_v0 }
0x15bf   :  { %4775 = vmatpush3.bf16.msra.mxu1 %v5465_v12 }
0x15c0   :  { %4779 = vmatprep.subr.bf16.mxu1 %v5219_v0 }
0x15c1   :  { %v2051_v41 = vld [vmem:[#allocation2] sm:$0x3] }
0x168d   :  { %v1849_v49 = vpop.f32.mrb[16].mxu1 }
0x168e   :  { %v1850_v50 = vadd.f32 %v5457_v52, %v1849_v49  ;;  %v4441_v51 = vpop.f32.mrb[17].mxu1 }
0x1690   :  { %v1930_v53 = vadd.f32 %v1926_v27, %v1850_v50 }
0x1692   :  { %v4033_v54 = vmul.f32 -1.442695, %v1930_v53  ;;  %v2528_v53 = vld [vmem:[#allocation8] sm:$0xff] }
0x1694   :  { %4944 = vpow2.f32 %v4033_v54  ;;  %v2529_v54 = vld [vmem:[#allocation8 + $0x8] sm:$0xff] }
0x169e   :  { %v4945_v55 = vpop.eup %4944 }
0x169f   :  { %v1934_v56 = vadd.f32 1.0, %v4945_v55  ;;  %v5682_v55 = vpack.c.bf16 %v2529_v54, %v2528_v53 }
0x16a1   :  { %4946 = vrcp.f32 %v1934_v56  ;;  %v2526_v56 = vld [vmem:[#allocation3 + $0xa] sm:$0x3] }
0x16ab   :  { %v4947_v57 = vpop.eup %4946 }
0x16ac   :  { %v1941_v59 = vmul.f32 %v4947_v57, %v1939_v58 }
0x16ae   :  { %1943 = vrot.lane.b32.xlu0 %v1941_v59, %s5209_s27  ;;  %v2610_v59 = vld [vmem:[#allocation9] sm:$0xff] }
0x1720   :  { %v1944_v60 = vpop.permute.xlu0 %1943 }
0x1721   :  { %v1946_v61 = vadd.f32 %v1944_v60, %v1850_v50  ;;  %v2611_v60 = vld [vmem:[#allocation9 + $0x8] sm:$0xff] }
0x1723   :  { %4948 = vtanh.f32 %v1946_v61  ;;  %v5690_v61 = vpack.c.bf16 %v2611_v60, %v2610_v59  ;;  %v2916_v60 = vld [vmem:[#allocation14] sm:$0xff] }
0x172d   :  { %v4949_v62 = vpop.eup %4948 }
0x172e   :  { %1949 = vrot.lane.b32.xlu1 %v4949_v62, %s5223_s14 }
0x17a0   :  { %v1950_v63 = vpop.permute.xlu1 %1949 }
0x17a1   :  { %v1952_v2 = vsub.f32 %v5603_v17, %v1950_v63  ;;  %v2613_v63 = vld [vmem:[#allocation9 + $0x18] sm:$0xff] }
0x17a3   :  { %v1953_v3 = vmul.f32 %v4947_v57, %v1952_v2 }
0x17a5   :  { %1955 = vrot.lane.b32.xlu0 %v1953_v3, %s5223_s14 }
0x1817   :  { %v1956_v6 = vpop.permute.xlu0 %1955 }
0x1818   :  { %v1958_v7 = vadd.f32 %v4949_v62, %v1956_v6  ;;  %v2612_v62 = vld [vmem:[#allocation9 + $0x10] sm:$0xff]  ;;  %v2806_v6 = vld [vmem:[#allocation12 + $0x8] sm:$0xff] }
0x1819   :  { %v5695_v3 = vpack.c.bf16 %v2613_v63, %v2612_v62  ;;  %v2917_v62 = vld [vmem:[#allocation14 + $0x8] sm:$0xff]  ;;  %v2918_v63 = vld [vmem:[#allocation14 + $0x10] sm:$0xff] }
0x181a   :  { %1960 = vrot.lane.b32.xlu1 %v1958_v7, %s5223_s14  ;;  %v5701_v7 = vpack.c.bf16 %v2806_v6, %v2805_v4  ;;  %v2919_v4 = vld [vmem:[#allocation14 + $0x18] sm:$0xff] }
0x181b   :  { %v5757_v6 = vpack.c.bf16 %v2919_v4, %v2918_v63 }
0x188c   :  { %v1961_v10 = vpop.permute.xlu1 %1960 }
0x188d   :  { %1963 = vst.msk [vmem:[#allocation2 + $0x2] sm:$0x3] %vm140_vm1, %v1961_v10  ;;  %4462 = vmatmul.mubr.msk.f32.vlgmr.msra.gmra.mrb[18].mxu1 %vm232_vm3, %v1961_v10  ;;  %v2807_v10 = vld [vmem:[#allocation12 + $0x10] sm:$0xff] }
0x188e   :  { %4781 = vmatpush3.bf16.msra.mxu1 %v5397_v5  ;;  %4479 = vmatprep.mubr.msk.f32.mxu1 %vm5220_vm0, %v5221_v1 }
0x188f   :  { %4782 = vmatprep.subr.bf16.mxu1 %v5219_v0 }
0x1892   :  { %4784 = vmatpush3.bf16.msra.mxu1 %v5402_v11  ;;  %v2130_v11 = vpop.f32.mrb[20].mxu0 }
0x1893   :  { %4791 = vmatprep.subr.bf16.mxu1 %v5219_v0  ;;  %v4470_v42 = vpop.f32.mrb[21].mxu0  ;;  %v2131_v19 = vadd.f32 %v5420_v18, %v2130_v11 }
0x1894   :  { %v5655_v5 = vld [vmem:[#allocation2 + $0x2] sm:$0x3] }
0x1895   :  { %4480 = vmatmul.mubr.msk.f32.vlgmr.msra.gmra.mrb[20].mxu1 %vm232_vm3, %v2051_v41 }
0x1896   :  { %4793 = vmatpush3.bf16.msra.mxu1 %v5425_v33  ;;  %4501 = vmatprep.mubr.msk.f32.mxu1 %vm5220_vm0, %v5221_v1 }
0x1897   :  { %4794 = vmatprep.subr.bf16.mxu1 %v5219_v0 }
0x189a   :  { %4796 = vmatpush3.bf16.msra.mxu1 %v5429_v40 }
0x189b   :  { %4803 = vmatprep.subr.bf16.mxu1 %v5219_v0 }
0x189d   :  { %4502 = vmatmul.mubr.msk.f32.vlgmr.msra.gmra.mrb[22].mxu1 %vm232_vm3, %v5655_v5 }
0x189e   :  { %4519 = vmatprep.mubr.msk.f32.mxu1 %vm5220_vm0, %v5221_v1  ;;  %4805 = vmatpush3.bf16.msra.mxu1 %v5682_v55 }
0x189f   :  { %4812 = vmatprep.subr.bf16.mxu1 %v5219_v0 }
0x18a1   :  { %4520 = vmatmul.mubr.msk.f32.vlgmr.msra.gmra.mrb[24].mxu1 %vm154_vm2, %v2526_v56 }
0x18a2   :  { %4541 = vmatprep.mubr.msk.f32.mxu1 %vm5220_vm0, %v5221_v1 }
0x1960   :  { %v2043_v33 = vpop.f32.mrb[18].mxu1 }
0x1961   :  { %v2044_v13 = vadd.f32 %v5505_v25, %v2043_v33  ;;  %v4463_v14 = vpop.f32.mrb[19].mxu1 }
0x1963   :  { %2048 = vst [vmem:[#allocation15 + $0x6] sm:$0x3] %v2044_v13 }
0x1968   :  { %v2207_v15 = vpop.f32.mrb[20].mxu1 }
0x1969   :  { %2219 = vrot.lane.b32.xlu0 %v2207_v15, %s5222_s8  ;;  %v4481_v40 = vpop.f32.mrb[21].mxu1  ;;  %v2211_v20 = vadd.f32 %v2207_v15, %v2131_v19 }
0x196b   :  { %v4039_v21 = vmul.f32 -1.442695, %v2211_v20 }
0x196d   :  { %4950 = vpow2.f32 %v4039_v21  ;;  %v5726_v21 = vld [vmem:[%s5906_s3] ss:$0 sm:$0xff] }
0x1970   :  { %v2402_v16 = vpop.f32.mrb[22].mxu1 }
0x1971   :  { %v4503_v17 = vpop.f32.mrb[23].mxu1 }
0x1974   :  { %v2606_v33 = vpop.f32.mrb[24].mxu1 }
0x1975   :  { %v4521_v13 = vpop.f32.mrb[25].mxu1 }
0x1977   :  { %v4951_v22 = vpop.eup %4950 }
0x1978   :  { %v2215_v23 = vadd.f32 1.0, %v4951_v22  ;;  %v2607_v22 = vadd.f32 %v5726_v21, %v2606_v33  ;;  %v3002_v33 = vld [vmem:[#allocation3 + $0xc] sm:$0x3] }
0x197a   :  { %4952 = vrcp.f32 %v2215_v23 }
0x1984   :  { %v4953_v24 = vpop.eup %4952 }
0x19db   :  { %v2220_v26 = vpop.permute.xlu0 %2219 }
0x19dc   :  { %v2222_v27 = vmul.f32 %v4953_v24, %v2220_v26 }
0x19de   :  { %2224 = vrot.lane.b32.xlu1 %v2222_v27, %s5209_s27 }
0x1a50   :  { %v2225_v28 = vpop.permute.xlu1 %2224 }
0x1a51   :  { %v2227_v9 = vadd.f32 %v2225_v28, %v2131_v19 }
0x1a53   :  { %4954 = vtanh.f32 %v2227_v9 }
0x1a5d   :  { %v4955_v29 = vpop.eup %4954 }
0x1a5e   :  { %2230 = vrot.lane.b32.xlu0 %v4955_v29, %s5223_s14 }
0x1ad0   :  { %v2231_v30 = vpop.permute.xlu0 %2230 }
0x1ad1   :  { %v2233_v31 = vsub.f32 %v2051_v41, %v2231_v30  ;;  %v2808_v41 = vld [vmem:[#allocation12 + $0x18] sm:$0xff] }
0x1ad2   :  { %v5706_v11 = vpack.c.bf16 %v2808_v41, %v2807_v10 }
0x1ad3   :  { %v2234_v18 = vmul.f32 %v4953_v24, %v2233_v31 }
0x1ad5   :  { %2236 = vrot.lane.b32.xlu1 %v2234_v18, %s5223_s14  ;;  %v2722_v18 = vld [vmem:[#allocation11] sm:$0xff] }
0x1ad9   :  { %2414 = vrot.lane.b32.xlu1 %v2402_v16, %s5222_s8 }
0x1b47   :  { %v2237_v32 = vpop.permute.xlu1 %2236 }
0x1b48   :  { %v2239_v34 = vadd.f32 %v4955_v29, %v2237_v32  ;;  %v2723_v32 = vld [vmem:[#allocation11 + $0x8] sm:$0xff] }
0x1b4a   :  { %2241 = vrot.lane.b32.xlu0 %v2239_v34, %s5223_s14  ;;  %v2724_v34 = vld [vmem:[#allocation11 + $0x10] sm:$0xff] }
0x1b4b   :  { %v2415_v46 = vpop.permute.xlu1 %2414 }
0x1bbc   :  { %v2242_v35 = vpop.permute.xlu0 %2241 }
0x1bbd   :  { %2244 = vst.msk [vmem:[#allocation2] sm:$0x3] %vm140_vm1, %v2242_v35  ;;  %4491 = vmatmul.mubr.msk.f32.vlgmr.msra.gmra.mrb[22].mxu0 %vm232_vm3, %v2242_v35  ;;  %v5731_v35 = vpack.c.bf16 %v2723_v32, %v2722_v18 }
0x1bbe   :  { %4799 = vmatpush3.bf16.msra.mxu0 %v5462_v8  ;;  %4512 = vmatprep.mubr.msk.f32.mxu0 %vm5220_vm0, %v5221_v1 }
0x1bbf   :  { %4800 = vmatprep.subr.bf16.mxu0 %v5219_v0  ;;  %4814 = vmatpush3.bf16.msra.mxu1 %v5731_v35 }
0x1bc0   :  { %4815 = vmatprep.subr.bf16.mxu1 %v5219_v0 }
0x1bc2   :  { %4802 = vmatpush3.bf16.msra.mxu0 %v5465_v12 }
0x1bc3   :  { %4806 = vmatprep.subr.bf16.mxu0 %v5219_v0 }
0x1c90   :  { %v2325_v36 = vpop.f32.mrb[22].mxu0 }
0x1c91   :  { %v2326_v37 = vadd.f32 %v5457_v52, %v2325_v36  ;;  %v4492_v38 = vpop.f32.mrb[23].mxu0  ;;  %v2725_v36 = vld [vmem:[#allocation11 + $0x18] sm:$0xff] }
0x1c93   :  { %v2406_v39 = vadd.f32 %v2402_v16, %v2326_v37 }
0x1c95   :  { %v4043_v43 = vmul.f32 -1.442695, %v2406_v39 }
0x1c97   :  { %4956 = vpow2.f32 %v4043_v43 }
0x1ca1   :  { %v4957_v44 = vpop.eup %4956 }
0x1ca2   :  { %v2410_v45 = vadd.f32 1.0, %v4957_v44 }
0x1ca4   :  { %4958 = vrcp.f32 %v2410_v45 }
0x1cae   :  { %v4959_v8 = vpop.eup %4958 }
0x1caf   :  { %v2417_v47 = vmul.f32 %v4959_v8, %v2415_v46  ;;  %v5749_v46 = vld [vmem:[%s5909_s6] ss:$0 sm:$0xff] }
0x1cb1   :  { %2419 = vrot.lane.b32.xlu0 %v2417_v47, %s5209_s27 }
0x1d23   :  { %v2420_v48 = vpop.permute.xlu0 %2419 }
0x1d24   :  { %v2422_v49 = vadd.f32 %v2420_v48, %v2326_v37  ;;  %v5734_v37 = vpack.c.bf16 %v2725_v36, %v2724_v34 }
0x1d26   :  { %4960 = vtanh.f32 %v2422_v49  ;;  %4817 = vmatpush3.bf16.msra.mxu1 %v5734_v37 }
0x1d27   :  { %4824 = vmatprep.subr.bf16.mxu1 %v5219_v0 }
0x1d30   :  { %v4961_v12 = vpop.eup %4960 }
0x1d31   :  { %2425 = vrot.lane.b32.xlu1 %v4961_v12, %s5223_s14 }
0x1da3   :  { %v2426_v50 = vpop.permute.xlu1 %2425 }
0x1da4   :  { %v2428_v52 = vsub.f32 %v5655_v5, %v2426_v50  ;;  %v2527_v5 = vld [vmem:[#allocation2] sm:$0x3] }
0x1da6   :  { %v2429_v51 = vmul.f32 %v4959_v8, %v2428_v52 }
0x1da8   :  { %2431 = vrot.lane.b32.xlu0 %v2429_v51, %s5223_s14 }
0x1e1a   :  { %v2432_v57 = vpop.permute.xlu0 %2431 }
0x1e1b   :  { %v2434_v58 = vadd.f32 %v4961_v12, %v2432_v57 }
0x1e1d   :  { %2436 = vrot.lane.b32.xlu1 %v2434_v58, %s5223_s14 }
0x1e8f   :  { %v2437_v2 = vpop.permute.xlu1 %2436 }
0x1e90   :  { %2439 = vst.msk [vmem:[#allocation2 + $0x2] sm:$0x3] %vm140_vm1, %v2437_v2  ;;  %4513 = vmatmul.mubr.msk.f32.vlgmr.msra.gmra.mrb[24].mxu0 %vm232_vm3, %v2437_v2  ;;  %v5754_v2 = vpack.c.bf16 %v2917_v62, %v2916_v60 }
0x1e91   :  { %4808 = vmatpush3.bf16.msra.mxu0 %v5690_v61  ;;  %4530 = vmatprep.mubr.msk.f32.mxu0 %vm5220_vm0, %v5221_v1 }
0x1e92   :  { %4809 = vmatprep.subr.bf16.mxu0 %v5219_v0 }
0x1e95   :  { %4811 = vmatpush3.bf16.msra.mxu0 %v5695_v3 }
0x1e96   :  { %4818 = vmatprep.subr.bf16.mxu0 %v5219_v0 }
0x1e97   :  { %v5713_v42 = vld [vmem:[#allocation2 + $0x2] sm:$0x3] }
0x1e98   :  { %4531 = vmatmul.mubr.msk.f32.vlgmr.msra.gmra.mrb[26].mxu0 %vm232_vm3, %v2527_v5 }
0x1e99   :  { %4820 = vmatpush3.bf16.msra.mxu0 %v5701_v7  ;;  %4552 = vmatprep.mubr.msk.f32.mxu0 %vm5220_vm0, %v5221_v1 }
0x1e9a   :  { %4821 = vmatprep.subr.bf16.mxu0 %v5219_v0 }
0x1e9d   :  { %4823 = vmatpush3.bf16.msra.mxu0 %v5706_v11 }
0x1e9e   :  { %4830 = vmatprep.subr.bf16.mxu0 %v5219_v0 }
0x1ea0   :  { %4553 = vmatmul.mubr.msk.f32.vlgmr.msra.gmra.mrb[28].mxu0 %vm232_vm3, %v5713_v42 }
0x1ea1   :  { %4832 = vmatpush3.bf16.msra.mxu0 %v5682_v55  ;;  %4570 = vmatprep.mubr.msk.f32.mxu0 %vm5220_vm0, %v5221_v1 }
0x1ea2   :  { %4839 = vmatprep.subr.bf16.mxu0 %v5219_v0 }
0x1ea4   :  { %4571 = vmatmul.mubr.msk.f32.vlgmr.msra.gmra.mrb[30].mxu0 %vm154_vm2, %v3002_v33 }
0x1ea5   :  { %4841 = vmatpush3.bf16.msra.mxu0 %v5731_v35  ;;  %4592 = vmatprep.mubr.msk.f32.mxu0 %vm5220_vm0, %v5221_v1 }
0x1ea6   :  { %4842 = vmatprep.subr.bf16.mxu0 %v5219_v0 }
0x1ea9   :  { %4844 = vmatpush3.bf16.msra.mxu0 %v5734_v37 }
0x1eaa   :  { %4851 = vmatprep.subr.bf16.mxu0 %v5219_v0 }
0x1f63   :  { %v2519_v14 = vpop.f32.mrb[24].mxu0 }
0x1f64   :  { %v2520_v15 = vadd.f32 %v5505_v25, %v2519_v14  ;;  %v4514_v40 = vpop.f32.mrb[25].mxu0 }
0x1f66   :  { %2524 = vst [vmem:[#allocation15 + $0x8] sm:$0x3] %v2520_v15 }
0x1f6b   :  { %v2683_v16 = vpop.f32.mrb[26].mxu0 }
0x1f6c   :  { %2695 = vrot.lane.b32.xlu0 %v2683_v16, %s5222_s8  ;;  %v4532_v17 = vpop.f32.mrb[27].mxu0  ;;  %v2687_v23 = vadd.f32 %v2683_v16, %v2607_v22 }
0x1f6e   :  { %v4049_v24 = vmul.f32 -1.442695, %v2687_v23 }
0x1f70   :  { %4962 = vpow2.f32 %v4049_v24 }
0x1f73   :  { %v2878_v19 = vpop.f32.mrb[28].mxu0 }
0x1f74   :  { %v4554_v20 = vpop.f32.mrb[29].mxu0 }
0x1f77   :  { %v3082_v16 = vpop.f32.mrb[30].mxu0 }
0x1f78   :  { %v4572_v17 = vpop.f32.mrb[31].mxu0 }
0x1f7a   :  { %v4963_v26 = vpop.eup %4962 }
0x1f7b   :  { %v2691_v25 = vadd.f32 1.0, %v4963_v26 }
0x1f7d   :  { %4964 = vrcp.f32 %v2691_v25 }
0x1f87   :  { %v4965_v27 = vpop.eup %4964 }
0x1fde   :  { %v2696_v28 = vpop.permute.xlu0 %2695 }
0x1fdf   :  { %v2698_v9 = vmul.f32 %v4965_v27, %v2696_v28 }
0x1fe1   :  { %2700 = vrot.lane.b32.xlu1 %v2698_v9, %s5209_s27 }
0x2053   :  { %v2701_v29 = vpop.permute.xlu1 %2700 }
0x2054   :  { %v2703_v30 = vadd.f32 %v2701_v29, %v2607_v22 }
0x2056   :  { %4966 = vtanh.f32 %v2703_v30 }
0x2060   :  { %v4967_v31 = vpop.eup %4966 }
0x2061   :  { %2706 = vrot.lane.b32.xlu0 %v4967_v31, %s5223_s14 }
0x20d3   :  { %v2707_v38 = vpop.permute.xlu0 %2706 }
0x20d4   :  { %v2709_v39 = vsub.f32 %v2527_v5, %v2707_v38 }
0x20d6   :  { %v2710_v43 = vmul.f32 %v4965_v27, %v2709_v39  ;;  %v3083_v27 = vadd.f32 %v5726_v21, %v3082_v16 }
0x20d8   :  { %2712 = vrot.lane.b32.xlu1 %v2710_v43, %s5223_s14 }
0x20dc   :  { %2890 = vrot.lane.b32.xlu1 %v2878_v19, %s5222_s8 }
0x214a   :  { %v2713_v44 = vpop.permute.xlu1 %2712 }
0x214b   :  { %v2715_v45 = vadd.f32 %v4967_v31, %v2713_v44 }
0x214d   :  { %2717 = vrot.lane.b32.xlu0 %v2715_v45, %s5223_s14 }
0x214e   :  { %v2891_v54 = vpop.permute.xlu1 %2890 }
0x21bf   :  { %v2718_v8 = vpop.permute.xlu0 %2717 }
0x21c0   :  { %2720 = vst.msk [vmem:[#allocation2] sm:$0x3] %vm140_vm1, %v2718_v8  ;;  %4542 = vmatmul.mubr.msk.f32.vlgmr.msra.gmra.mrb[26].mxu1 %vm232_vm3, %v2718_v8 }
0x21c1   :  { %4563 = vmatprep.mubr.msk.f32.mxu1 %vm5220_vm0, %v5221_v1  ;;  %4826 = vmatpush3.bf16.msra.mxu1 %v5754_v2 }
0x21c2   :  { %4827 = vmatprep.subr.bf16.mxu1 %v5219_v0 }
0x21c5   :  { %4829 = vmatpush3.bf16.msra.mxu1 %v5757_v6 }
0x21c6   :  { %4833 = vmatprep.subr.bf16.mxu1 %v5219_v0 }
0x21c7   :  { %v3003_v15 = vld [vmem:[#allocation2] sm:$0x3] }
0x2293   :  { %v2801_v47 = vpop.f32.mrb[26].mxu1 }
0x2294   :  { %v2802_v48 = vadd.f32 %v5749_v46, %v2801_v47  ;;  %v4543_v49 = vpop.f32.mrb[27].mxu1 }
0x2296   :  { %v2882_v12 = vadd.f32 %v2878_v19, %v2802_v48  ;;  %v5798_v19 = vld [vmem:[%s5912_s9] ss:$0 sm:$0xff]  ;;  %s5224_s9 = smov [#allocation16]  }
0x2297   :  { %s3977_s1 = sshll.u32 %s5224_s9, 4  ;;  %s3978_s1 = int_to_ptr.vmem [resolvable:$true] %s3977_s1 }
0x2298   :  { %v4053_v50 = vmul.f32 -1.442695, %v2882_v12  ;;  %s5152_s13 = scalar_lea.vmem %s3978_s1, 64  ;;  %p5157_p1 = scmp.lt.s32.totalorder %s3978_s1, %s3978_s1 }
0x2299   :  { %p5153_p0 = scmp.ne.s32.totalorder %s3978_s1, %s5152_s13  ;;  %p5158_p2 = scmp.lt.s32.totalorder %s5152_s13, %s5152_s13 }
0x229a   :  { %4968 = vpow2.f32 %v4053_v50 }
0x229b   :  { %p5159_p3 = por %p5158_p2, %p5157_p1 }
0x229d   :  { %p5160_p4 = pnand %p5159_p3, %p5153_p0 }
0x22a4   :  { %v4969_v52 = vpop.eup %4968 }
0x22a5   :  { %v2886_v51 = vadd.f32 1.0, %v4969_v52 }
0x22a7   :  { %4970 = vrcp.f32 %v2886_v51 }
0x22b1   :  { %v4971_v53 = vpop.eup %4970 }
0x22b2   :  { %v2893_v56 = vmul.f32 %v4971_v53, %v2891_v54 }
0x22b4   :  { %2895 = vrot.lane.b32.xlu0 %v2893_v56, %s5209_s27 }
0x2326   :  { %v2896_v57 = vpop.permute.xlu0 %2895 }
0x2327   :  { %v2898_v58 = vadd.f32 %v2896_v57, %v2802_v48 }
0x2329   :  { %4972 = vtanh.f32 %v2898_v58 }
0x2333   :  { %v4973_v59 = vpop.eup %4972 }
0x2334   :  { %2901 = vrot.lane.b32.xlu1 %v4973_v59, %s5223_s14 }
0x23a6   :  { %v2902_v10 = vpop.permute.xlu1 %2901 }
0x23a7   :  { %v2904_v41 = vsub.f32 %v5713_v42, %v2902_v10  ;;  %v3478_v10 = vld [vmem:[#allocation3 + $0xe] sm:$0x3] }
0x23a9   :  { %v2905_v5 = vmul.f32 %v4971_v53, %v2904_v41 }
0x23ab   :  { %2907 = vrot.lane.b32.xlu0 %v2905_v5, %s5223_s14 }
0x241d   :  { %v2908_v13 = vpop.permute.xlu0 %2907 }
0x241e   :  { %v2910_v14 = vadd.f32 %v4973_v59, %v2908_v13 }
0x2420   :  { %2912 = vrot.lane.b32.xlu1 %v2910_v14, %s5223_s14 }
0x2492   :  { %v2913_v42 = vpop.permute.xlu1 %2912 }
0x2493   :  { %2915 = vst.msk [vmem:[#allocation2 + $0x2] sm:$0x3] %vm140_vm1, %v2913_v42  ;;  %4564 = vmatmul.mubr.msk.f32.vlgmr.msra.gmra.mrb[28].mxu1 %vm232_vm3, %v2913_v42 }
0x2494   :  { %4835 = vmatpush3.bf16.msra.mxu1 %v5690_v61  ;;  %4581 = vmatprep.mubr.msk.f32.mxu1 %vm5220_vm0, %v5221_v1 }
0x2495   :  { %4836 = vmatprep.subr.bf16.mxu1 %v5219_v0 }
0x2498   :  { %4838 = vmatpush3.bf16.msra.mxu1 %v5695_v3 }
0x2499   :  { %4845 = vmatprep.subr.bf16.mxu1 %v5219_v0 }
0x249a   :  { %v5787_v40 = vld [vmem:[#allocation2 + $0x2] sm:$0x3] }
0x249b   :  { %4582 = vmatmul.mubr.msk.f32.vlgmr.msra.gmra.mrb[30].mxu1 %vm232_vm3, %v3003_v15 }
0x249c   :  { %4847 = vmatpush3.bf16.msra.mxu1 %v5701_v7  ;;  %4603 = vmatprep.mubr.msk.f32.mxu1 %vm5220_vm0, %v5221_v1 }
0x249d   :  { %4848 = vmatprep.subr.bf16.mxu1 %v5219_v0 }
0x24a0   :  { %4850 = vmatpush3.bf16.msra.mxu1 %v5706_v11 }
0x24a1   :  { %4857 = vmatprep.subr.bf16.mxu1 %v5219_v0 }
0x24a3   :  { %4604 = vmatmul.mubr.msk.f32.vlgmr.msra.gmra.mrb[32].mxu1 %vm232_vm3, %v5787_v40 }
0x24a4   :  { %4859 = vmatpush3.bf16.msra.mxu1 %v5682_v55  ;;  %4621 = vmatprep.mubr.msk.f32.mxu1 %vm5220_vm0, %v5221_v1 }
0x24a5   :  { %4866 = vmatprep.subr.bf16.mxu1 %v5219_v0 }
0x24a7   :  { %4622 = vmatmul.mubr.msk.f32.vlgmr.msra.gmra.mrb[34].mxu1 %vm154_vm2, %v3478_v10 }
0x24a8   :  { %4868 = vmatpush3.bf16.msra.mxu1 %v5731_v35  ;;  %4643 = vmatprep.mubr.msk.f32.mxu1 %vm5220_vm0, %v5221_v1 }
0x24a9   :  { %4869 = vmatprep.subr.bf16.mxu1 %v5219_v0 }
0x24ac   :  { %4871 = vmatpush3.bf16.msra.mxu1 %v5734_v37 }
0x24ad   :  { %4878 = vmatprep.subr.bf16.mxu1 %v5219_v0 }
0x2566   :  { %v2995_v20 = vpop.f32.mrb[28].mxu1 }
0x2567   :  { %v2996_v22 = vadd.f32 %v5798_v19, %v2995_v20  ;;  %v4565_v23 = vpop.f32.mrb[29].mxu1 }
0x2569   :  { %3000 = vst [vmem:[#allocation15 + $0xa] sm:$0x3] %v2996_v22 }
0x256e   :  { %v3159_v24 = vpop.f32.mrb[30].mxu1 }
0x256f   :  { %3171 = vrot.lane.b32.xlu0 %v3159_v24, %s5222_s8  ;;  %v4583_v55 = vpop.f32.mrb[31].mxu1  ;;  %v3163_v28 = vadd.f32 %v3159_v24, %v3083_v27 }
0x2571   :  { %v4059_v9 = vmul.f32 -1.442695, %v3163_v28 }
0x2573   :  { %4974 = vpow2.f32 %v4059_v9 }
0x2576   :  { %v3354_v26 = vpop.f32.mrb[32].mxu1 }
0x2577   :  { %v4605_v25 = vpop.f32.mrb[33].mxu1 }
0x257d   :  { %v4975_v29 = vpop.eup %4974 }
0x257e   :  { %v3167_v30 = vadd.f32 1.0, %v4975_v29 }
0x2580   :  { %4976 = vrcp.f32 %v3167_v30 }
0x258a   :  { %v4977_v31 = vpop.eup %4976 }
0x25e1   :  { %v3172_v18 = vpop.permute.xlu0 %3171 }
0x25e2   :  { %v3174_v32 = vmul.f32 %v4977_v31, %v3172_v18 }
0x25e4   :  { %3176 = vrot.lane.b32.xlu1 %v3174_v32, %s5209_s27 }
0x2656   :  { %v3177_v34 = vpop.permute.xlu1 %3176 }
0x2657   :  { %v3179_v36 = vadd.f32 %v3177_v34, %v3083_v27 }
0x2659   :  { %4978 = vtanh.f32 %v3179_v36 }
0x2663   :  { %v4979_v38 = vpop.eup %4978 }
0x2664   :  { %3182 = vrot.lane.b32.xlu0 %v4979_v38, %s5223_s14 }
0x26d6   :  { %v3183_v39 = vpop.permute.xlu0 %3182 }
0x26d7   :  { %v3185_v43 = vsub.f32 %v3003_v15, %v3183_v39 }
0x26d9   :  { %v3186_v44 = vmul.f32 %v4977_v31, %v3185_v43 }
0x26db   :  { %3188 = vrot.lane.b32.xlu1 %v3186_v44, %s5223_s14 }
0x26df   :  { %3366 = vrot.lane.b32.xlu1 %v3354_v26, %s5222_s8 }
0x274d   :  { %v3189_v45 = vpop.permute.xlu1 %3188 }
0x274e   :  { %v3191_v8 = vadd.f32 %v4979_v38, %v3189_v45 }
0x2750   :  { %3193 = vrot.lane.b32.xlu0 %v3191_v8, %s5223_s14 }
0x2751   :  { %v3367_v56 = vpop.permute.xlu1 %3366 }
0x27c2   :  { %v3194_v47 = vpop.permute.xlu0 %3193 }
0x27c3   :  { %3196 = vst.msk [vmem:[#allocation2] sm:$0x3] %vm140_vm1, %v3194_v47  ;;  %4593 = vmatmul.mubr.msk.f32.vlgmr.msra.gmra.mrb[32].mxu0 %vm232_vm3, %v3194_v47 }
0x27c4   :  { %4853 = vmatpush3.bf16.msra.mxu0 %v5754_v2  ;;  %4614 = vmatprep.mubr.msk.f32.mxu0 %vm5220_vm0, %v5221_v1 }
0x27c5   :  { %4854 = vmatprep.subr.bf16.mxu0 %v5219_v0 }
0x27c8   :  { %4856 = vmatpush3.bf16.msra.mxu0 %v5757_v6 }
0x27c9   :  { %4860 = vmatprep.subr.bf16.mxu0 %v5219_v0 }
0x27ca   :  { %v3479_v35 = vld [vmem:[#allocation2] sm:$0x3] }
0x2896   :  { %v3277_v48 = vpop.f32.mrb[32].mxu0 }
0x2897   :  { %v3278_v49 = vadd.f32 %v5749_v46, %v3277_v48  ;;  %v4594_v12 = vpop.f32.mrb[33].mxu0 }
0x2899   :  { %v3358_v50 = vadd.f32 %v3354_v26, %v3278_v49 }
0x289b   :  { %v4063_v52 = vmul.f32 -1.442695, %v3358_v50 }
0x289d   :  { %4980 = vpow2.f32 %v4063_v52 }
0x28a7   :  { %v4981_v51 = vpop.eup %4980 }
0x28a8   :  { %v3362_v53 = vadd.f32 1.0, %v4981_v51 }
0x28aa   :  { %4982 = vrcp.f32 %v3362_v53 }
0x28b4   :  { %v4983_v54 = vpop.eup %4982 }
0x28b5   :  { %v3369_v57 = vmul.f32 %v4983_v54, %v3367_v56 }
0x28b7   :  { %3371 = vrot.lane.b32.xlu0 %v3369_v57, %s5209_s27 }
0x2929   :  { %v3372_v58 = vpop.permute.xlu0 %3371 }
0x292a   :  { %v3374_v59 = vadd.f32 %v3372_v58, %v3278_v49 }
0x292c   :  { %4984 = vtanh.f32 %v3374_v59 }
0x2936   :  { %v4985_v60 = vpop.eup %4984 }
0x2937   :  { %3377 = vrot.lane.b32.xlu1 %v4985_v60, %s5223_s14 }
0x29a9   :  { %v3378_v62 = vpop.permute.xlu1 %3377 }
0x29aa   :  { %v3380_v63 = vsub.f32 %v5787_v40, %v3378_v62 }
0x29ac   :  { %v3381_v4 = vmul.f32 %v4983_v54, %v3380_v63 }
0x29ae   :  { %3383 = vrot.lane.b32.xlu0 %v3381_v4, %s5223_s14 }
0x2a20   :  { %v3384_v41 = vpop.permute.xlu0 %3383 }
0x2a21   :  { %v3386_v5 = vadd.f32 %v4985_v60, %v3384_v41 }
0x2a23   :  { %3388 = vrot.lane.b32.xlu1 %v3386_v5, %s5223_s14 }
0x2a95   :  { %v3389_v33 = vpop.permute.xlu1 %3388 }
0x2a96   :  { %3391 = vst.msk [vmem:[#allocation2 + $0x2] sm:$0x3] %vm140_vm1, %v3389_v33  ;;  %4615 = vmatmul.mubr.msk.f32.vlgmr.msra.gmra.mrb[34].mxu0 %vm232_vm3, %v3389_v33 }
0x2a97   :  { %4862 = vmatpush3.bf16.msra.mxu0 %v5690_v61  ;;  %4632 = vmatprep.mubr.msk.f32.mxu0 %vm5220_vm0, %v5221_v1 }
0x2a98   :  { %4863 = vmatprep.subr.bf16.mxu0 %v5219_v0 }
0x2a9b   :  { %4865 = vmatpush3.bf16.msra.mxu0 %v5695_v3  ;;  %v3558_v3 = vpop.f32.mrb[34].mxu1 }
0x2a9c   :  { %4872 = vmatprep.subr.bf16.mxu0 %v5219_v0  ;;  %v4623_v37 = vpop.f32.mrb[35].mxu1 }
0x2a9d   :  { %v5843_v61 = vld [vmem:[#allocation2 + $0x2] sm:$0x3] }
0x2a9e   :  { %4633 = vmatmul.mubr.msk.f32.vlgmr.msra.gmra.mrb[36].mxu0 %vm232_vm3, %v3479_v35 }
0x2a9f   :  { %4874 = vmatpush3.bf16.msra.mxu0 %v5701_v7  ;;  %4654 = vmatprep.mubr.msk.f32.mxu0 %vm5220_vm0, %v5221_v1 }
0x2aa0   :  { %4875 = vmatprep.subr.bf16.mxu0 %v5219_v0 }
0x2aa3   :  { %4877 = vmatpush3.bf16.msra.mxu0 %v5706_v11  ;;  %v3559_v11 = vadd.f32 %v5726_v21, %v3558_v3 }
0x2aa6   :  { %4655 = vmatmul.mubr.msk.f32.vlgmr.msra.gmra.mrb[38].mxu0 %vm232_vm3, %v5843_v61 }
0x2b69   :  { %v3471_v13 = vpop.f32.mrb[34].mxu0 }
0x2b6a   :  { %v3472_v14 = vadd.f32 %v5798_v19, %v3471_v13  ;;  %v4616_v42 = vpop.f32.mrb[35].mxu0 }
0x2b6c   :  { %3476 = vst [vmem:[#allocation15 + $0xc] sm:$0x3] %v3472_v14 }
0x2b71   :  { %v3635_v7 = vpop.f32.mrb[36].mxu0 }
0x2b72   :  { %3647 = vrot.lane.b32.xlu0 %v3635_v7, %s5222_s8  ;;  %v4634_v15 = vpop.f32.mrb[37].mxu0  ;;  %v3639_v17 = vadd.f32 %v3635_v7, %v3559_v11 }
0x2b74   :  { %v4069_v20 = vmul.f32 -1.442695, %v3639_v17 }
0x2b76   :  { %4986 = vpow2.f32 %v4069_v20 }
0x2b79   :  { %v3830_v40 = vpop.f32.mrb[38].mxu0 }
0x2b7a   :  { %v4656_v16 = vpop.f32.mrb[39].mxu0 }
0x2b80   :  { %v4987_v22 = vpop.eup %4986 }
0x2b81   :  { %v3643_v23 = vadd.f32 1.0, %v4987_v22 }
0x2b83   :  { %4988 = vrcp.f32 %v3643_v23 }
0x2b8d   :  { %v4989_v24 = vpop.eup %4988 }
0x2be4   :  { %v3648_v55 = vpop.permute.xlu0 %3647 }
0x2be5   :  { %v3650_v26 = vmul.f32 %v4989_v24, %v3648_v55 }
0x2be7   :  { %3652 = vrot.lane.b32.xlu1 %v3650_v26, %s5209_s27 }
0x2c59   :  { %v3653_v25 = vpop.permute.xlu1 %3652 }
0x2c5a   :  { %v3655_v27 = vadd.f32 %v3653_v25, %v3559_v11 }
0x2c5c   :  { %4990 = vtanh.f32 %v3655_v27 }
0x2c66   :  { %v4991_v28 = vpop.eup %4990 }
0x2c67   :  { %3658 = vrot.lane.b32.xlu0 %v4991_v28, %s5223_s14 }
0x2cd9   :  { %v3659_v9 = vpop.permute.xlu0 %3658 }
0x2cda   :  { %v3661_v29 = vsub.f32 %v3479_v35, %v3659_v9 }
0x2cdc   :  { %v3662_v21 = vmul.f32 %v4989_v24, %v3661_v29 }
0x2cde   :  { %3664 = vrot.lane.b32.xlu1 %v3662_v21, %s5223_s14 }
0x2ce2   :  { %3842 = vrot.lane.b32.xlu1 %v3830_v40, %s5222_s8 }
0x2d50   :  { %v3665_v30 = vpop.permute.xlu1 %3664 }
0x2d51   :  { %v3667_v31 = vadd.f32 %v4991_v28, %v3665_v30 }
0x2d53   :  { %3669 = vrot.lane.b32.xlu0 %v3667_v31, %s5223_s14 }
0x2d54   :  { %v3843_v8 = vpop.permute.xlu1 %3842 }
0x2dc5   :  { %v3670_v18 = vpop.permute.xlu0 %3669 }
0x2dc6   :  { %3672 = vst.msk [vmem:[#allocation2] sm:$0x3] %vm140_vm1, %v3670_v18  ;;  %4644 = vmatmul.mubr.msk.f32.vlgmr.msra.gmra.mrb[36].mxu1 %vm232_vm3, %v3670_v18 }
0x2dc7   :  { %4880 = vmatpush3.bf16.msra.mxu1 %v5754_v2  ;;  %4665 = vmatprep.mubr.msk.f32.mxu1 %vm5220_vm0, %v5221_v1 }
0x2dc8   :  { %4881 = vmatprep.subr.bf16.mxu1 %v5219_v0 }
0x2dcb   :  { %4883 = vmatpush3.bf16.msra.mxu1 %v5757_v6 }
0x2dcd   :  { %v3956_v32 = vld [vmem:[#allocation2] sm:$0x3] }
0x2dce   :  { %3958 = vst.msk [vmem:[#allocation16] sm:$0x3] %vm140_vm1, %v3956_v32 }
0x2e99   :  { %v3753_v34 = vpop.f32.mrb[36].mxu1 }
0x2e9a   :  { %v3754_v36 = vadd.f32 %v5749_v46, %v3753_v34  ;;  %v4645_v38 = vpop.f32.mrb[37].mxu1 }
0x2e9c   :  { %v3834_v39 = vadd.f32 %v3830_v40, %v3754_v36 }
0x2e9e   :  { %v4073_v43 = vmul.f32 -1.442695, %v3834_v39 }
0x2ea0   :  { %4992 = vpow2.f32 %v4073_v43 }
0x2eaa   :  { %v4993_v44 = vpop.eup %4992 }
0x2eab   :  { %v3838_v45 = vadd.f32 1.0, %v4993_v44 }
0x2ead   :  { %4994 = vrcp.f32 %v3838_v45 }
0x2eb7   :  { %v4995_v2 = vpop.eup %4994 }
0x2eb8   :  { %v3845_v1 = vmul.f32 %v4995_v2, %v3843_v8 }
0x2eba   :  { %3847 = vrot.lane.b32.xlu0 %v3845_v1, %s5209_s27 }
0x2f2c   :  { %v3848_v0 = vpop.permute.xlu0 %3847 }
0x2f2d   :  { %v3850_v6 = vadd.f32 %v3848_v0, %v3754_v36 }
0x2f2f   :  { %4996 = vtanh.f32 %v3850_v6 }
0x2f39   :  { %v4997_v47 = vpop.eup %4996 }
0x2f3a   :  { %3853 = vrot.lane.b32.xlu1 %v4997_v47, %s5223_s14 }
0x2fac   :  { %v3854_v48 = vpop.permute.xlu1 %3853 }
0x2fad   :  { %v3856_v46 = vsub.f32 %v5843_v61, %v3854_v48 }
0x2faf   :  { %v3857_v49 = vmul.f32 %v4995_v2, %v3856_v46 }
0x2fb1   :  { %3859 = vrot.lane.b32.xlu0 %v3857_v49, %s5223_s14 }
0x3023   :  { %v3860_v12 = vpop.permute.xlu0 %3859 }
0x3024   :  { %v3862_v50 = vadd.f32 %v4997_v47, %v3860_v12 }
0x3026   :  { %3864 = vrot.lane.b32.xlu1 %v3862_v50, %s5223_s14 }
0x3098   :  { %v3865_v52 = vpop.permute.xlu1 %3864 }
0x3099   :  { %3867 = vst.msk [vmem:[#allocation2 + $0x2] sm:$0x3] %vm140_vm1, %v3865_v52  ;;  %4666 = vmatmul.mubr.msk.f32.vlgmr.msra.gmra.mrb[38].mxu1 %vm232_vm3, %v3865_v52 }
0x30a0   :  { %v3957_v51 = vld [vmem:[#allocation2 + $0x2] sm:$0x3] }
0x30a1   :  { %3959 = vst.msk [vmem:[#allocation16 + $0x2] sm:$0x3] %vm140_vm1, %v3957_v51 }
0x30a2   :  { %5163 = shalt.err (!%p5160_p4)
}
0x30a3   :  { %s5164_s25 = scalar_lea.hbm %s5914_s11, 64 }
0x30a4   :  { %p5165_p5 = scmp.ne.s32.totalorder %s5914_s11, %s5164_s25  ;;  %p5168_p6 = scmp.lt.u32.totalorder %s5164_s25, %s5914_s11 }
0x30a6   :  { %p5170_p7 = pnand %p5168_p6, %p5165_p5 }
0x30a8   :  { %5173 = shalt.err (!%p5170_p7)
}
0x30a9   :  { %3983 = dma.vmem_to_hbm [thread:$0]  %s3978_s1, 64, %s5914_s11, [#allocation17], %s5209_s27, %s5209_s27, %s5210_s28  }
0x30aa   :  { %s5225_s30 = smov [#allocation15]  }
0x30ab   :  { %s3965_s8 = sshll.u32 %s5225_s30, 4  ;;  %s3966_s8 = int_to_ptr.vmem [resolvable:$true] %s3965_s8 }
0x30ac   :  { %s5174_s18 = scalar_lea.vmem %s3966_s8, 256  ;;  %p5179_p9 = scmp.lt.s32.totalorder %s3966_s8, %s3966_s8 }
0x30ad   :  { %p5175_p8 = scmp.ne.s32.totalorder %s3966_s8, %s5174_s18  ;;  %p5180_p10 = scmp.lt.s32.totalorder %s5174_s18, %s5174_s18 }
0x30af   :  { %p5181_p11 = por %p5180_p10, %p5179_p9 }
0x30b1   :  { %p5182_p12 = pnand %p5181_p11, %p5175_p8 }
0x316c   :  { %v3947_v53 = vpop.f32.mrb[38].mxu1 }
0x316d   :  { %v3948_v54 = vadd.f32 %v5798_v19, %v3947_v53  ;;  %v4667_v56 = vpop.f32.mrb[39].mxu1 }
0x316f   :  { %3952 = vst [vmem:[#allocation15 + $0xe] sm:$0x3] %v3948_v54 }
0x3170   :  { %5185 = shalt.err (!%p5182_p12)
}
0x3171   :  { %s5186_s16 = scalar_lea.hbm %s5913_s10, 256 }
0x3172   :  { %p5187_p13 = scmp.ne.s32.totalorder %s5913_s10, %s5186_s16  ;;  %p5190_p0 = scmp.lt.u32.totalorder %s5186_s16, %s5913_s10 }
0x3174   :  { %p5192_p1 = pnand %p5190_p0, %p5187_p13 }
0x3176   :  { %5195 = shalt.err (!%p5192_p1)
}
0x3177   :  { %3971 = dma.vmem_to_hbm [thread:$0]  %s3966_s8, 256, %s5913_s10, [#allocation5], %s5209_s27, %s5209_s27, %s5210_s28  }
0x3178   :  { %5204 = dma.done.wait [#allocation5], 256  }
0x3179   :  { %5205 = vsyncadd [#allocation5], 4294967040 }
0x317a   :  { %5206 = dma.done.wait [#allocation17], 64  }
0x317b   :  { %5207 = vsyncadd [#allocation17], 4294967232 }
0x317c   :  { %3990 = vsyncpa [#allocation4], 1 }
0x317d   :  { %3991 = vsyncpa [#allocation7], 1 }
0x317e   :  { %3992 = vsyncpa [#allocation10], 1 }
0x317f   :  { %3993 = vsyncpa [#allocation13], 1 }
0x3180   :  { %3994 = vsyncpa [#allocation5], 1 }
0x3181   :  { %3995 = vsyncpa [#allocation17], 1 }

</bundles_post_ra>
